<compile_context>
chip_gen: v6e
topology: v6e:2x2x1
jax: 0.10.0
libtpu: 0.0.40
codegen_flags: <defaults>
</compile_context>

<pallas_src>
import functools

import jax
import jax.numpy as jnp
from jax import lax
from jax.experimental import pallas as pl
from jax.experimental.pallas import tpu as pltpu

_VMEM_LIMIT_BYTES = 48 * 1024 * 1024   # safe on v7x (64 MiB phys), generous on v5e/v6e
_APPROX_SOFTMAX_RECIP = True           # EUP reciprocal; set False for exact softmax


def _round_up(x, m):
    return ((x + m - 1) // m) * m


@functools.lru_cache(maxsize=None)
def _tm_max_for_device():
    """Row-tile cap: ~1024 on 128-MiB-VMEM chips (v5e/v6e), 256 on v7x (64 MiB)."""
    try:
        vmem = pltpu.get_tpu_info().vmem_capacity_bytes
        return 1024 if vmem >= (100 << 20) else 256
    except Exception:
        return 512


def _pick_row_tile(M, tm_max):
    """Row tile: multiple of 16 (bf16 sublane packing), >=2 grid steps when possible."""
    if M <= 16:
        return M                                   # single full-extent block
    half = _round_up((M + 1) // 2, 16)             # >= 2 steps so both v7x TCs get work
    return int(min(tm_max, half))


# --------------------------------------------------------------------------
# 1x1-conv-as-matmul: (M, K) @ (K, N) + b, tiled over rows (bf16 in, f32 acc)
# --------------------------------------------------------------------------

def _matmul_bias_kernel(x_ref, w_ref, b_ref, o_ref):
    acc = jnp.dot(x_ref[...], w_ref[...], preferred_element_type=jnp.float32)
    o_ref[...] = (acc + b_ref[...]).astype(o_ref.dtype)


def pointwise_proj(x2d, w, b, out_dtype=None):
    """(M, K) @ (K, N) + b via a row-tiled Pallas kernel; no pad/slice HBM copies."""
    M, K = x2d.shape
    N = w.shape[1]
    out_dtype = out_dtype or x2d.dtype
    tm = _pick_row_tile(M, _tm_max_for_device())
    grid = (pl.cdiv(M, tm),)
    return pl.pallas_call(
        _matmul_bias_kernel,
        out_shape=jax.ShapeDtypeStruct((M, N), out_dtype),
        grid=grid,
        in_specs=[
            pl.BlockSpec((tm, K), lambda i: (i, 0)),
            pl.BlockSpec((K, N), lambda i: (0, 0)),
            pl.BlockSpec((1, N), lambda i: (0, 0)),
        ],
        out_specs=pl.BlockSpec((tm, N), lambda i: (i, 0)),
        compiler_params=pltpu.CompilerParams(
            dimension_semantics=("parallel",),
            vmem_limit_bytes=_VMEM_LIMIT_BYTES),
    )(x2d, w, b.reshape(1, N))


# --------------------------------------------------------------------------
# Windowed attention: gb windows per grid step, batched einsum matmuls
# --------------------------------------------------------------------------

def _window_attn_kernel(q_ref, k_ref, v_ref, o_ref):
    # scale is pre-folded into the Q projection weights (no per-step multiply).
    q = q_ref[...]
    k = k_ref[...]
    s = jnp.einsum('gtd,gsd->gts', q, k, preferred_element_type=jnp.float32)
    s = s - jnp.max(s, axis=-1, keepdims=True)
    p = jnp.exp(s)
    denom = jnp.sum(p, axis=-1, keepdims=True)
    p = p * pl.reciprocal(denom, approx=_APPROX_SOFTMAX_RECIP)   # EUP slot
    out = jnp.einsum('gts,gsc->gtc', p.astype(v_ref.dtype), v_ref[...],
                     preferred_element_type=jnp.float32)
    o_ref[...] = out.astype(o_ref.dtype)


def _choose_window_batch(G, T, dk, dv, itemsize, gb_max=16, vmem_budget=8 << 20):
    """Windows per grid step: VMEM-bounded, padding-minimizing, >=2 grid steps."""
    per_win = 2 * T * (2 * dk + 2 * dv) * itemsize        # double-buffered q,k,v,o
    cap = max(1, min(gb_max, vmem_budget // max(per_win, 1)))
    if G <= 1:
        return 1
    n_steps = max(2, pl.cdiv(G, cap))                     # v7x: both TCs get work
    return pl.cdiv(G, n_steps)


def window_attention(q_win, k_win, v_win, out_dtype=None):
    """q_win,k_win: (G, T, dk); v_win: (G, T, dv) -> (G, T, dv)."""
    G, T, dk = q_win.shape
    dv = v_win.shape[-1]
    out_dtype = out_dtype or v_win.dtype
    gb = _choose_window_batch(G, T, dk, dv, jnp.dtype(q_win.dtype).itemsize)
    grid = (pl.cdiv(G, gb),)
    # TODO(synk): lane-dense output (pad dv -> 128) and sublane-aligned T (49 -> 56
    # with -inf key masking) are skipped at these channel counts; revisit when
    # low_dim/d_model reach production sizes.
    return pl.pallas_call(
        _window_attn_kernel,
        out_shape=jax.ShapeDtypeStruct((G, T, dv), out_dtype),
        grid=grid,
        in_specs=[
            pl.BlockSpec((gb, T, dk), lambda g: (g, 0, 0)),
            pl.BlockSpec((gb, T, dk), lambda g: (g, 0, 0)),
            pl.BlockSpec((gb, T, dv), lambda g: (g, 0, 0)),
        ],
        out_specs=pl.BlockSpec((gb, T, dv), lambda g: (g, 0, 0)),
        compiler_params=pltpu.CompilerParams(
            dimension_semantics=("parallel",),
            vmem_limit_bytes=_VMEM_LIMIT_BYTES),
    )(q_win, k_win, v_win)


# --------------------------------------------------------------------------
# BatchNorm (global batch stats, training mode) + ReLU — two-pass pipeline.
# The 1x1 out_conv matmul is already folded into V, so pass A is stats-only.
# --------------------------------------------------------------------------

def _stats_kernel(y_ref, sum_ref, sq_ref, *, m_valid, tm, ragged):
    i = pl.program_id(0)

    @pl.when(i == 0)
    def _():
        sum_ref[...] = jnp.zeros_like(sum_ref)
        sq_ref[...] = jnp.zeros_like(sq_ref)

    y = y_ref[...].astype(jnp.float32)
    if ragged:  # only emitted when M % tm != 0 (per review: skip mask otherwise)
        row = i * tm + lax.broadcasted_iota(jnp.int32, y.shape, 0)
        y = jnp.where(row < m_valid, y, 0.0)
    sum_ref[...] += jnp.sum(y, axis=0, keepdims=True)
    sq_ref[...] += jnp.sum(y * y, axis=0, keepdims=True)


def _bn_relu_kernel(y_ref, scale_ref, shift_ref, o_ref):
    y = y_ref[...].astype(jnp.float32)
    o_ref[...] = jnp.maximum(y * scale_ref[...] + shift_ref[...], 0.0).astype(o_ref.dtype)


def batchnorm_relu(y2d, gamma, beta, eps=1e-5, out_dtype=jnp.float32):
    M, N = y2d.shape
    tm = _pick_row_tile(M, _tm_max_for_device())
    grid = (pl.cdiv(M, tm),)
    ragged = (M % tm) != 0

    # Pass A: global sum / sumsq in grid-resident (1, N) accumulators.
    # NOTE: resident accumulators -> this grid axis MUST stay "arbitrary"
    # (sequential). Flipping it to "parallel" (e.g. for v7x's two TCs) silently
    # breaks the read-modify-write accumulation.
    s1, s2 = pl.pallas_call(
        functools.partial(_stats_kernel, m_valid=M, tm=tm, ragged=ragged),
        out_shape=(jax.ShapeDtypeStruct((1, N), jnp.float32),
                   jax.ShapeDtypeStruct((1, N), jnp.float32)),
        grid=grid,
        in_specs=[pl.BlockSpec((tm, N), lambda i: (i, 0))],
        out_specs=(pl.BlockSpec((1, N), lambda i: (0, 0)),
                   pl.BlockSpec((1, N), lambda i: (0, 0))),
        compiler_params=pltpu.CompilerParams(
            dimension_semantics=("arbitrary",),
            vmem_limit_bytes=_VMEM_LIMIT_BYTES),
    )(y2d)

    mean = s1 / M
    var = jnp.maximum(s2 / M - mean * mean, 0.0)          # biased var (training BN)
    bn_scale = gamma.reshape(1, N) * lax.rsqrt(var + eps)
    bn_shift = beta.reshape(1, N) - mean * bn_scale

    # Pass B: normalize with globally-correct stats + ReLU.
    return pl.pallas_call(
        _bn_relu_kernel,
        out_shape=jax.ShapeDtypeStruct((M, N), out_dtype),
        grid=grid,
        in_specs=[
            pl.BlockSpec((tm, N), lambda i: (i, 0)),
            pl.BlockSpec((1, N), lambda i: (0, 0)),
            pl.BlockSpec((1, N), lambda i: (0, 0)),
        ],
        out_specs=pl.BlockSpec((tm, N), lambda i: (i, 0)),
        compiler_params=pltpu.CompilerParams(
            dimension_semantics=("parallel",),
            vmem_limit_bytes=_VMEM_LIMIT_BYTES),
    )(y2d, bn_scale, bn_shift)


# --------------------------------------------------------------------------
# Parameter setup + one-time algebraic weight fusion
# --------------------------------------------------------------------------

def init_params(key, low_dim, high_dim, d_model, deconv_scale):
    ks = jax.random.split(key, 10)

    def rn(k, shape, scale=0.1):
        return scale * jax.random.normal(k, shape, jnp.float32)

    return {
        # ConvTranspose2d weight stored as (Cin, kH, kW, Cout)
        "deconv_w": rn(ks[0], (high_dim, deconv_scale, deconv_scale, high_dim)),
        "deconv_b": rn(ks[1], (high_dim,)),
        # 1x1 convs stored as (Cin, Cout)
        "q_w": rn(ks[2], (low_dim, d_model)),
        "q_b": rn(ks[3], (d_model,)),
        "k_w": rn(ks[4], (high_dim, d_model)),
        "k_b": rn(ks[5], (d_model,)),
        "v_w": rn(ks[6], (high_dim, high_dim)),
        "v_b": rn(ks[7], (high_dim,)),
        "scale": 1.0 / (d_model ** 0.5),                  # nn.Parameter(1/sqrt(d_model))
        "out_w": rn(ks[8], (high_dim, low_dim)),
        "out_b": rn(ks[9], (low_dim,)),
        "bn_gamma": jnp.ones((low_dim,), jnp.float32),
        "bn_beta": jnp.zeros((low_dim,), jnp.float32),
    }


def prepare_fused_params(params, compute_dtype):
    """One-time weight prep (all folds are exact algebra, done in f32)."""
    d_model = params["q_w"].shape[1]
    low_dim = params["out_w"].shape[1]
    high_dim = params["deconv_w"].shape[0]
    s = params["deconv_w"].shape[1]

    # (1) fold attention scale into the Q projection.
    q_w = params["q_w"] * params["scale"]
    q_b = params["q_b"] * params["scale"]

    # (2) fold out_conv's 1x1 (out_w, out_b) into V: softmax rows sum to 1, so
    #     channel-wise biases pass through attention unchanged.
    v_w = params["v_w"] @ params["out_w"]                          # (high_dim, low_dim)
    v_b = params["v_b"] @ params["out_w"] + params["out_b"]        # (low_dim,)

    # (3) fold the non-overlapping deconv into the joint K/V projection:
    #     KV[b, i*s+di, j*s+dj, :] = high[b,i,j,:] @ fused_w[:, di, dj, :] + fused_b
    kv_w = jnp.concatenate([params["k_w"], v_w], axis=1)           # (high_dim, dkv)
    kv_b = jnp.concatenate([params["k_b"], v_b])
    dkv = d_model + low_dim
    fused_w = jnp.einsum("cijo,oe->cije", params["deconv_w"], kv_w)
    fused_w = fused_w.reshape(high_dim, s * s * dkv)
    fused_b = jnp.tile(params["deconv_b"] @ kv_w + kv_b, s * s)

    return {
        "q_w": q_w.astype(compute_dtype), "q_b": q_b.astype(jnp.float32),
        "kv_w": fused_w.astype(compute_dtype), "kv_b": fused_b.astype(jnp.float32),
        "bn_gamma": params["bn_gamma"], "bn_beta": params["bn_beta"],
        "d_model": d_model, "low_dim": low_dim, "s": s,
    }


# --------------------------------------------------------------------------
# Module forward (layout glue in XLA, heavy lifting in Pallas)
# --------------------------------------------------------------------------

def cross_level_attention(params, low_feat_nchw, high_feat_nchw, window_size=7,
                          compute_dtype=jnp.bfloat16):
    fp = prepare_fused_params(params, compute_dtype)
    d_model, low_dim, s = fp["d_model"], fp["low_dim"], fp["s"]
    dkv = d_model + low_dim

    low = jnp.transpose(low_feat_nchw, (0, 2, 3, 1)).astype(compute_dtype)   # NCHW->NHWC
    high = jnp.transpose(high_feat_nchw, (0, 2, 3, 1)).astype(compute_dtype)
    B, H, W, _ = low.shape
    _, Hh, Wh, high_dim = high.shape
    Hu, Wu = Hh * s, Wh * s
    assert (Hu, Wu) == (H, W), "deconv output spatial size must match low_feat"

    # --- Q projection (scale pre-folded) ---
    Q = pointwise_proj(low.reshape(B * H * W, -1), fp["q_w"], fp["q_b"])
    Q = Q.reshape(B, H, W, d_model)

    # --- fused deconv + K/V (+ folded out_conv) projection straight from `high`:
    #     `high_up` never materializes; one Pallas matmul, then KV pixel-shuffle ---
    KV = pointwise_proj(high.reshape(B * Hh * Wh, high_dim), fp["kv_w"], fp["kv_b"])
    KV = KV.reshape(B, Hh, Wh, s, s, dkv).transpose(0, 1, 3, 2, 4, 5)
    KV = KV.reshape(B, Hu, Wu, dkv)
    K = KV[..., :d_model]
    V = KV[..., d_model:]                                  # already low_dim channels

    # --- reflect pad (bottom/right) to a multiple of window_size (== torch F.pad) ---
    pad_h = (window_size - H % window_size) % window_size
    pad_w = (window_size - W % window_size) % window_size
    pad = ((0, 0), (0, pad_h), (0, pad_w), (0, 0))
    Qp = jnp.pad(Q, pad, mode="reflect")
    Kp = jnp.pad(K, pad, mode="reflect")
    Vp = jnp.pad(V, pad, mode="reflect")
    Hp, Wp = H + pad_h, W + pad_w
    nh, nw = Hp // window_size, Wp // window_size
    T = window_size * window_size

    def to_windows(x):
        C = x.shape[-1]
        x = x.reshape(B, nh, window_size, nw, window_size, C)
        x = x.transpose(0, 1, 3, 2, 4, 5)
        return x.reshape(B * nh * nw, T, C)

    # TODO(synk): fold window (un)folding into the attention kernel via
    # (1, window_size, Wp, C) row-strip BlockSpecs + in-VMEM rearrangement; the
    # ws=7 sublane-splitting reshape is the lowering risk that keeps this in XLA.
    Qw, Kw, Vw = to_windows(Qp), to_windows(Kp), to_windows(Vp)

    # --- windowed attention (adaptive gb windows per grid step) ---
    aligned = window_attention(Qw, Kw, Vw)                 # (B*nh*nw, T, low_dim)
    aligned = aligned.reshape(B, nh, nw, window_size, window_size, low_dim)
    aligned = aligned.transpose(0, 1, 3, 2, 4, 5).reshape(B, Hp, Wp, low_dim)
    aligned = aligned[:, :H, :W, :]

    # --- out_conv matmul is folded into V; remaining: BN (global batch stats) + ReLU ---
    out = batchnorm_relu(aligned.reshape(B * H * W, low_dim),
                         fp["bn_gamma"], fp["bn_beta"])
    out = out.reshape(B, H, W, low_dim)
    return jnp.transpose(out, (0, 3, 1, 2))                # back to NCHW


# --------------------------------------------------------------------------

if __name__ == "__main__":
    key = jax.random.PRNGKey(0)
    B, low_dim, high_dim, d_model = 2, 8, 8, 32
    window_size, deconv_scale = 7, 2
    Hl = Wl = 16        # low_feat spatial
    Hh = Wh = 8         # high_feat spatial (deconv x2 -> matches low_feat)

    kp, kl, kh = jax.random.split(key, 3)
    params = init_params(kp, low_dim, high_dim, d_model, deconv_scale)
    low_feat = jax.random.normal(kl, (B, low_dim, Hl, Wl), jnp.float32)    # NCHW like torch
    high_feat = jax.random.normal(kh, (B, high_dim, Hh, Wh), jnp.float32)  # NCHW like torch

    fwd = jax.jit(functools.partial(cross_level_attention, window_size=window_size))
    out = jax.block_until_ready(fwd(params, low_feat, high_feat))

    assert out.shape == (B, low_dim, Hl, Wl), out.shape
    assert bool(jnp.all(jnp.isfinite(out)))
    assert bool(jnp.all(out >= 0.0))   # ReLU output
    print("KERNEL_OK")
</pallas_src>

<mosaic_0001>
module attributes {stable_mosaic.version = 11 : i64} {
  func.func @_matmul_bias_kernel(%arg0: i32, %arg1: memref<64x8xbf16, #tpu.memory_space<vmem>>, %arg2: memref<8x160xbf16, #tpu.memory_space<vmem>>, %arg3: memref<1x160xf32, #tpu.memory_space<vmem>>, %arg4: memref<64x160xbf16, #tpu.memory_space<vmem>>) attributes {dimension_semantics = [#tpu.dimension_semantics<parallel>], iteration_bounds = array<i64: 2>, scalar_prefetch = 0 : i64, scratch_operands = 0 : i64, tpu.core_type = #tpu.core_type<tc>, window_params = [{transform_indices = @transform_0, window_bounds = array<i64: 64, 8>}, {pipeline_mode = #tpu.pipeline_mode<synchronous>, transform_indices = @transform_1, window_bounds = array<i64: 8, 160>}, {pipeline_mode = #tpu.pipeline_mode<synchronous>, transform_indices = @transform_2, window_bounds = array<i64: 1, 160>}, {transform_indices = @transform_3, window_bounds = array<i64: 64, 160>}]} {
    %c0 = arith.constant 0 : index
    %c0_0 = arith.constant 0 : index
    %0 = vector.load %arg1[%c0, %c0_0] : memref<64x8xbf16, #tpu.memory_space<vmem>>, vector<64x8xbf16>
    %c0_1 = arith.constant 0 : index
    %c0_2 = arith.constant 0 : index
    %1 = vector.load %arg2[%c0_1, %c0_2] : memref<8x160xbf16, #tpu.memory_space<vmem>>, vector<8x160xbf16>
    %cst = arith.constant dense<0.000000e+00> : vector<64x160xf32>
    %2 = tpu.matmul %0, %1, %cst {dimension_numbers = #tpu.dot_dimension_numbers<[1], [0], [0], [1], [0, 0, 1, 1], [], []>} : vector<64x8xbf16>, vector<8x160xbf16>, vector<64x160xf32> -> vector<64x160xf32>
    %c0_3 = arith.constant 0 : index
    %c0_4 = arith.constant 0 : index
    %3 = vector.load %arg3[%c0_3, %c0_4] : memref<1x160xf32, #tpu.memory_space<vmem>>, vector<1x160xf32>
    %4 = vector.broadcast %3 : vector<1x160xf32> to vector<64x160xf32>
    %5 = arith.addf %2, %4 : vector<64x160xf32>
    %6 = arith.truncf %5 : vector<64x160xf32> to vector<64x160xbf16>
    %c0_5 = arith.constant 0 : index
    %c0_6 = arith.constant 0 : index
    %7 = vector.load %arg4[%c0_5, %c0_6] : memref<64x160xbf16, #tpu.memory_space<vmem>>, vector<64x160xbf16>
    tpu.vector_store %arg4[%c0_5, %c0_6], %6 {strides = array<i32>} : memref<64x160xbf16, #tpu.memory_space<vmem>>, vector<64x160xbf16>,
    return
  }
  func.func @transform_0(%arg0: i32) -> (i32, i32) {
    %c0_i32 = arith.constant 0 : i32
    %c0_i32_0 = arith.constant 0 : i32
    return %arg0, %c0_i32 : i32, i32
  }
  func.func @transform_1(%arg0: i32) -> (i32, i32) {
    %c0_i32 = arith.constant 0 : i32
    %c0_i32_0 = arith.constant 0 : i32
    %c0_i32_1 = arith.constant 0 : i32
    return %c0_i32, %c0_i32_0 : i32, i32
  }
  func.func @transform_2(%arg0: i32) -> (i32, i32) {
    %c0_i32 = arith.constant 0 : i32
    %c0_i32_0 = arith.constant 0 : i32
    %c0_i32_1 = arith.constant 0 : i32
    return %c0_i32, %c0_i32_0 : i32, i32
  }
  func.func @transform_3(%arg0: i32) -> (i32, i32) {
    %c0_i32 = arith.constant 0 : i32
    %c0_i32_0 = arith.constant 0 : i32
    return %arg0, %c0_i32 : i32, i32
  }
}

module attributes {stable_mosaic.version = 11 : i64} {
  func.func @_matmul_bias_kernel(%arg0: i32, %arg1: memref<256x8xbf16, #tpu.memory_space<vmem>>, %arg2: memref<8x32xbf16, #tpu.memory_space<vmem>>, %arg3: memref<1x32xf32, #tpu.memory_space<vmem>>, %arg4: memref<256x32xbf16, #tpu.memory_space<vmem>>) attributes {dimension_semantics = [#tpu.dimension_semantics<parallel>], iteration_bounds = array<i64: 2>, scalar_prefetch = 0 : i64, scratch_operands = 0 : i64, tpu.core_type = #tpu.core_type<tc>, window_params = [{transform_indices = @transform_0, window_bounds = array<i64: 256, 8>}, {pipeline_mode = #tpu.pipeline_mode<synchronous>, transform_indices = @transform_1, window_bounds = array<i64: 8, 32>}, {pipeline_mode = #tpu.pipeline_mode<synchronous>, transform_indices = @transform_2, window_bounds = array<i64: 1, 32>}, {transform_indices = @transform_3, window_bounds = array<i64: 256, 32>}]} {
    %c0 = arith.constant 0 : index
    %c0_0 = arith.constant 0 : index
    %0 = vector.load %arg1[%c0, %c0_0] : memref<256x8xbf16, #tpu.memory_space<vmem>>, vector<256x8xbf16>
    %c0_1 = arith.constant 0 : index
    %c0_2 = arith.constant 0 : index
    %1 = vector.load %arg2[%c0_1, %c0_2] : memref<8x32xbf16, #tpu.memory_space<vmem>>, vector<8x32xbf16>
    %cst = arith.constant dense<0.000000e+00> : vector<256x32xf32>
    %2 = tpu.matmul %0, %1, %cst {dimension_numbers = #tpu.dot_dimension_numbers<[1], [0], [0], [1], [0, 0, 1, 1], [], []>} : vector<256x8xbf16>, vector<8x32xbf16>, vector<256x32xf32> -> vector<256x32xf32>
    %c0_3 = arith.constant 0 : index
    %c0_4 = arith.constant 0 : index
    %3 = vector.load %arg3[%c0_3, %c0_4] : memref<1x32xf32, #tpu.memory_space<vmem>>, vector<1x32xf32>
    %4 = vector.broadcast %3 : vector<1x32xf32> to vector<256x32xf32>
    %5 = arith.addf %2, %4 : vector<256x32xf32>
    %6 = arith.truncf %5 : vector<256x32xf32> to vector<256x32xbf16>
    %c0_5 = arith.constant 0 : index
    %c0_6 = arith.constant 0 : index
    %7 = vector.load %arg4[%c0_5, %c0_6] : memref<256x32xbf16, #tpu.memory_space<vmem>>, vector<256x32xbf16>
    tpu.vector_store %arg4[%c0_5, %c0_6], %6 {strides = array<i32>} : memref<256x32xbf16, #tpu.memory_space<vmem>>, vector<256x32xbf16>,
    return
  }
  func.func @transform_0(%arg0: i32) -> (i32, i32) {
    %c0_i32 = arith.constant 0 : i32
    %c0_i32_0 = arith.constant 0 : i32
    return %arg0, %c0_i32 : i32, i32
  }
  func.func @transform_1(%arg0: i32) -> (i32, i32) {
    %c0_i32 = arith.constant 0 : i32
    %c0_i32_0 = arith.constant 0 : i32
    %c0_i32_1 = arith.constant 0 : i32
    return %c0_i32, %c0_i32_0 : i32, i32
  }
  func.func @transform_2(%arg0: i32) -> (i32, i32) {
    %c0_i32 = arith.constant 0 : i32
    %c0_i32_0 = arith.constant 0 : i32
    %c0_i32_1 = arith.constant 0 : i32
    return %c0_i32, %c0_i32_0 : i32, i32
  }
  func.func @transform_3(%arg0: i32) -> (i32, i32) {
    %c0_i32 = arith.constant 0 : i32
    %c0_i32_0 = arith.constant 0 : i32
    return %arg0, %c0_i32 : i32, i32
  }
}

module attributes {stable_mosaic.version = 11 : i64} {
  func.func @_window_attn_kernel(%arg0: i32, %arg1: memref<9x49x32xbf16, #tpu.memory_space<vmem>>, %arg2: memref<9x49x32xbf16, #tpu.memory_space<vmem>>, %arg3: memref<9x49x8xbf16, #tpu.memory_space<vmem>>, %arg4: memref<9x49x8xbf16, #tpu.memory_space<vmem>>) attributes {dimension_semantics = [#tpu.dimension_semantics<parallel>], iteration_bounds = array<i64: 2>, scalar_prefetch = 0 : i64, scratch_operands = 0 : i64, tpu.core_type = #tpu.core_type<tc>, window_params = [{transform_indices = @transform_0, window_bounds = array<i64: 9, 49, 32>}, {transform_indices = @transform_1, window_bounds = array<i64: 9, 49, 32>}, {transform_indices = @transform_2, window_bounds = array<i64: 9, 49, 8>}, {transform_indices = @transform_3, window_bounds = array<i64: 9, 49, 8>}]} {
    %c0 = arith.constant 0 : index
    %c0_0 = arith.constant 0 : index
    %c0_1 = arith.constant 0 : index
    %0 = vector.load %arg1[%c0, %c0_0, %c0_1] : memref<9x49x32xbf16, #tpu.memory_space<vmem>>, vector<9x49x32xbf16>
    %c0_2 = arith.constant 0 : index
    %c0_3 = arith.constant 0 : index
    %c0_4 = arith.constant 0 : index
    %1 = vector.load %arg2[%c0_2, %c0_3, %c0_4] : memref<9x49x32xbf16, #tpu.memory_space<vmem>>, vector<9x49x32xbf16>
    "tpu.trace_start"() <{level = 10 : i32, message = "gtd,gsd->gts"}> : () -> ()
    %cst = arith.constant dense<0.000000e+00> : vector<9x49x49xf32>
    %2 = tpu.matmul %0, %1, %cst {dimension_numbers = #tpu.dot_dimension_numbers<[2], [2], [1], [1], [0, 0, 0, 1, 1, 1], [0], [0]>} : vector<9x49x32xbf16>, vector<9x49x32xbf16>, vector<9x49x49xf32> -> vector<9x49x49xf32>
    "tpu.trace_stop"() : () -> ()
    %cst_5 = arith.constant dense<0xFF800000> : vector<9x49xf32>
    %3 = vector.multi_reduction <maximumf>, %2, %cst_5 [2] : vector<9x49x49xf32> to vector<9x49xf32>
    %4 = vector.shape_cast %3 : vector<9x49xf32> to vector<9x49x1xf32>
    %5 = vector.broadcast %4 : vector<9x49x1xf32> to vector<9x49x49xf32>
    %6 = arith.subf %2, %5 : vector<9x49x49xf32>
    %7 = math.exp %6 : vector<9x49x49xf32>
    %cst_6 = arith.constant dense<0.000000e+00> : vector<9x49xf32>
    %8 = vector.multi_reduction <add>, %7, %cst_6 [2] : vector<9x49x49xf32> to vector<9x49xf32>
    %9 = vector.shape_cast %8 : vector<9x49xf32> to vector<9x49x1xf32>
    %10 = tpu.reciprocal %9 {approx = true} : vector<9x49x1xf32> -> vector<9x49x1xf32>
    %11 = vector.broadcast %10 : vector<9x49x1xf32> to vector<9x49x49xf32>
    %12 = arith.mulf %7, %11 : vector<9x49x49xf32>
    %13 = arith.truncf %12 : vector<9x49x49xf32> to vector<9x49x49xbf16>
    %c0_7 = arith.constant 0 : index
    %c0_8 = arith.constant 0 : index
    %c0_9 = arith.constant 0 : index
    %14 = vector.load %arg3[%c0_7, %c0_8, %c0_9] : memref<9x49x8xbf16, #tpu.memory_space<vmem>>, vector<9x49x8xbf16>
    "tpu.trace_start"() <{level = 10 : i32, message = "gts,gsc->gtc"}> : () -> ()
    %cst_10 = arith.constant dense<0.000000e+00> : vector<9x49x8xf32>
    %15 = tpu.matmul %13, %14, %cst_10 {dimension_numbers = #tpu.dot_dimension_numbers<[2], [1], [1], [2], [0, 0, 0, 1, 1, 2], [0], [0]>} : vector<9x49x49xbf16>, vector<9x49x8xbf16>, vector<9x49x8xf32> -> vector<9x49x8xf32>
    "tpu.trace_stop"() : () -> ()
    %16 = arith.truncf %15 : vector<9x49x8xf32> to vector<9x49x8xbf16>
    %c0_11 = arith.constant 0 : index
    %c0_12 = arith.constant 0 : index
    %c0_13 = arith.constant 0 : index
    %17 = vector.load %arg4[%c0_11, %c0_12, %c0_13] : memref<9x49x8xbf16, #tpu.memory_space<vmem>>, vector<9x49x8xbf16>
    tpu.vector_store %arg4[%c0_11, %c0_12, %c0_13], %16 {strides = array<i32>} : memref<9x49x8xbf16, #tpu.memory_space<vmem>>, vector<9x49x8xbf16>,
    return
  }
  func.func @transform_0(%arg0: i32) -> (i32, i32, i32) {
    %c0_i32 = arith.constant 0 : i32
    %c0_i32_0 = arith.constant 0 : i32
    %c0_i32_1 = arith.constant 0 : i32
    return %arg0, %c0_i32, %c0_i32_0 : i32, i32, i32
  }
  func.func @transform_1(%arg0: i32) -> (i32, i32, i32) {
    %c0_i32 = arith.constant 0 : i32
    %c0_i32_0 = arith.constant 0 : i32
    %c0_i32_1 = arith.constant 0 : i32
    return %arg0, %c0_i32, %c0_i32_0 : i32, i32, i32
  }
  func.func @transform_2(%arg0: i32) -> (i32, i32, i32) {
    %c0_i32 = arith.constant 0 : i32
    %c0_i32_0 = arith.constant 0 : i32
    %c0_i32_1 = arith.constant 0 : i32
    return %arg0, %c0_i32, %c0_i32_0 : i32, i32, i32
  }
  func.func @transform_3(%arg0: i32) -> (i32, i32, i32) {
    %c0_i32 = arith.constant 0 : i32
    %c0_i32_0 = arith.constant 0 : i32
    %c0_i32_1 = arith.constant 0 : i32
    return %arg0, %c0_i32, %c0_i32_0 : i32, i32, i32
  }
}

module attributes {stable_mosaic.version = 11 : i64} {
  func.func @_stats_kernel(%arg0: i32, %arg1: memref<256x8xbf16, #tpu.memory_space<vmem>>, %arg2: memref<1x8xf32, #tpu.memory_space<vmem>>, %arg3: memref<1x8xf32, #tpu.memory_space<vmem>>) attributes {dimension_semantics = [#tpu.dimension_semantics<arbitrary>], iteration_bounds = array<i64: 2>, scalar_prefetch = 0 : i64, scratch_operands = 0 : i64, tpu.core_type = #tpu.core_type<tc>, window_params = [{transform_indices = @transform_0, window_bounds = array<i64: 256, 8>}, {pipeline_mode = #tpu.pipeline_mode<synchronous>, transform_indices = @transform_1, window_bounds = array<i64: 1, 8>}, {pipeline_mode = #tpu.pipeline_mode<synchronous>, transform_indices = @transform_2, window_bounds = array<i64: 1, 8>}]} {
    %c0_i32 = arith.constant 0 : i32
    %0 = arith.cmpi eq, %arg0, %c0_i32 : i32
    %1 = arith.extui %0 : i1 to i32
    %c0_i32_0 = arith.constant 0 : i32
    %2 = arith.cmpi ne, %1, %c0_i32_0 : i32
    scf.if %2 {
      %cst_11 = arith.constant 0.000000e+00 : f32
      %16 = vector.broadcast %cst_11 : f32 to vector<1x8xf32>
      %c0_12 = arith.constant 0 : index
      %c0_13 = arith.constant 0 : index
      %17 = vector.load %arg2[%c0_12, %c0_13] : memref<1x8xf32, #tpu.memory_space<vmem>>, vector<1x8xf32>
      tpu.vector_store %arg2[%c0_12, %c0_13], %16 {strides = array<i32>} : memref<1x8xf32, #tpu.memory_space<vmem>>, vector<1x8xf32>,
      %cst_14 = arith.constant 0.000000e+00 : f32
      %18 = vector.broadcast %cst_14 : f32 to vector<1x8xf32>
      %c0_15 = arith.constant 0 : index
      %c0_16 = arith.constant 0 : index
      %19 = vector.load %arg3[%c0_15, %c0_16] : memref<1x8xf32, #tpu.memory_space<vmem>>, vector<1x8xf32>
      tpu.vector_store %arg3[%c0_15, %c0_16], %18 {strides = array<i32>} : memref<1x8xf32, #tpu.memory_space<vmem>>, vector<1x8xf32>,
    } else {
    }
    %c0 = arith.constant 0 : index
    %c0_1 = arith.constant 0 : index
    %3 = vector.load %arg1[%c0, %c0_1] : memref<256x8xbf16, #tpu.memory_space<vmem>>, vector<256x8xbf16>
    %4 = arith.extf %3 : vector<256x8xbf16> to vector<256x8xf32>
    %c0_2 = arith.constant 0 : index
    %c0_3 = arith.constant 0 : index
    %5 = vector.load %arg2[%c0_2, %c0_3] : memref<1x8xf32, #tpu.memory_space<vmem>>, vector<1x8xf32>
    %cst = arith.constant dense<0.000000e+00> : vector<8xf32>
    %6 = vector.multi_reduction <add>, %4, %cst [0] : vector<256x8xf32> to vector<8xf32>
    %7 = vector.shape_cast %6 : vector<8xf32> to vector<1x8xf32>
    %8 = arith.addf %5, %7 : vector<1x8xf32>
    %c0_4 = arith.constant 0 : index
    %c0_5 = arith.constant 0 : index
    %9 = vector.load %arg2[%c0_4, %c0_5] : memref<1x8xf32, #tpu.memory_space<vmem>>, vector<1x8xf32>
    tpu.vector_store %arg2[%c0_4, %c0_5], %8 {strides = array<i32>} : memref<1x8xf32, #tpu.memory_space<vmem>>, vector<1x8xf32>,
    %c0_6 = arith.constant 0 : index
    %c0_7 = arith.constant 0 : index
    %10 = vector.load %arg3[%c0_6, %c0_7] : memref<1x8xf32, #tpu.memory_space<vmem>>, vector<1x8xf32>
    %11 = arith.mulf %4, %4 : vector<256x8xf32>
    %cst_8 = arith.constant dense<0.000000e+00> : vector<8xf32>
    %12 = vector.multi_reduction <add>, %11, %cst_8 [0] : vector<256x8xf32> to vector<8xf32>
    %13 = vector.shape_cast %12 : vector<8xf32> to vector<1x8xf32>
    %14 = arith.addf %10, %13 : vector<1x8xf32>
    %c0_9 = arith.constant 0 : index
    %c0_10 = arith.constant 0 : index
    %15 = vector.load %arg3[%c0_9, %c0_10] : memref<1x8xf32, #tpu.memory_space<vmem>>, vector<1x8xf32>
    tpu.vector_store %arg3[%c0_9, %c0_10], %14 {strides = array<i32>} : memref<1x8xf32, #tpu.memory_space<vmem>>, vector<1x8xf32>,
    return
  }
  func.func @transform_0(%arg0: i32) -> (i32, i32) {
    %c0_i32 = arith.constant 0 : i32
    %c0_i32_0 = arith.constant 0 : i32
    return %arg0, %c0_i32 : i32, i32
  }
  func.func @transform_1(%arg0: i32) -> (i32, i32) {
    %c0_i32 = arith.constant 0 : i32
    %c0_i32_0 = arith.constant 0 : i32
    %c0_i32_1 = arith.constant 0 : i32
    return %c0_i32, %c0_i32_0 : i32, i32
  }
  func.func @transform_2(%arg0: i32) -> (i32, i32) {
    %c0_i32 = arith.constant 0 : i32
    %c0_i32_0 = arith.constant 0 : i32
    %c0_i32_1 = arith.constant 0 : i32
    return %c0_i32, %c0_i32_0 : i32, i32
  }
}

module attributes {stable_mosaic.version = 11 : i64} {
  func.func @_bn_relu_kernel(%arg0: i32, %arg1: memref<256x8xbf16, #tpu.memory_space<vmem>>, %arg2: memref<1x8xf32, #tpu.memory_space<vmem>>, %arg3: memref<1x8xf32, #tpu.memory_space<vmem>>, %arg4: memref<256x8xf32, #tpu.memory_space<vmem>>) attributes {dimension_semantics = [#tpu.dimension_semantics<parallel>], iteration_bounds = array<i64: 2>, scalar_prefetch = 0 : i64, scratch_operands = 0 : i64, tpu.core_type = #tpu.core_type<tc>, window_params = [{transform_indices = @transform_0, window_bounds = array<i64: 256, 8>}, {pipeline_mode = #tpu.pipeline_mode<synchronous>, transform_indices = @transform_1, window_bounds = array<i64: 1, 8>}, {pipeline_mode = #tpu.pipeline_mode<synchronous>, transform_indices = @transform_2, window_bounds = array<i64: 1, 8>}, {transform_indices = @transform_3, window_bounds = array<i64: 256, 8>}]} {
    %c0 = arith.constant 0 : index
    %c0_0 = arith.constant 0 : index
    %0 = vector.load %arg1[%c0, %c0_0] : memref<256x8xbf16, #tpu.memory_space<vmem>>, vector<256x8xbf16>
    %1 = arith.extf %0 : vector<256x8xbf16> to vector<256x8xf32>
    %c0_1 = arith.constant 0 : index
    %c0_2 = arith.constant 0 : index
    %2 = vector.load %arg2[%c0_1, %c0_2] : memref<1x8xf32, #tpu.memory_space<vmem>>, vector<1x8xf32>
    %3 = vector.broadcast %2 : vector<1x8xf32> to vector<256x8xf32>
    %4 = arith.mulf %1, %3 : vector<256x8xf32>
    %c0_3 = arith.constant 0 : index
    %c0_4 = arith.constant 0 : index
    %5 = vector.load %arg3[%c0_3, %c0_4] : memref<1x8xf32, #tpu.memory_space<vmem>>, vector<1x8xf32>
    %6 = vector.broadcast %5 : vector<1x8xf32> to vector<256x8xf32>
    %7 = arith.addf %4, %6 : vector<256x8xf32>
    %cst = arith.constant 0.000000e+00 : f32
    %8 = vector.broadcast %cst : f32 to vector<256x8xf32>
    %9 = arith.maximumf %7, %8 : vector<256x8xf32>
    %c0_5 = arith.constant 0 : index
    %c0_6 = arith.constant 0 : index
    %10 = vector.load %arg4[%c0_5, %c0_6] : memref<256x8xf32, #tpu.memory_space<vmem>>, vector<256x8xf32>
    tpu.vector_store %arg4[%c0_5, %c0_6], %9 {strides = array<i32>} : memref<256x8xf32, #tpu.memory_space<vmem>>, vector<256x8xf32>,
    return
  }
  func.func @transform_0(%arg0: i32) -> (i32, i32) {
    %c0_i32 = arith.constant 0 : i32
    %c0_i32_0 = arith.constant 0 : i32
    return %arg0, %c0_i32 : i32, i32
  }
  func.func @transform_1(%arg0: i32) -> (i32, i32) {
    %c0_i32 = arith.constant 0 : i32
    %c0_i32_0 = arith.constant 0 : i32
    %c0_i32_1 = arith.constant 0 : i32
    return %c0_i32, %c0_i32_0 : i32, i32
  }
  func.func @transform_2(%arg0: i32) -> (i32, i32) {
    %c0_i32 = arith.constant 0 : i32
    %c0_i32_0 = arith.constant 0 : i32
    %c0_i32_1 = arith.constant 0 : i32
    return %c0_i32, %c0_i32_0 : i32, i32
  }
  func.func @transform_3(%arg0: i32) -> (i32, i32) {
    %c0_i32 = arith.constant 0 : i32
    %c0_i32_0 = arith.constant 0 : i32
    return %arg0, %c0_i32 : i32, i32
  }
}

</mosaic_0001>

<bundles_post_ra>
// kernel: tile.9
= control target key start
LH: loop header
LB: loop body
LE: loop exit
PB: predicated region body
PF: predicated region fallthrough
CT: control target
= control target key end

     0   :  { %vm14_vm0 = vcmask 64512   ;;  %vm8_vm1 = vcmask 326656   ;;  %s54_s8 = smov 40   ;;  %s55_s9 = smov 80   ;;  %vm18_vm2 = vcmask 261120   ;;  %vm21_vm3 = vcmask 1048512   ;;  %s75_s0 = inlined_call_operand.vmem [shape: f32[4,40], index: 0, kind: input, shape index: {}]   ;;  %s76_s1 = inlined_call_operand.vmem [shape: f32[1,160], index: 1, kind: output, shape index: {}]  }
   0x1   :  { %v5_v0 = vld [vmem:[%s75_s0] sm:$0xf]  ;;  %s53_s0 = smov 120   ;;  %vm27_vm4 = vcmask 982656   ;;  %vm33_vm5 = vcmask 654656  }
   0x2   :  { %6 = vst [vmem:[#allocation1] sm:$0xf] %v5_v0 }
   0x9   :  { %v11_v1 = vld [vmem:[#allocation1 + $0x3] sm:$0x1]   ;;  %v30_v4 = vld [vmem:[#allocation1 + $0x1] sm:$0x1]   ;;  %v7_v5 = vld [vmem:[#allocation1] sm:$0x1]  }
   0xa   :  { %v13_v2 = vld [vmem:[#allocation1 + $0x3] sm:$0x1]   ;;  %31 = vrot.lane.b32.xlu1 %v30_v4, %s54_s8  ;;  %9 = vst.msk [vmem:[#allocation0] sm:$0x1] %vm8_vm1, %v7_v5   ;;  %v24_v6 = vld [vmem:[#allocation1 + $0x2] sm:$0x1]  }
   0xb   :  { %v15_v3 = vsel %vm14_vm0, %v13_v2, %v11_v1 }
   0xc   :  { %16 = vrot.lane.b32.xlu0 %v15_v3, %s53_s0 }
  0x10   :  { %25 = vrot.lane.b32.xlu0 %v24_v6, %s55_s9 }
  0x7c   :  { %v32_v8 = vpop.permute.xlu1 %31  }
  0x7e   :  { %v17_v7 = vpop.permute.xlu0 %16  }
  0x7f   :  { %20 = vst.msk [vmem:[#allocation0 + $0x8] sm:$0x1] %vm18_vm2, %v17_v7  }
  0x80   :  { %22 = vst.msk [vmem:[#allocation0] sm:$0x1] %vm21_vm3, %v17_v7  }
  0x82   :  { %v26_v9 = vpop.permute.xlu0 %25  }
  0x83   :  { %28 = vst.msk [vmem:[#allocation0] sm:$0x1] %vm27_vm4, %v26_v9  }
  0x84   :  { %34 = vst.msk [vmem:[#allocation0] sm:$0x1] %vm33_vm5, %v32_v8  }
  0x86   :  { %v44_v10 = vld [vmem:[#allocation0 + $0x8] sm:$0x1] }
  0x87   :  { %49 = vst [vmem:[%s76_s1 + $0x1] sm:$0x1] %v44_v10 }
  0x8b   :  { %v39_v11 = vld [vmem:[#allocation0] sm:$0x1] }
  0x8c   :  { %42 = vst [vmem:[%s76_s1] sm:$0x1] %v39_v11 }

// kernel: tile.8
= control target key start
LH: loop header
LB: loop body
LE: loop exit
PB: predicated region body
PF: predicated region fallthrough
CT: control target
= control target key end

     0   :  { %s22_s0 = inlined_call_operand.vmem [shape: f32[40], index: 0, kind: input, shape index: {}]   ;;  %s23_s1 = inlined_call_operand.vmem [shape: f32[4,40], index: 1, kind: output, shape index: {}]  }
   0x1   :  { %v4_v0 = vld [vmem:[%s22_s0] ss:$0 sm:$0xff] }
   0x2   :  { %5 = vst [vmem:[%s23_s1] sm:$0xf] %v4_v0 }

// kernel: cross_level_attention.6
= control target key start
LH: loop header
LB: loop body
LE: loop exit
PB: predicated region body
PF: predicated region fallthrough
CT: control target
= control target key end

     0   :  { %s518_s12 = smov 0   ;;  %s579_s0 = inlined_call_operand.vmem [shape: bf16[128,8], index: 0, kind: input, shape index: {}]   ;;  %s580_s1 = inlined_call_operand.vmem [shape: bf16[8,160], index: 1, kind: input, shape index: {}]   ;;  %s581_s2 = inlined_call_operand.vmem [shape: f32[1,160], index: 2, kind: input, shape index: {}]   ;;  %s582_s3 = inlined_call_operand.vmem [shape: bf16[128,160], index: 3, kind: output, shape index: {}]  }
   0x1 LB: > { %s432_s13 = sadd.s32 4294967295, %s495_s12   ;;  %p436_p0 = scmp.ge.s32.totalorder %s495_s12, 1  ;;  %s495_s12 = sphi %s518_s12, %s13_s12  }
   0x2   : > { %p138_p1 = scmp.lt.s32.totalorder %s495_s12, 3 }
   0x4   : > { %p139_p2 = pnand %p436_p0, %p138_p1 }
   0x5   : > { %s437_s16 = sshll.u32 (!%p139_p2), %s432_s13, 3 }
   0x6   : > { %142 = sbr.rel (%p139_p2) target bundleno = 230 (0xe6), region = 32  ;;  %p164_p3 = scmp.lt.s32.totalorder (!%p139_p2), %s437_s16, 15 }
   0xb   : > { %v185_v0 = vld [vmem:[%s580_s1] sm:$0xff]  ;;  %vm236_vm0 = vcmask 1043456   ;;  %v497_v3 = vmov 0   ;;  %s586_s16 = smov (!%p164_p3, %s437_s16), 15  ;;  %vm223_vm1 = vcmask 64512   ;;  %v188_v9 = vlaneseq }
   0xc   : > { %v447_v1 = vcombine.high %v185_v0, %v185_v0  ;;  %v446_v2 = vcombine.low %v185_v0, %v185_v0  ;;  %275 = vmatprep.mubr.bf16.mxu0 %v497_v3  ;;  %295 = vmatprep.mubr.bf16.mxu1 %v497_v3  ;;  %s438_s17 = sshll.u32 %s586_s16, 2  ;;  %v186_v13 = vld [vmem:[%s581_s2] sm:$0x3]  ;;  %vm364_vm2 = vcmask 261124   ;;  %s463_s23 = sshll.u32 %s586_s16, 3 }
   0xd   : > { %s167_s20 = scalar_lea.vmem %s579_s0, %s438_s17  ;;  %v189_v10 = vshrl.u32 %v188_v9, 7  ;;  %vm543_vm3 = vmor %vm364_vm2, %vm236_vm0  ;;  %s550_s26 = scalar_lea.vmem %s582_s3, %s463_s23 }
   0xe   : > { %448 = vmatprep.subr.msk.bf16.mxu0 %vm236_vm0, %v447_v1  ;;  %472 = vmatprep.subr.msk.bf16.mxu1 %vm236_vm0, %v447_v1  ;;  %v238_v4 = vsel %vm236_vm0, %v446_v2, 0  ;;  %v485_v5 = vld [vmem:[%s167_s20] sm:$0xff]   ;;  %v486_v6 = vld [vmem:[%s167_s20 + $0x10] sm:$0xff]   ;;  %v487_v7 = vld [vmem:[%s167_s20 + $0x8] sm:$0xff]  }
   0xf   : > { %258 = vmatpush1.bf16.msra.mxu0 %v238_v4  ;;  %473 = vmatpush1.bf16.msra.mxu1 %v238_v4  ;;  %v488_v8 = vld [vmem:[%s167_s20 + $0x18] sm:$0xff]   ;;  %v190_v11 = vsub.s32 0, %v189_v10  ;;  %v194_v12 = vsub.s32 1, %v189_v10 }
  0x11   : > { %v191_v14 = vrot.slane %v186_v13, %v190_v11  ;;  %v195_v15 = vrot.slane %v186_v13, %v194_v12 }
  0x12   : > { %449 = vmatmul.mubr.msk.bf16.vlgmr.msra.gmra.mxu0 %vm223_vm1, %v485_v5  ;;  %451 = vmatmul.mubr.msk.bf16.vlgmr.msra.gmra.mxu1 %vm223_vm1, %v486_v6 }
  0x13   : > { %285 = vmatprep.mubr.bf16.mxu0 %v497_v3  ;;  %305 = vmatprep.mubr.bf16.mxu1 %v497_v3 }
  0x1a   : > { %450 = vmatmul.mubr.msk.bf16.gmra.mxu0 %vm223_vm1, %v487_v7  ;;  %452 = vmatmul.mubr.msk.bf16.gmra.mxu1 %vm223_vm1, %v488_v8 }
  0xd2   : > { %v277_v16 = vpop.f32.mrf.mxu0  ;;  %v297_v17 = vpop.f32.mrf.mxu1 }
  0xd3   : > { %v278_v19 = vadd.f32 %v277_v16, %v191_v14  ;;  %v298_v23 = vadd.f32 %v297_v17, %v191_v14 }
  0xd4   : > { %v279_v18 = vpop.f32.mrf.mxu0  ;;  %v299_v21 = vpop.f32.mrf.mxu1 }
  0xd5   : > { %v280_v20 = vadd.f32 %v279_v18, %v195_v15  ;;  %v300_v24 = vadd.f32 %v299_v21, %v195_v15 }
  0xd6   : > { %v281_v25 = vpop.f32.mrf.mxu0  ;;  %v301_v27 = vpop.f32.mrf.mxu1 }
  0xd7   : > { %v464_v26 = vpack.c.bf16 %v280_v20, %v278_v19  ;;  %v468_v28 = vpack.c.bf16 %v300_v24, %v298_v23  ;;  %v282_v30 = vadd.f32 %v281_v25, %v191_v14  ;;  %v302_v33 = vadd.f32 %v301_v27, %v191_v14 }
  0xd8   : > { %v283_v29 = vpop.f32.mrf.mxu0  ;;  %v303_v32 = vpop.f32.mrf.mxu1 }
  0xd9   : > { %366 = vst.msk [vmem:[%s550_s26] sm:$0xff] %vm543_vm3, %v464_v26  ;;  %v284_v31 = vadd.f32 %v283_v29, %v195_v15  ;;  %370 = vst.msk [vmem:[%s550_s26 + $0x20] sm:$0xff] %vm543_vm3, %v468_v28  ;;  %v304_v34 = vadd.f32 %v303_v32, %v195_v15 }
  0xda   : > { %v287_v35 = vpop.f32.mrf.mxu0  ;;  %v307_v37 = vpop.f32.mrf.mxu1 }
  0xdb   : > { %v465_v36 = vpack.c.bf16 %v284_v31, %v282_v30  ;;  %v469_v38 = vpack.c.bf16 %v304_v34, %v302_v33  ;;  %v288_v40 = vadd.f32 %v287_v35, %v191_v14  ;;  %v308_v43 = vadd.f32 %v307_v37, %v191_v14 }
  0xdc   : > { %v289_v39 = vpop.f32.mrf.mxu0  ;;  %v309_v42 = vpop.f32.mrf.mxu1 }
  0xdd   : > { %367 = vst.msk [vmem:[%s550_s26 + $0x8] sm:$0xff] %vm543_vm3, %v465_v36  ;;  %v290_v41 = vadd.f32 %v289_v39, %v195_v15  ;;  %371 = vst.msk [vmem:[%s550_s26 + $0x28] sm:$0xff] %vm543_vm3, %v469_v38  ;;  %v310_v44 = vadd.f32 %v309_v42, %v195_v15 }
  0xde   : > { %v291_v45 = vpop.f32.mrf.mxu0  ;;  %v311_v47 = vpop.f32.mrf.mxu1 }
  0xdf   : > { %v466_v46 = vpack.c.bf16 %v290_v41, %v288_v40  ;;  %v470_v48 = vpack.c.bf16 %v310_v44, %v308_v43  ;;  %v292_v50 = vadd.f32 %v291_v45, %v191_v14  ;;  %v312_v53 = vadd.f32 %v311_v47, %v191_v14 }
  0xe0   : > { %v293_v49 = vpop.f32.mrf.mxu0  ;;  %v313_v52 = vpop.f32.mrf.mxu1 }
  0xe1   : > { %368 = vst.msk [vmem:[%s550_s26 + $0x10] sm:$0xff] %vm543_vm3, %v466_v46  ;;  %v294_v51 = vadd.f32 %v293_v49, %v195_v15  ;;  %372 = vst.msk [vmem:[%s550_s26 + $0x30] sm:$0xff] %vm543_vm3, %v470_v48  ;;  %v314_v54 = vadd.f32 %v313_v52, %v195_v15 }
  0xe3   : > { %v467_v55 = vpack.c.bf16 %v294_v51, %v292_v50  ;;  %v471_v56 = vpack.c.bf16 %v314_v54, %v312_v53 }
  0xe5   : > { %369 = vst.msk [vmem:[%s550_s26 + $0x18] sm:$0xff] %vm543_vm3, %v467_v55  ;;  %373 = vst.msk [vmem:[%s550_s26 + $0x38] sm:$0xff] %vm543_vm3, %v471_v56 }
  0xe6 PF: > { %s13_s12 = sadd.s32 1, %s495_s12  }
  0xe7   : > { %p10_p4 = scmp.ge.s32.totalorder %s13_s12, 4  }
  0xe9   :  { %12 = sbr.rel (!%p10_p4) target bundleno = 1 (0x1), region = 62 }

// kernel: cross_level_attention.5
= control target key start
LH: loop header
LB: loop body
LE: loop exit
PB: predicated region body
PF: predicated region fallthrough
CT: control target
= control target key end

     0   :  { %s941_s12 = smov 0   ;;  %s1105_s0 = inlined_call_operand.vmem [shape: bf16[512,8], index: 0, kind: input, shape index: {}]   ;;  %s1106_s1 = inlined_call_operand.vmem [shape: bf16[8,32], index: 1, kind: input, shape index: {}]   ;;  %s1107_s2 = inlined_call_operand.vmem [shape: f32[1,32], index: 2, kind: input, shape index: {}]   ;;  %s1108_s3 = inlined_call_operand.vmem [shape: bf16[512,32], index: 3, kind: output, shape index: {}]  }
   0x1 LB: > { %s726_s13 = sadd.s32 4294967295, %s919_s12   ;;  %p730_p0 = scmp.ge.s32.totalorder %s919_s12, 1  ;;  %s919_s12 = sphi %s941_s12, %s13_s12  }
   0x2   : > { %p138_p1 = scmp.lt.s32.totalorder %s919_s12, 3 }
   0x4   : > { %p139_p2 = pnand %p730_p0, %p138_p1 }
   0x5   : > { %s731_s16 = sshll.u32 (!%p139_p2), %s726_s13, 5 }
   0x6   : > { %142 = sbr.rel (%p139_p2) target bundleno = 245 (0xf5), region = 32  ;;  %p163_p3 = scmp.lt.s32.totalorder (!%p139_p2), %s731_s16, 63 }
   0xb   : > { %v207_v0 = vld [vmem:[%s1106_s1] sm:$0xf]  ;;  %vm344_vm0 = vcmask 1043456   ;;  %s1110_s16 = smov (!%p163_p3, %s731_s16), 63  ;;  %vm295_vm1 = vcmask 64512   ;;  %vm637_vm2 = vcmask 257024  }
   0xc   : > { %887 = vmatprep.subr.msk.bf16.mxu0 %vm344_vm0, %v207_v0  ;;  %888 = vmatprep.subr.msk.bf16.mxu1 %vm344_vm0, %v207_v0  ;;  %v346_v1 = vsel %vm344_vm0, %v207_v0, 0  ;;  %s732_s17 = sshll.u32 %s1110_s16, 2  ;;  %v997_v18 = vld [vmem:[%s1107_s2] ss:$0 sm:$0xff] }
   0xd   : > { %852 = vmatpush3.bf16.msra.mxu0 %v346_v1  ;;  %886 = vmatpush3.bf16.msra.mxu1 %v346_v1  ;;  %s960_s20 = scalar_lea.vmem %s1105_s0, %s732_s17  ;;  %s1005_s25 = scalar_lea.vmem %s1108_s3, %s732_s17 }
   0xe   : > { %v897_v2 = vld [vmem:[%s960_s20] sm:$0xff]   ;;  %v899_v4 = vld [vmem:[%s960_s20 + $0x8] sm:$0xff]   ;;  %v901_v6 = vld [vmem:[%s960_s20 + $0x10] sm:$0xff]  }
   0xf   : > { %v898_v3 = vld [vmem:[%s960_s20 + $0x40] sm:$0xff]   ;;  %853 = vmatprep.mubr.msk.bf16.mxu0 %vm295_vm1, %v897_v2  ;;  %v900_v5 = vld [vmem:[%s960_s20 + $0x48] sm:$0xff]   ;;  %v902_v7 = vld [vmem:[%s960_s20 + $0x50] sm:$0xff]  }
  0x10   : > { %869 = vmatprep.mubr.msk.bf16.mxu1 %vm295_vm1, %v898_v3  ;;  %854 = vmatmul.mubr.msk.bf16.vlgmr.msra.gmra.mxu0 %vm295_vm1, %v899_v4  ;;  %v903_v8 = vld [vmem:[%s960_s20 + $0x18] sm:$0xff]   ;;  %v905_v10 = vld [vmem:[%s960_s20 + $0x20] sm:$0xff]   ;;  %v907_v12 = vld [vmem:[%s960_s20 + $0x28] sm:$0xff]  }
  0x11   : > { %870 = vmatmul.mubr.msk.bf16.vlgmr.msra.gmra.mxu1 %vm295_vm1, %v900_v5  ;;  %857 = vmatprep.mubr.msk.bf16.mxu0 %vm295_vm1, %v901_v6  ;;  %v904_v9 = vld [vmem:[%s960_s20 + $0x58] sm:$0xff]   ;;  %v906_v11 = vld [vmem:[%s960_s20 + $0x60] sm:$0xff]   ;;  %v908_v13 = vld [vmem:[%s960_s20 + $0x68] sm:$0xff]  }
  0x12   : > { %873 = vmatprep.mubr.msk.bf16.mxu1 %vm295_vm1, %v902_v7  ;;  %v909_v14 = vld [vmem:[%s960_s20 + $0x30] sm:$0xff]   ;;  %v911_v16 = vld [vmem:[%s960_s20 + $0x38] sm:$0xff]  }
  0x13   : > { %v910_v15 = vld [vmem:[%s960_s20 + $0x70] sm:$0xff]   ;;  %v912_v17 = vld [vmem:[%s960_s20 + $0x78] sm:$0xff]  }
  0x18   : > { %858 = vmatmul.mubr.msk.bf16.gmra.mxu0 %vm295_vm1, %v903_v8 }
  0x19   : > { %874 = vmatmul.mubr.msk.bf16.gmra.mxu1 %vm295_vm1, %v904_v9  ;;  %861 = vmatprep.mubr.msk.bf16.mxu0 %vm295_vm1, %v905_v10 }
  0x1a   : > { %877 = vmatprep.mubr.msk.bf16.mxu1 %vm295_vm1, %v906_v11 }
  0x20   : > { %862 = vmatmul.mubr.msk.bf16.gmra.mxu0 %vm295_vm1, %v907_v12 }
  0x21   : > { %878 = vmatmul.mubr.msk.bf16.gmra.mxu1 %vm295_vm1, %v908_v13  ;;  %865 = vmatprep.mubr.msk.bf16.mxu0 %vm295_vm1, %v909_v14 }
  0x22   : > { %881 = vmatprep.mubr.msk.bf16.mxu1 %vm295_vm1, %v910_v15 }
  0x28   : > { %866 = vmatmul.mubr.msk.bf16.gmra.mxu0 %vm295_vm1, %v911_v16 }
  0x29   : > { %882 = vmatmul.mubr.msk.bf16.gmra.mxu1 %vm295_vm1, %v912_v17 }
  0xd0   : > { %v855_v19 = vpop.f32.mrf.mxu0 }
  0xd1   : > { %v391_v20 = vadd.f32 %v855_v19, %v997_v18  ;;  %v871_v21 = vpop.f32.mrf.mxu1 }
  0xd2   : > { %v455_v22 = vadd.f32 %v871_v21, %v997_v18  ;;  %v382_v23 = vpop.f32.mrf.mxu0 }
  0xd3   : > { %v804_v24 = vpack.c.bf16 %v391_v20, %v391_v20  ;;  %v383_v25 = vadd.f32 %v997_v18, %v382_v23  ;;  %v446_v26 = vpop.f32.mrf.mxu1 }
  0xd4   : > { %v820_v27 = vpack.c.bf16 %v455_v22, %v455_v22  ;;  %v447_v28 = vadd.f32 %v997_v18, %v446_v26  ;;  %v856_v29 = vpop.f32.mrf.mxu0 }
  0xd5   : > { %640 = vst.msk [vmem:[%s1005_s25 + $0x8] sm:$0xf] %vm637_vm2, %v804_v24  ;;  %v802_v30 = vpack.c.bf16 %v383_v25, %v383_v25  ;;  %v394_v31 = vadd.f32 %v856_v29, %v997_v18  ;;  %v872_v32 = vpop.f32.mrf.mxu1 }
  0xd6   : > { %656 = vst.msk [vmem:[%s1005_s25 + $0x48] sm:$0xf] %vm637_vm2, %v820_v27  ;;  %v818_v33 = vpack.c.bf16 %v447_v28, %v447_v28  ;;  %v458_v34 = vadd.f32 %v872_v32, %v997_v18  ;;  %v385_v35 = vpop.f32.mrf.mxu0 }
  0xd7   : > { %638 = vst.msk [vmem:[%s1005_s25] sm:$0xf] %vm637_vm2, %v802_v30  ;;  %v805_v36 = vpack.c.bf16 %v394_v31, %v394_v31  ;;  %v386_v37 = vadd.f32 %v997_v18, %v385_v35  ;;  %v449_v38 = vpop.f32.mrf.mxu1 }
  0xd8   : > { %654 = vst.msk [vmem:[%s1005_s25 + $0x40] sm:$0xf] %vm637_vm2, %v818_v33  ;;  %v821_v39 = vpack.c.bf16 %v458_v34, %v458_v34  ;;  %v450_v40 = vadd.f32 %v997_v18, %v449_v38  ;;  %v859_v41 = vpop.f32.mrf.mxu0 }
  0xd9   : > { %641 = vst.msk [vmem:[%s1005_s25 + $0xc] sm:$0xf] %vm637_vm2, %v805_v36  ;;  %v803_v42 = vpack.c.bf16 %v386_v37, %v386_v37  ;;  %v407_v43 = vadd.f32 %v859_v41, %v997_v18  ;;  %v875_v44 = vpop.f32.mrf.mxu1 }
  0xda   : > { %657 = vst.msk [vmem:[%s1005_s25 + $0x4c] sm:$0xf] %vm637_vm2, %v821_v39  ;;  %v819_v45 = vpack.c.bf16 %v450_v40, %v450_v40  ;;  %v471_v46 = vadd.f32 %v875_v44, %v997_v18  ;;  %v398_v47 = vpop.f32.mrf.mxu0 }
  0xdb   : > { %639 = vst.msk [vmem:[%s1005_s25 + $0x4] sm:$0xf] %vm637_vm2, %v803_v42  ;;  %v808_v48 = vpack.c.bf16 %v407_v43, %v407_v43  ;;  %v399_v49 = vadd.f32 %v997_v18, %v398_v47  ;;  %v462_v50 = vpop.f32.mrf.mxu1 }
  0xdc   : > { %655 = vst.msk [vmem:[%s1005_s25 + $0x44] sm:$0xf] %vm637_vm2, %v819_v45  ;;  %v824_v51 = vpack.c.bf16 %v471_v46, %v471_v46  ;;  %v463_v52 = vadd.f32 %v997_v18, %v462_v50  ;;  %v860_v53 = vpop.f32.mrf.mxu0 }
  0xdd   : > { %644 = vst.msk [vmem:[%s1005_s25 + $0x18] sm:$0xf] %vm637_vm2, %v808_v48  ;;  %v806_v54 = vpack.c.bf16 %v399_v49, %v399_v49  ;;  %v410_v55 = vadd.f32 %v860_v53, %v997_v18  ;;  %v876_v56 = vpop.f32.mrf.mxu1 }
  0xde   : > { %660 = vst.msk [vmem:[%s1005_s25 + $0x58] sm:$0xf] %vm637_vm2, %v824_v51  ;;  %v822_v57 = vpack.c.bf16 %v463_v52, %v463_v52  ;;  %v474_v58 = vadd.f32 %v876_v56, %v997_v18  ;;  %v401_v59 = vpop.f32.mrf.mxu0 }
  0xdf   : > { %642 = vst.msk [vmem:[%s1005_s25 + $0x10] sm:$0xf] %vm637_vm2, %v806_v54  ;;  %v809_v60 = vpack.c.bf16 %v410_v55, %v410_v55  ;;  %v402_v61 = vadd.f32 %v997_v18, %v401_v59  ;;  %v465_v62 = vpop.f32.mrf.mxu1 }
  0xe0   : > { %658 = vst.msk [vmem:[%s1005_s25 + $0x50] sm:$0xf] %vm637_vm2, %v822_v57  ;;  %v825_v63 = vpack.c.bf16 %v474_v58, %v474_v58  ;;  %v466_v0 = vadd.f32 %v997_v18, %v465_v62  ;;  %v863_v1 = vpop.f32.mrf.mxu0 }
  0xe1   : > { %645 = vst.msk [vmem:[%s1005_s25 + $0x1c] sm:$0xf] %vm637_vm2, %v809_v60  ;;  %v807_v2 = vpack.c.bf16 %v402_v61, %v402_v61  ;;  %v423_v3 = vadd.f32 %v863_v1, %v997_v18  ;;  %v879_v4 = vpop.f32.mrf.mxu1 }
  0xe2   : > { %661 = vst.msk [vmem:[%s1005_s25 + $0x5c] sm:$0xf] %vm637_vm2, %v825_v63  ;;  %v823_v5 = vpack.c.bf16 %v466_v0, %v466_v0  ;;  %v487_v6 = vadd.f32 %v879_v4, %v997_v18  ;;  %v414_v7 = vpop.f32.mrf.mxu0 }
  0xe3   : > { %643 = vst.msk [vmem:[%s1005_s25 + $0x14] sm:$0xf] %vm637_vm2, %v807_v2  ;;  %v812_v8 = vpack.c.bf16 %v423_v3, %v423_v3  ;;  %v415_v9 = vadd.f32 %v997_v18, %v414_v7  ;;  %v478_v10 = vpop.f32.mrf.mxu1 }
  0xe4   : > { %659 = vst.msk [vmem:[%s1005_s25 + $0x54] sm:$0xf] %vm637_vm2, %v823_v5  ;;  %v828_v11 = vpack.c.bf16 %v487_v6, %v487_v6  ;;  %v479_v12 = vadd.f32 %v997_v18, %v478_v10  ;;  %v864_v13 = vpop.f32.mrf.mxu0 }
  0xe5   : > { %648 = vst.msk [vmem:[%s1005_s25 + $0x28] sm:$0xf] %vm637_vm2, %v812_v8  ;;  %v810_v14 = vpack.c.bf16 %v415_v9, %v415_v9  ;;  %v426_v15 = vadd.f32 %v864_v13, %v997_v18  ;;  %v880_v16 = vpop.f32.mrf.mxu1 }
  0xe6   : > { %664 = vst.msk [vmem:[%s1005_s25 + $0x68] sm:$0xf] %vm637_vm2, %v828_v11  ;;  %v826_v17 = vpack.c.bf16 %v479_v12, %v479_v12  ;;  %v490_v19 = vadd.f32 %v880_v16, %v997_v18  ;;  %v417_v20 = vpop.f32.mrf.mxu0 }
  0xe7   : > { %646 = vst.msk [vmem:[%s1005_s25 + $0x20] sm:$0xf] %vm637_vm2, %v810_v14  ;;  %v813_v21 = vpack.c.bf16 %v426_v15, %v426_v15  ;;  %v418_v22 = vadd.f32 %v997_v18, %v417_v20  ;;  %v481_v23 = vpop.f32.mrf.mxu1 }
  0xe8   : > { %662 = vst.msk [vmem:[%s1005_s25 + $0x60] sm:$0xf] %vm637_vm2, %v826_v17  ;;  %v829_v24 = vpack.c.bf16 %v490_v19, %v490_v19  ;;  %v482_v25 = vadd.f32 %v997_v18, %v481_v23  ;;  %v867_v26 = vpop.f32.mrf.mxu0 }
  0xe9   : > { %649 = vst.msk [vmem:[%s1005_s25 + $0x2c] sm:$0xf] %vm637_vm2, %v813_v21  ;;  %v811_v27 = vpack.c.bf16 %v418_v22, %v418_v22  ;;  %v439_v28 = vadd.f32 %v867_v26, %v997_v18  ;;  %v883_v29 = vpop.f32.mrf.mxu1 }
  0xea   : > { %665 = vst.msk [vmem:[%s1005_s25 + $0x6c] sm:$0xf] %vm637_vm2, %v829_v24  ;;  %v827_v30 = vpack.c.bf16 %v482_v25, %v482_v25  ;;  %v503_v31 = vadd.f32 %v883_v29, %v997_v18  ;;  %v430_v32 = vpop.f32.mrf.mxu0 }
  0xeb   : > { %647 = vst.msk [vmem:[%s1005_s25 + $0x24] sm:$0xf] %vm637_vm2, %v811_v27  ;;  %v816_v33 = vpack.c.bf16 %v439_v28, %v439_v28  ;;  %v431_v34 = vadd.f32 %v997_v18, %v430_v32  ;;  %v494_v35 = vpop.f32.mrf.mxu1 }
  0xec   : > { %663 = vst.msk [vmem:[%s1005_s25 + $0x64] sm:$0xf] %vm637_vm2, %v827_v30  ;;  %v832_v36 = vpack.c.bf16 %v503_v31, %v503_v31  ;;  %v495_v37 = vadd.f32 %v997_v18, %v494_v35  ;;  %v868_v38 = vpop.f32.mrf.mxu0 }
  0xed   : > { %652 = vst.msk [vmem:[%s1005_s25 + $0x38] sm:$0xf] %vm637_vm2, %v816_v33  ;;  %v814_v39 = vpack.c.bf16 %v431_v34, %v431_v34  ;;  %v442_v40 = vadd.f32 %v868_v38, %v997_v18  ;;  %v884_v41 = vpop.f32.mrf.mxu1 }
  0xee   : > { %668 = vst.msk [vmem:[%s1005_s25 + $0x78] sm:$0xf] %vm637_vm2, %v832_v36  ;;  %v830_v42 = vpack.c.bf16 %v495_v37, %v495_v37  ;;  %v506_v43 = vadd.f32 %v884_v41, %v997_v18  ;;  %v433_v44 = vpop.f32.mrf.mxu0 }
  0xef   : > { %650 = vst.msk [vmem:[%s1005_s25 + $0x30] sm:$0xf] %vm637_vm2, %v814_v39  ;;  %v817_v45 = vpack.c.bf16 %v442_v40, %v442_v40  ;;  %v434_v46 = vadd.f32 %v997_v18, %v433_v44  ;;  %v497_v47 = vpop.f32.mrf.mxu1 }
  0xf0   : > { %666 = vst.msk [vmem:[%s1005_s25 + $0x70] sm:$0xf] %vm637_vm2, %v830_v42  ;;  %v833_v48 = vpack.c.bf16 %v506_v43, %v506_v43  ;;  %v498_v49 = vadd.f32 %v997_v18, %v497_v47 }
  0xf1   : > { %653 = vst.msk [vmem:[%s1005_s25 + $0x3c] sm:$0xf] %vm637_vm2, %v817_v45  ;;  %v815_v50 = vpack.c.bf16 %v434_v46, %v434_v46 }
  0xf2   : > { %669 = vst.msk [vmem:[%s1005_s25 + $0x7c] sm:$0xf] %vm637_vm2, %v833_v48  ;;  %v831_v51 = vpack.c.bf16 %v498_v49, %v498_v49 }
  0xf3   : > { %651 = vst.msk [vmem:[%s1005_s25 + $0x34] sm:$0xf] %vm637_vm2, %v815_v50 }
  0xf4   : > { %667 = vst.msk [vmem:[%s1005_s25 + $0x74] sm:$0xf] %vm637_vm2, %v831_v51 }
  0xf5 PF: > { %s13_s12 = sadd.s32 1, %s919_s12  }
  0xf6   : > { %p10_p4 = scmp.ge.s32.totalorder %s13_s12, 4  }
  0xf8   :  { %12 = sbr.rel (!%p10_p4) target bundleno = 1 (0x1), region = 62 }

// kernel: cross_level_attention.7
= control target key start
LH: loop header
LB: loop body
LE: loop exit
PB: predicated region body
PF: predicated region fallthrough
CT: control target
= control target key end

     0   :  { %s4790_s12 = smov 0   ;;  %s5880_s0 = inlined_call_operand.vmem [shape: bf16[18,49,32], index: 0, kind: input, shape index: {}]   ;;  %s5881_s1 = inlined_call_operand.vmem [shape: bf16[18,49,32], index: 1, kind: input, shape index: {}]   ;;  %s5882_s2 = inlined_call_operand.vmem [shape: bf16[18,49,8], index: 2, kind: input, shape index: {}]   ;;  %s5883_s3 = inlined_call_operand.vmem [shape: bf16[18,49,8], index: 3, kind: output, shape index: {}]  }
   0x1 LB: > { %s3598_s13 = sadd.s32 4294967295, %s4767_s12   ;;  %p3602_p0 = scmp.ge.s32.totalorder %s4767_s12, 1  ;;  %s4767_s12 = sphi %s4790_s12, %s13_s12  }
   0x2   : > { %p163_p1 = scmp.lt.s32.totalorder %s4767_s12, 3 }
   0x4   : > { %p164_p2 = pnand %p3602_p0, %p163_p1 }
   0x6   : > { %167 = sbr.rel (%p164_p2) target bundleno = 907 (0x38b), region = 32 }
   0xb   : > { %s201_s14 = smul.u32 9, %s3598_s13  ;;  %vm392_vm0 = vcmask 261120   ;;  %vm1473_vm1 = vcmask 400384   ;;  %vm1492_vm2 = vcmask 393216   ;;  %vm2300_vm3 = vcmask 1040384  }
   0xc   : > { %vm3431_vm4 = vcmask 60416   ;;  %vm3438_vm5 = vcmask 57344   ;;  %vm3439_vm6 = vsmask.f32 256 }
   0xd   : > { %p202_p3 = scmp.lt.s32.totalorder %s201_s14, 17  ;;  %vm5737_vm7 = vmand %vm3438_vm5, %vm3439_vm6 }
   0xf   : > { %s5986_s14 = smov (!%p202_p3, %s201_s14), 17 }
  0x10   : > { %s4798_s15 = smul.u32 28, %s5986_s14 }
  0x12   : > { %s4804_s18 = scalar_lea.vmem %s5881_s1, %s4798_s15  ;;  %s4820_s21 = scalar_lea.vmem %s5880_s0, %s4798_s15 }
  0x13   : > { %v4401_v0 = vld [vmem:[%s4804_s18 + $0x18] ss:$0 sps:$4 sm:$0x11]   ;;  %v4403_v1 = vld [vmem:[%s4804_s18 + $0x10] sm:$0xff]   ;;  %v4405_v6 = vld [vmem:[%s4804_s18 + $0x8] sm:$0xff]   ;;  %s5323_s24 = scalar_lea.vmem %s5882_s2, %s4798_s15  ;;  %s5727_s27 = scalar_lea.vmem %s5883_s3, %s4798_s15 }
  0x14   : > { %v4402_v2 = vld [vmem:[%s4804_s18 + $0x34] ss:$0 sps:$4 sm:$0x11]   ;;  %v4404_v3 = vld [vmem:[%s4804_s18 + $0x2c] sm:$0xff]   ;;  %4355 = vmatprep.subr.msk.bf16.mxu0 %vm392_vm0, %v4401_v0  ;;  %v415_v4 = vsel %vm392_vm0, %v4401_v0, 0  ;;  %v412_v7 = vsel %vm392_vm0, %v4403_v1, 0 }
  0x15   : > { %4060 = vmatpush3.bf16.xpose.msra.mxu0 %v415_v4  ;;  %4359 = vmatprep.subr.msk.bf16.mxu1 %vm392_vm0, %v4402_v2  ;;  %v539_v5 = vsel %vm392_vm0, %v4402_v2, 0  ;;  %v4409_v8 = vld [vmem:[%s4820_s21] sm:$0xff]   ;;  %v536_v9 = vsel %vm392_vm0, %v4404_v3, 0  ;;  %v409_v12 = vsel %vm392_vm0, %v4405_v6, 0  ;;  %v4410_v20 = vld [vmem:[%s4820_s21 + $0x8] sm:$0xff]   ;;  %v4420_v27 = vld [vmem:[%s4820_s21 + $0x10] sm:$0xff]  }
  0x16   : > { %4076 = vmatpush3.bf16.xpose.msra.mxu1 %v539_v5  ;;  %4356 = vmatprep.subr.msk.bf16.mxu0 %vm392_vm0, %v4403_v1  ;;  %v4406_v10 = vld [vmem:[%s4804_s18 + $0x24] sm:$0xff]   ;;  %v4412_v11 = vld [vmem:[%s4820_s21 + $0x1c] sm:$0xff]   ;;  %v4411_v16 = vld [vmem:[%s4804_s18 + $0x50] ss:$0 sps:$4 sm:$0x11]  }
  0x17   : > { %4360 = vmatprep.subr.msk.bf16.mxu1 %vm392_vm0, %v4404_v3  ;;  %4067 = vmatprep.mubr.msk.bf16.mxu0 %vm392_vm0, %v4409_v8  ;;  %v4407_v13 = vld [vmem:[%s4804_s18] sm:$0xff]   ;;  %v533_v14 = vsel %vm392_vm0, %v4406_v10, 0  ;;  %v4414_v19 = vld [vmem:[%s4804_s18 + $0x6c] ss:$0 sps:$4 sm:$0x11]   ;;  %v663_v22 = vsel %vm392_vm0, %v4411_v16, 0 }
  0x18   : > { %4083 = vmatprep.mubr.msk.bf16.mxu1 %vm392_vm0, %v4412_v11  ;;  %v4408_v15 = vld [vmem:[%s4804_s18 + $0x1c] sm:$0xff]   ;;  %v406_v17 = vsel %vm392_vm0, %v4407_v13, 0  ;;  %v4413_v21 = vld [vmem:[%s4820_s21 + $0x24] sm:$0xff]   ;;  %v787_v25 = vsel %vm392_vm0, %v4414_v19, 0  ;;  %v4417_v26 = vld [vmem:[%s4820_s21 + $0x2c] sm:$0xff]  }
  0x19   : > { %v530_v18 = vsel %vm392_vm0, %v4408_v15, 0  ;;  %v4415_v23 = vld [vmem:[%s4804_s18 + $0x48] sm:$0xff]   ;;  %v4421_v28 = vld [vmem:[%s4820_s21 + $0x18] ss:$0 sps:$4 sm:$0x11]   ;;  %v4419_v30 = vld [vmem:[%s4804_s18 + $0x40] sm:$0xff]  }
  0x1a   : > { %v4416_v24 = vld [vmem:[%s4804_s18 + $0x64] sm:$0xff]   ;;  %v4418_v29 = vld [vmem:[%s4820_s21 + $0x34] ss:$0 sps:$4 sm:$0x11]   ;;  %v660_v31 = vsel %vm392_vm0, %v4415_v23, 0  ;;  %v4422_v33 = vld [vmem:[%s4804_s18 + $0x5c] sm:$0xff]  }
  0x1b   : > { %v784_v32 = vsel %vm392_vm0, %v4416_v24, 0  ;;  %v4425_v34 = vld [vmem:[%s4820_s21 + $0x38] sm:$0xff]   ;;  %v657_v36 = vsel %vm392_vm0, %v4419_v30, 0  ;;  %v781_v38 = vsel %vm392_vm0, %v4422_v33, 0  ;;  %v4426_v44 = vld [vmem:[%s4820_s21 + $0x40] sm:$0xff]   ;;  %v4433_v50 = vld [vmem:[%s4820_s21 + $0x48] sm:$0xff]  }
  0x1c   : > { %v4428_v35 = vld [vmem:[%s4820_s21 + $0x54] sm:$0xff]   ;;  %v4427_v40 = vld [vmem:[%s4804_s18 + $0x88] ss:$0 sps:$4 sm:$0x11]   ;;  %v4429_v45 = vld [vmem:[%s4820_s21 + $0x5c] sm:$0xff]  }
  0x1d   : > { %4062 = vmatpush3.bf16.xpose.msra.mxu0 %v412_v7  ;;  %v4423_v37 = vld [vmem:[%s4804_s18 + $0x38] sm:$0xff]   ;;  %v4430_v42 = vld [vmem:[%s4804_s18 + $0xa4] ss:$0 sps:$4 sm:$0x11]   ;;  %v911_v47 = vsel %vm392_vm0, %v4427_v40, 0  ;;  %v4441_v58 = vld [vmem:[%s4820_s21 + $0x70] sm:$0xff]  }
  0x1e   : > { %4078 = vmatpush3.bf16.xpose.msra.mxu1 %v536_v9  ;;  %4357 = vmatprep.subr.msk.bf16.mxu0 %vm392_vm0, %v4405_v6  ;;  %v4424_v39 = vld [vmem:[%s4804_s18 + $0x54] sm:$0xff]   ;;  %v654_v41 = vsel %vm392_vm0, %v4423_v37, 0  ;;  %v4431_v46 = vld [vmem:[%s4804_s18 + $0x80] sm:$0xff]   ;;  %v1035_v49 = vsel %vm392_vm0, %v4430_v42, 0  ;;  %v4444_v59 = vld [vmem:[%s4820_s21 + $0x8c] sm:$0xff]  }
  0x1f   : > { %4361 = vmatprep.subr.msk.bf16.mxu1 %vm392_vm0, %v4406_v10  ;;  %v778_v43 = vsel %vm392_vm0, %v4424_v39, 0  ;;  %v4432_v48 = vld [vmem:[%s4804_s18 + $0x9c] sm:$0xff]   ;;  %v4436_v51 = vld [vmem:[%s4820_s21 + $0x64] sm:$0xff]   ;;  %v4434_v52 = vld [vmem:[%s4820_s21 + $0x50] ss:$0 sps:$4 sm:$0x11]  }
  0x20   : > { %v4437_v53 = vld [vmem:[%s4820_s21 + $0x6c] ss:$0 sps:$4 sm:$0x11]   ;;  %v908_v54 = vsel %vm392_vm0, %v4431_v46, 0  ;;  %v4435_v55 = vld [vmem:[%s4804_s18 + $0x78] sm:$0xff]   ;;  %v1032_v56 = vsel %vm392_vm0, %v4432_v48, 0 }
  0x21   : > { %v4438_v57 = vld [vmem:[%s4804_s18 + $0x94] sm:$0xff]   ;;  %v905_v60 = vsel %vm392_vm0, %v4435_v55, 0  ;;  %v4440_v63 = vld [vmem:[%s4804_s18 + $0x8c] sm:$0xff]   ;;  %v4443_v1 = vld [vmem:[%s4804_s18 + $0xc0] ss:$0 sps:$4 sm:$0x11]  }
  0x22   : > { %v4439_v61 = vld [vmem:[%s4804_s18 + $0x70] sm:$0xff]   ;;  %v1029_v62 = vsel %vm392_vm0, %v4438_v57, 0  ;;  %v1026_v2 = vsel %vm392_vm0, %v4440_v63, 0  ;;  %v4446_v3 = vld [vmem:[%s4804_s18 + $0xdc] ss:$0 sps:$4 sm:$0x11]  }
  0x23   : > { %v902_v0 = vsel %vm392_vm0, %v4439_v61, 0  ;;  %v4442_v4 = vld [vmem:[%s4820_s21 + $0x78] sm:$0xff]   ;;  %v1159_v6 = vsel %vm392_vm0, %v4443_v1, 0  ;;  %v1283_v8 = vsel %vm392_vm0, %v4446_v3, 0  ;;  %v4449_v10 = vld [vmem:[%s4820_s21 + $0x80] sm:$0xff]  }
  0x24   : > { %v4445_v5 = vld [vmem:[%s4820_s21 + $0x94] sm:$0xff]   ;;  %v4452_v11 = vld [vmem:[%s4820_s21 + $0x9c] sm:$0xff]  }
  0x25   : > { %4064 = vmatpush3.bf16.xpose.msra.mxu0 %v409_v12  ;;  %v4447_v7 = vld [vmem:[%s4804_s18 + $0xb8] sm:$0xff]   ;;  %v4450_v12 = vld [vmem:[%s4820_s21 + $0x88] ss:$0 sps:$4 sm:$0x11]  }
  0x26   : > { %4080 = vmatpush3.bf16.xpose.msra.mxu1 %v533_v14  ;;  %4358 = vmatprep.subr.msk.bf16.mxu0 %vm392_vm0, %v4407_v13  ;;  %v4448_v9 = vld [vmem:[%s4804_s18 + $0xd4] sm:$0xff]   ;;  %v4453_v13 = vld [vmem:[%s4820_s21 + $0xa4] ss:$0 sps:$4 sm:$0x11]   ;;  %v1156_v14 = vsel %vm392_vm0, %v4447_v7, 0 }
  0x27   : > { %4362 = vmatprep.subr.msk.bf16.mxu1 %vm392_vm0, %v4408_v15  ;;  %v4451_v15 = vld [vmem:[%s4804_s18 + $0xb0] sm:$0xff]  }
  0x2d   : > { %4066 = vmatpush3.bf16.xpose.msra.mxu0 %v406_v17  ;;  %v4454_v17 = vld [vmem:[%s4804_s18 + $0xcc] sm:$0xff]  }
  0x2e   : > { %4082 = vmatpush3.bf16.xpose.msra.mxu1 %v530_v18  ;;  %4363 = vmatprep.subr.msk.bf16.mxu0 %vm392_vm0, %v4411_v16  ;;  %v1280_v16 = vsel %vm392_vm0, %v4448_v9, 0  ;;  %v4457_v18 = vld [vmem:[%s4820_s21 + $0xa8] sm:$0xff]  }
  0x2f   : > { %4367 = vmatprep.subr.msk.bf16.mxu1 %vm392_vm0, %v4414_v19  ;;  %v4460_v19 = vld [vmem:[%s4820_s21 + $0xc4] sm:$0xff]  }
  0x34   : > { %4068 = vmatmul.mubr.msk.bf16.vlgmr.msra.gmra.mxu0 %vm392_vm0, %v4410_v20  ;;  %v1153_v20 = vsel %vm392_vm0, %v4451_v15, 0 }
  0x35   : > { %4092 = vmatpush3.bf16.xpose.msra.mxu0 %v663_v22  ;;  %4084 = vmatmul.mubr.msk.bf16.vlgmr.msra.gmra.mxu1 %vm392_vm0, %v4413_v21  ;;  %v4455_v21 = vld [vmem:[%s4804_s18 + $0xa8] sm:$0xff]   ;;  %v1277_v22 = vsel %vm392_vm0, %v4454_v17, 0 }
  0x36   : > { %4108 = vmatpush3.bf16.xpose.msra.mxu1 %v787_v25  ;;  %4364 = vmatprep.subr.msk.bf16.mxu0 %vm392_vm0, %v4415_v23  ;;  %v4456_v23 = vld [vmem:[%s4804_s18 + $0xc4] sm:$0xff]   ;;  %v4459_v25 = vld [vmem:[%s4804_s18 + $0xf8] ss:$0 sps:$4 sm:$0x11]  }
  0x37   : > { %4368 = vmatprep.subr.msk.bf16.mxu1 %vm392_vm0, %v4416_v24  ;;  %4087 = vmatprep.mubr.msk.bf16.mxu1 %vm392_vm0, %v4417_v26  ;;  %v1150_v24 = vsel %vm392_vm0, %v4455_v21, 0  ;;  %v1274_v26 = vsel %vm392_vm0, %v4456_v23, 0 }
  0x38   : > { %4071 = vmatprep.mubr.msk.bf16.mxu0 %vm392_vm0, %v4420_v27  ;;  %v4458_v27 = vld [vmem:[%s4820_s21 + $0xb0] sm:$0xff]  }
  0x3c   : > { %4072 = vmatmul.mubr.msk.bf16.gmra.mxu0 %vm392_vm0, %v4421_v28  ;;  %v4461_v28 = vld [vmem:[%s4820_s21 + $0xcc] sm:$0xff]  }
  0x3d   : > { %4094 = vmatpush3.bf16.xpose.msra.mxu0 %v660_v31  ;;  %4088 = vmatmul.mubr.msk.bf16.gmra.mxu1 %vm392_vm0, %v4418_v29  ;;  %v1407_v29 = vsel %vm392_vm0, %v4459_v25, 0  ;;  %v4463_v31 = vld [vmem:[%s4820_s21 + $0xb8] sm:$0xff]  }
  0x3e   : > { %4110 = vmatpush3.bf16.xpose.msra.mxu1 %v784_v32  ;;  %4365 = vmatprep.subr.msk.bf16.mxu0 %vm392_vm0, %v4419_v30  ;;  %v4462_v30 = vld [vmem:[%s4804_s18 + $0xf0] sm:$0xff]  }
  0x3f   : > { %4369 = vmatprep.subr.msk.bf16.mxu1 %vm392_vm0, %v4422_v33  ;;  %4099 = vmatprep.mubr.msk.bf16.mxu0 %vm392_vm0, %v4425_v34  ;;  %v4466_v32 = vld [vmem:[%s4820_s21 + $0xd4] sm:$0xff]   ;;  %v4464_v33 = vld [vmem:[%s4820_s21 + $0xc0] ss:$0 sps:$4 sm:$0x11]  }
  0x40   : > { %4115 = vmatprep.mubr.msk.bf16.mxu1 %vm392_vm0, %v4428_v35  ;;  %v4467_v34 = vld [vmem:[%s4820_s21 + $0xdc] ss:$0 sps:$4 sm:$0x11]   ;;  %v1404_v35 = vsel %vm392_vm0, %v4462_v30, 0 }
  0x45   : > { %4096 = vmatpush3.bf16.xpose.msra.mxu0 %v657_v36  ;;  %v4465_v36 = vld [vmem:[%s4804_s18 + $0xe8] sm:$0xff]  }
  0x46   : > { %4112 = vmatpush3.bf16.xpose.msra.mxu1 %v781_v38  ;;  %4366 = vmatprep.subr.msk.bf16.mxu0 %vm392_vm0, %v4423_v37  ;;  %v4469_v37 = vld [vmem:[%s4820_s21 + $0xe0] sm:$0xff]   ;;  %v1401_v38 = vsel %vm392_vm0, %v4465_v36, 0 }
  0x47   : > { %4370 = vmatprep.subr.msk.bf16.mxu1 %vm392_vm0, %v4424_v39  ;;  %v4468_v39 = vld [vmem:[%s4804_s18 + $0xe0] sm:$0xff]  }
  0x4d   : > { %4098 = vmatpush3.bf16.xpose.msra.mxu0 %v654_v41  ;;  %v4470_v41 = vld [vmem:[%s4820_s21 + $0xe8] sm:$0xff]  }
  0x4e   : > { %4114 = vmatpush3.bf16.xpose.msra.mxu1 %v778_v43  ;;  %4371 = vmatprep.subr.msk.bf16.mxu0 %vm392_vm0, %v4427_v40  ;;  %v1398_v40 = vsel %vm392_vm0, %v4468_v39, 0  ;;  %v4472_v43 = vld [vmem:[%s4820_s21 + $0xf8] ss:$0 sps:$4 sm:$0x11]  }
  0x4f   : > { %4375 = vmatprep.subr.msk.bf16.mxu1 %vm392_vm0, %v4430_v42  ;;  %v4471_v42 = vld [vmem:[%s4820_s21 + $0xf0] sm:$0xff]  }
  0x54   : > { %4100 = vmatmul.mubr.msk.bf16.vlgmr.msra.gmra.mxu0 %vm392_vm0, %v4426_v44 }
  0x55   : > { %4124 = vmatpush3.bf16.xpose.msra.mxu0 %v911_v47  ;;  %4116 = vmatmul.mubr.msk.bf16.vlgmr.msra.gmra.mxu1 %vm392_vm0, %v4429_v45 }
  0x56   : > { %4140 = vmatpush3.bf16.xpose.msra.mxu1 %v1035_v49  ;;  %4372 = vmatprep.subr.msk.bf16.mxu0 %vm392_vm0, %v4431_v46 }
  0x57   : > { %4376 = vmatprep.subr.msk.bf16.mxu1 %vm392_vm0, %v4432_v48  ;;  %4103 = vmatprep.mubr.msk.bf16.mxu0 %vm392_vm0, %v4433_v50 }
  0x58   : > { %4119 = vmatprep.mubr.msk.bf16.mxu1 %vm392_vm0, %v4436_v51 }
  0x5c   : > { %4104 = vmatmul.mubr.msk.bf16.gmra.mxu0 %vm392_vm0, %v4434_v52 }
  0x5d   : > { %4126 = vmatpush3.bf16.xpose.msra.mxu0 %v908_v54  ;;  %4120 = vmatmul.mubr.msk.bf16.gmra.mxu1 %vm392_vm0, %v4437_v53 }
  0x5e   : > { %4142 = vmatpush3.bf16.xpose.msra.mxu1 %v1032_v56  ;;  %4373 = vmatprep.subr.msk.bf16.mxu0 %vm392_vm0, %v4435_v55 }
  0x5f   : > { %4377 = vmatprep.subr.msk.bf16.mxu1 %vm392_vm0, %v4438_v57  ;;  %4131 = vmatprep.mubr.msk.bf16.mxu0 %vm392_vm0, %v4441_v58 }
  0x60   : > { %4147 = vmatprep.mubr.msk.bf16.mxu1 %vm392_vm0, %v4444_v59 }
  0x65   : > { %4128 = vmatpush3.bf16.xpose.msra.mxu0 %v905_v60 }
  0x66   : > { %4144 = vmatpush3.bf16.xpose.msra.mxu1 %v1029_v62  ;;  %4374 = vmatprep.subr.msk.bf16.mxu0 %vm392_vm0, %v4439_v61 }
  0x67   : > { %4378 = vmatprep.subr.msk.bf16.mxu1 %vm392_vm0, %v4440_v63 }
  0x6d   : > { %4130 = vmatpush3.bf16.xpose.msra.mxu0 %v902_v0 }
  0x6e   : > { %4146 = vmatpush3.bf16.xpose.msra.mxu1 %v1026_v2  ;;  %4379 = vmatprep.subr.msk.bf16.mxu0 %vm392_vm0, %v4443_v1 }
  0x6f   : > { %4383 = vmatprep.subr.msk.bf16.mxu1 %vm392_vm0, %v4446_v3 }
  0x74   : > { %4132 = vmatmul.mubr.msk.bf16.vlgmr.msra.gmra.mxu0 %vm392_vm0, %v4442_v4 }
  0x75   : > { %4156 = vmatpush3.bf16.xpose.msra.mxu0 %v1159_v6  ;;  %4148 = vmatmul.mubr.msk.bf16.vlgmr.msra.gmra.mxu1 %vm392_vm0, %v4445_v5 }
  0x76   : > { %4172 = vmatpush3.bf16.xpose.msra.mxu1 %v1283_v8  ;;  %4380 = vmatprep.subr.msk.bf16.mxu0 %vm392_vm0, %v4447_v7 }
  0x77   : > { %4384 = vmatprep.subr.msk.bf16.mxu1 %vm392_vm0, %v4448_v9  ;;  %4135 = vmatprep.mubr.msk.bf16.mxu0 %vm392_vm0, %v4449_v10 }
  0x78   : > { %4151 = vmatprep.mubr.msk.bf16.mxu1 %vm392_vm0, %v4452_v11 }
  0x7c   : > { %4136 = vmatmul.mubr.msk.bf16.gmra.mxu0 %vm392_vm0, %v4450_v12 }
  0x7d   : > { %4158 = vmatpush3.bf16.xpose.msra.mxu0 %v1156_v14  ;;  %4152 = vmatmul.mubr.msk.bf16.gmra.mxu1 %vm392_vm0, %v4453_v13 }
  0x7e   : > { %4174 = vmatpush3.bf16.xpose.msra.mxu1 %v1280_v16  ;;  %4381 = vmatprep.subr.msk.bf16.mxu0 %vm392_vm0, %v4451_v15 }
  0x7f   : > { %4385 = vmatprep.subr.msk.bf16.mxu1 %vm392_vm0, %v4454_v17  ;;  %4163 = vmatprep.mubr.msk.bf16.mxu0 %vm392_vm0, %v4457_v18 }
  0x80   : > { %4179 = vmatprep.mubr.msk.bf16.mxu1 %vm392_vm0, %v4460_v19 }
  0x85   : > { %4160 = vmatpush3.bf16.xpose.msra.mxu0 %v1153_v20 }
  0x86   : > { %4176 = vmatpush3.bf16.xpose.msra.mxu1 %v1277_v22  ;;  %4382 = vmatprep.subr.msk.bf16.mxu0 %vm392_vm0, %v4455_v21 }
  0x87   : > { %4386 = vmatprep.subr.msk.bf16.mxu1 %vm392_vm0, %v4456_v23 }
  0x8d   : > { %4162 = vmatpush3.bf16.xpose.msra.mxu0 %v1150_v24 }
  0x8e   : > { %4178 = vmatpush3.bf16.xpose.msra.mxu1 %v1274_v26  ;;  %4387 = vmatprep.subr.msk.bf16.mxu0 %vm392_vm0, %v4459_v25 }
  0x94   : > { %4164 = vmatmul.mubr.msk.bf16.vlgmr.msra.gmra.mxu0 %vm392_vm0, %v4458_v27 }
  0x95   : > { %4188 = vmatpush3.bf16.xpose.msra.mxu0 %v1407_v29  ;;  %4180 = vmatmul.mubr.msk.bf16.vlgmr.msra.gmra.mxu1 %vm392_vm0, %v4461_v28 }
  0x96   : > { %4388 = vmatprep.subr.msk.bf16.mxu0 %vm392_vm0, %v4462_v30  ;;  %4167 = vmatprep.mubr.msk.bf16.mxu0 %vm392_vm0, %v4463_v31 }
  0x97   : > { %4183 = vmatprep.mubr.msk.bf16.mxu1 %vm392_vm0, %v4466_v32 }
  0x9c   : > { %4168 = vmatmul.mubr.msk.bf16.gmra.mxu0 %vm392_vm0, %v4464_v33 }
  0x9d   : > { %4190 = vmatpush3.bf16.xpose.msra.mxu0 %v1404_v35  ;;  %4184 = vmatmul.mubr.msk.bf16.gmra.mxu1 %vm392_vm0, %v4467_v34 }
  0x9e   : > { %4389 = vmatprep.subr.msk.bf16.mxu0 %vm392_vm0, %v4465_v36  ;;  %4195 = vmatprep.mubr.msk.bf16.mxu0 %vm392_vm0, %v4469_v37 }
  0xa5   : > { %4192 = vmatpush3.bf16.xpose.msra.mxu0 %v1401_v38 }
  0xa6   : > { %4390 = vmatprep.subr.msk.bf16.mxu0 %vm392_vm0, %v4468_v39 }
  0xad   : > { %4194 = vmatpush3.bf16.xpose.msra.mxu0 %v1398_v40 }
  0xb4   : > { %4196 = vmatmul.mubr.msk.bf16.vlgmr.msra.gmra.mxu0 %vm392_vm0, %v4470_v41 }
  0xb5   : > { %4199 = vmatprep.mubr.msk.bf16.mxu0 %vm392_vm0, %v4471_v42 }
  0xbc   : > { %4200 = vmatmul.mubr.msk.bf16.gmra.mxu0 %vm392_vm0, %v4472_v43 }
  0xf4   : > { %v4992_v44 = vpop.f32.mrf.mxu0 }
  0xf5   : > { %v4994_v45 = vpop.f32.mrf.mxu1  ;;  %v1480_v46 = vsel %vm1473_vm1, %v4992_v44, -inf }
  0xf6   : > { %1481 = vmax.xlane.f32.xlu1 %v1480_v46  ;;  %v4998_v47 = vpop.f32.mrf.mxu0  ;;  %v1502_v50 = vsel %vm1473_vm1, %v4994_v45, -inf }
  0xf7   : > { %v5000_v48 = vpop.f32.mrf.mxu1  ;;  %v1474_v49 = vsel %vm1473_vm1, %v4998_v47, -inf }
  0xf8   : > { %1475 = vmax.xlane.f32.xlu0 %v1474_v49  ;;  %v5006_v51 = vpop.f32.mrf.mxu0  ;;  %v1496_v55 = vsel %vm1473_vm1, %v5000_v48, -inf }
  0xf9   : > { %v5008_v52 = vpop.f32.mrf.mxu1  ;;  %v1483_v63 = vsel %vm1473_vm1, %v5006_v51, -inf }
  0xfa   : > { %1503 = vmax.xlane.f32.xlu1 %v1502_v50  ;;  %v5010_v53 = vpop.f32.mrf.mxu0  ;;  %v1505_v54 = vsel %vm1473_vm1, %v5008_v52, -inf }
  0xfb   : > { %v5016_v56 = vpop.f32.mrf.mxu1  ;;  %v1477_v60 = vsel %vm1473_vm1, %v5010_v53, -inf }
  0xfc   : > { %1506 = vmax.xlane.f32.xlu0 %v1505_v54  ;;  %v5018_v57 = vpop.f32.mrf.mxu0  ;;  %v1499_v1 = vsel %vm1473_vm1, %v5016_v56, -inf }
  0xfd   : > { %v5020_v58 = vpop.f32.mrf.mxu1  ;;  %v1493_v3 = vsel %vm1492_vm2, %v5018_v57, -inf }
  0xfe   : > { %1497 = vmax.xlane.f32.xlu1 %v1496_v55  ;;  %v5022_v59 = vpop.f32.mrf.mxu0  ;;  %v1514_v2 = vsel %vm1492_vm2, %v5020_v58, -inf }
  0xff   : > { %v5026_v61 = vpop.f32.mrf.mxu1  ;;  %v1486_v6 = vsel %vm1473_vm1, %v5022_v59, -inf }
 0x100   : > { %1478 = vmax.xlane.f32.xlu0 %v1477_v60  ;;  %v4074_v62 = vpop.f32.mrf.mxu0  ;;  %v1508_v4 = vsel %vm1473_vm1, %v5026_v61, -inf }
 0x101   : > { %v4090_v0 = vpop.f32.mrf.mxu1 }
 0x102   : > { %1484 = vmax.xlane.f32.xlu1 %v1483_v63  ;;  %v5038_v5 = vpop.f32.mrf.mxu0 }
 0x103   : > { %v5042_v7 = vpop.f32.mrf.mxu1  ;;  %v1489_v8 = vsel %vm1473_vm1, %v5038_v5, -inf }
 0x104   : > { %1500 = vmax.xlane.f32.xlu0 %v1499_v1  ;;  %v1511_v9 = vsel %vm1473_vm1, %v5042_v7, -inf }
 0x106   : > { %1515 = vmax.xlane.f32.xlu1 %v1514_v2 }
 0x108   : > { %1494 = vmax.xlane.f32.xlu0 %v1493_v3 }
 0x10a   : > { %1509 = vmax.xlane.f32.xlu1 %v1508_v4 }
 0x10c   : > { %1487 = vmax.xlane.f32.xlu0 %v1486_v6 }
 0x10e   : > { %1490 = vmax.xlane.f32.xlu1 %v1489_v8 }
 0x110   : > { %1512 = vmax.xlane.f32.xlu0 %v1511_v9 }
 0x114   : > { %v5048_v10 = vpop.f32.mrf.mxu0 }
 0x115   : > { %v1523_v11 = vsel %vm1473_vm1, %v5048_v10, -inf  ;;  %v5052_v12 = vpop.f32.mrf.mxu1 }
 0x116   : > { %1524 = vmax.xlane.f32.xlu0 %v1523_v11  ;;  %v5054_v13 = vpop.f32.mrf.mxu0  ;;  %v1544_v15 = vsel %vm1473_vm1, %v5052_v12, -inf }
 0x117   : > { %v5056_v14 = vpop.f32.mrf.mxu1  ;;  %v1517_v23 = vsel %vm1473_vm1, %v5054_v13, -inf }
 0x118   : > { %v5060_v16 = vpop.f32.mrf.mxu0  ;;  %v1538_v26 = vsel %vm1473_vm1, %v5056_v14, -inf }
 0x119   : > { %v1526_v17 = vsel %vm1473_vm1, %v5060_v16, -inf  ;;  %v5064_v18 = vpop.f32.mrf.mxu1 }
 0x11a   : > { %1545 = vmax.xlane.f32.xlu0 %v1544_v15  ;;  %1527 = vmax.xlane.f32.xlu1 %v1526_v17  ;;  %v5066_v19 = vpop.f32.mrf.mxu0  ;;  %v1547_v20 = vsel %vm1473_vm1, %v5064_v18, -inf }
 0x11b   : > { %v5070_v21 = vpop.f32.mrf.mxu1  ;;  %v1520_v29 = vsel %vm1473_vm1, %v5066_v19, -inf }
 0x11c   : > { %v5072_v22 = vpop.f32.mrf.mxu0  ;;  %v1541_v32 = vsel %vm1473_vm1, %v5070_v21, -inf }
 0x11d   : > { %v5076_v24 = vpop.f32.mrf.mxu1  ;;  %v1535_v31 = vsel %vm1492_vm2, %v5072_v22, -inf }
 0x11e   : > { %1518 = vmax.xlane.f32.xlu0 %v1517_v23  ;;  %1548 = vmax.xlane.f32.xlu1 %v1547_v20  ;;  %v5078_v25 = vpop.f32.mrf.mxu0  ;;  %v1556_v33 = vsel %vm1492_vm2, %v5076_v24, -inf }
 0x11f   : > { %v5082_v27 = vpop.f32.mrf.mxu1  ;;  %v1529_v34 = vsel %vm1473_vm1, %v5078_v25, -inf }
 0x120   : > { %v4106_v28 = vpop.f32.mrf.mxu0  ;;  %v1550_v36 = vsel %vm1473_vm1, %v5082_v27, -inf }
 0x121   : > { %v4122_v30 = vpop.f32.mrf.mxu1 }
 0x122   : > { %1539 = vmax.xlane.f32.xlu0 %v1538_v26  ;;  %1521 = vmax.xlane.f32.xlu1 %v1520_v29  ;;  %v5094_v35 = vpop.f32.mrf.mxu0 }
 0x123   : > { %v1532_v37 = vsel %vm1473_vm1, %v5094_v35, -inf  ;;  %v5100_v38 = vpop.f32.mrf.mxu1 }
 0x124   : > { %v1553_v39 = vsel %vm1473_vm1, %v5100_v38, -inf }
 0x126   : > { %1542 = vmax.xlane.f32.xlu1 %v1541_v32  ;;  %1536 = vmax.xlane.f32.xlu0 %v1535_v31 }
 0x12a   : > { %1557 = vmax.xlane.f32.xlu1 %v1556_v33  ;;  %1530 = vmax.xlane.f32.xlu0 %v1529_v34 }
 0x12e   : > { %1551 = vmax.xlane.f32.xlu0 %v1550_v36  ;;  %1533 = vmax.xlane.f32.xlu1 %v1532_v37 }
 0x132   : > { %1554 = vmax.xlane.f32.xlu1 %v1553_v39 }
 0x134   : > { %v5104_v40 = vpop.f32.mrf.mxu0 }
 0x135   : > { %v1565_v41 = vsel %vm1473_vm1, %v5104_v40, -inf  ;;  %v5108_v42 = vpop.f32.mrf.mxu1 }
 0x136   : > { %1566 = vmax.xlane.f32.xlu0 %v1565_v41  ;;  %v5110_v43 = vpop.f32.mrf.mxu0  ;;  %v1586_v49 = vsel %vm1473_vm1, %v5108_v42, -inf }
 0x137   : > { %v5112_v46 = vpop.f32.mrf.mxu1  ;;  %v1559_v1 = vsel %vm1473_vm1, %v5110_v43, -inf }
 0x138   : > { %v5116_v50 = vpop.f32.mrf.mxu0  ;;  %v1580_v4 = vsel %vm1473_vm1, %v5112_v46, -inf }
 0x139   : > { %v1568_v54 = vsel %vm1473_vm1, %v5116_v50, -inf  ;;  %v5120_v55 = vpop.f32.mrf.mxu1 }
 0x13a   : > { %1587 = vmax.xlane.f32.xlu0 %v1586_v49  ;;  %1569 = vmax.xlane.f32.xlu1 %v1568_v54  ;;  %v5122_v60 = vpop.f32.mrf.mxu0  ;;  %v1589_v62 = vsel %vm1473_vm1, %v5120_v55, -inf }
 0x13b   : > { %v5126_v63 = vpop.f32.mrf.mxu1  ;;  %v1562_v9 = vsel %vm1473_vm1, %v5122_v60, -inf }
 0x13c   : > { %v5128_v0 = vpop.f32.mrf.mxu0  ;;  %v1583_v17 = vsel %vm1473_vm1, %v5126_v63, -inf }
 0x13d   : > { %v5132_v2 = vpop.f32.mrf.mxu1  ;;  %v1577_v15 = vsel %vm1492_vm2, %v5128_v0, -inf }
 0x13e   : > { %1560 = vmax.xlane.f32.xlu0 %v1559_v1  ;;  %1590 = vmax.xlane.f32.xlu1 %v1589_v62  ;;  %v5134_v3 = vpop.f32.mrf.mxu0  ;;  %v1598_v20 = vsel %vm1492_vm2, %v5132_v2, -inf }
 0x13f   : > { %v5138_v6 = vpop.f32.mrf.mxu1  ;;  %v1571_v23 = vsel %vm1473_vm1, %v5134_v3, -inf }
 0x140   : > { %v4138_v8 = vpop.f32.mrf.mxu0  ;;  %v1592_v28 = vsel %vm1473_vm1, %v5138_v6, -inf }
 0x141   : > { %v4154_v11 = vpop.f32.mrf.mxu1 }
 0x142   : > { %1581 = vmax.xlane.f32.xlu0 %v1580_v4  ;;  %1563 = vmax.xlane.f32.xlu1 %v1562_v9  ;;  %v5150_v26 = vpop.f32.mrf.mxu0 }
 0x143   : > { %v1574_v29 = vsel %vm1473_vm1, %v5150_v26, -inf  ;;  %v5156_v30 = vpop.f32.mrf.mxu1 }
 0x144   : > { %v1595_v31 = vsel %vm1473_vm1, %v5156_v30, -inf }
 0x146   : > { %1584 = vmax.xlane.f32.xlu1 %v1583_v17  ;;  %1578 = vmax.xlane.f32.xlu0 %v1577_v15 }
 0x14a   : > { %1599 = vmax.xlane.f32.xlu1 %v1598_v20  ;;  %1572 = vmax.xlane.f32.xlu0 %v1571_v23 }
 0x14e   : > { %1593 = vmax.xlane.f32.xlu0 %v1592_v28  ;;  %1575 = vmax.xlane.f32.xlu1 %v1574_v29 }
 0x152   : > { %1596 = vmax.xlane.f32.xlu1 %v1595_v31 }
 0x154   : > { %v5160_v32 = vpop.f32.mrf.mxu0 }
 0x155   : > { %v1607_v33 = vsel %vm1473_vm1, %v5160_v32, -inf  ;;  %v5164_v34 = vpop.f32.mrf.mxu1 }
 0x156   : > { %1608 = vmax.xlane.f32.xlu0 %v1607_v33  ;;  %v5166_v36 = vpop.f32.mrf.mxu0  ;;  %v1628_v39 = vsel %vm1473_vm1, %v5164_v34, -inf }
 0x157   : > { %v5168_v37 = vpop.f32.mrf.mxu1  ;;  %v1601_v9 = vsel %vm1473_vm1, %v5166_v36, -inf }
 0x158   : > { %v5172_v41 = vpop.f32.mrf.mxu0  ;;  %v1622_v23 = vsel %vm1473_vm1, %v5168_v37, -inf }
 0x159   : > { %v1610_v49 = vsel %vm1473_vm1, %v5172_v41, -inf  ;;  %v5176_v54 = vpop.f32.mrf.mxu1 }
 0x15a   : > { %1629 = vmax.xlane.f32.xlu0 %v1628_v39  ;;  %1611 = vmax.xlane.f32.xlu1 %v1610_v49  ;;  %v5178_v62 = vpop.f32.mrf.mxu0  ;;  %v1631_v4 = vsel %vm1473_vm1, %v5176_v54, -inf }
 0x15b   : > { %v5180_v1 = vpop.f32.mrf.mxu1  ;;  %v1604_v28 = vsel %vm1473_vm1, %v5178_v62, -inf }
 0x15c   : > { %v5184_v8 = vpop.f32.mrf.mxu0  ;;  %v1625_v33 = vsel %vm1473_vm1, %v5180_v1, -inf }
 0x15d   : > { %v5188_v11 = vpop.f32.mrf.mxu1  ;;  %v1619_v31 = vsel %vm1492_vm2, %v5184_v8, -inf }
 0x15e   : > { %5917 = vst [vmem:[#allocation2_spill] sm:$0xff] %v5188_v11  ;;  %1602 = vmax.xlane.f32.xlu0 %v1601_v9  ;;  %1632 = vmax.xlane.f32.xlu1 %v1631_v4  ;;  %v5190_v15 = vpop.f32.mrf.mxu0  ;;  %v1640_v39 = vsel %vm1492_vm2, %v5188_v11, -inf }
 0x15f   : > { %5918 = vst [vmem:[#allocation3_spill] sm:$0xff] %v5190_v15  ;;  %v5192_v17 = vpop.f32.mrf.mxu1  ;;  %v1613_v49 = vsel %vm1473_vm1, %v5190_v15, -inf }
 0x160   : > { %5919 = vst [vmem:[#allocation4_spill] sm:$0xff] %v5192_v17  ;;  %v4170_v20 = vpop.f32.mrf.mxu0  ;;  %v1634_v9 = vsel %vm1473_vm1, %v5192_v17, -inf }
 0x161   : > { %v4186_v29 = vpop.f32.mrf.mxu1 }
 0x162   : > { %1623 = vmax.xlane.f32.xlu0 %v1622_v23  ;;  %1605 = vmax.xlane.f32.xlu1 %v1604_v28  ;;  %v5206_v4 = vpop.f32.mrf.mxu0 }
 0x163   : > { %5920 = vst [vmem:[#allocation5_spill] sm:$0xff] %v5206_v4  ;;  %v1616_v20 = vsel %vm1473_vm1, %v5206_v4, -inf  ;;  %v5212_v23 = vpop.f32.mrf.mxu1 }
 0x164   : > { %5921 = vst [vmem:[#allocation6_spill] sm:$0xff] %v5212_v23  ;;  %v1637_v28 = vsel %vm1473_vm1, %v5212_v23, -inf }
 0x166   : > { %1626 = vmax.xlane.f32.xlu1 %v1625_v33  ;;  %1620 = vmax.xlane.f32.xlu0 %v1619_v31 }
 0x16a   : > { %1641 = vmax.xlane.f32.xlu1 %v1640_v39  ;;  %1614 = vmax.xlane.f32.xlu0 %v1613_v49 }
 0x16e   : > { %1635 = vmax.xlane.f32.xlu0 %v1634_v9  ;;  %1617 = vmax.xlane.f32.xlu1 %v1616_v20 }
 0x172   : > { %1638 = vmax.xlane.f32.xlu1 %v1637_v28 }
 0x174   : > { %v5216_v29 = vpop.f32.mrf.mxu0 }
 0x175   : > { %5922 = vst [vmem:[#allocation7_spill] sm:$0xff] %v5216_v29  ;;  %v1649_v31 = vsel %vm1473_vm1, %v5216_v29, -inf }
 0x176   : > { %1650 = vmax.xlane.f32.xlu0 %v1649_v31  ;;  %v5220_v33 = vpop.f32.mrf.mxu0 }
 0x177   : > { %5923 = vst [vmem:[#allocation8_spill] sm:$0xff] %v5220_v33  ;;  %v1643_v49 = vsel %vm1473_vm1, %v5220_v33, -inf }
 0x178   : > { %v5222_v39 = vpop.f32.mrf.mxu0 }
 0x179   : > { %5924 = vst [vmem:[#allocation9_spill] sm:$0xff] %v5222_v39  ;;  %v1652_v9 = vsel %vm1473_vm1, %v5222_v39, -inf }
 0x17a   : > { %1644 = vmax.xlane.f32.xlu0 %v1643_v49  ;;  %1653 = vmax.xlane.f32.xlu1 %v1652_v9  ;;  %v5228_v20 = vpop.f32.mrf.mxu0 }
 0x17b   : > { %5925 = vst [vmem:[#allocation10_spill] sm:$0xff] %v5228_v20  ;;  %v1646_v29 = vsel %vm1473_vm1, %v5228_v20, -inf }
 0x17c   : > { %v5230_v28 = vpop.f32.mrf.mxu0 }
 0x17d   : > { %5926 = vst [vmem:[#allocation11_spill] sm:$0xff] %v5230_v28  ;;  %v1661_v31 = vsel %vm1492_vm2, %v5230_v28, -inf }
 0x17e   : > { %1647 = vmax.xlane.f32.xlu1 %v1646_v29  ;;  %1662 = vmax.xlane.f32.xlu0 %v1661_v31  ;;  %v5236_v23 = vpop.f32.mrf.mxu0 }
 0x17f   : > { %5927 = vst [vmem:[#allocation12_spill] sm:$0xff] %v5236_v23  ;;  %v1482_v33 = vpop.xlane.xlu1 %1481  ;;  %v1655_v9 = vsel %vm1473_vm1, %v5236_v23, -inf }
 0x180   : > { %v1666_v4 = vsub.f32 %v4992_v44, %v1482_v33  ;;  %v4202_v39 = vpop.f32.mrf.mxu0 }
 0x181   : > { %v1476_v49 = vpop.xlane.xlu0 %1475 }
 0x182   : > { %v1731_v17 = vmul.f32 1.442695, %v1666_v4  ;;  %v1664_v15 = vsub.f32 %v4998_v47, %v1476_v49  ;;  %1656 = vmax.xlane.f32.xlu0 %v1655_v9  ;;  %v5242_v20 = vpop.f32.mrf.mxu0 }
 0x183   : > { %5928 = vst [vmem:[#allocation13_spill] sm:$0xff] %v5242_v20  ;;  %v1504_v11 = vpop.xlane.xlu1 %1503  ;;  %v1658_v29 = vsel %vm1473_vm1, %v5242_v20, -inf }
 0x184   : > { %4509 = vpow2.f32 %v1731_v17  ;;  %v1727_v31 = vmul.f32 1.442695, %v1664_v15  ;;  %v1673_v28 = vsub.f32 %v4994_v45, %v1504_v11  ;;  %1659 = vmax.xlane.f32.xlu1 %v1658_v29 }
 0x185   : > { %v1507_v44 = vpop.xlane.xlu0 %1506 }
 0x186   : > { %4511 = vpow2.f32 %v1727_v31  ;;  %v1745_v33 = vmul.f32 1.442695, %v1673_v28  ;;  %v1674_v39 = vsub.f32 %v5008_v52, %v1507_v44 }
 0x187   : > { %v1498_v4 = vpop.xlane.xlu1 %1497 }
 0x188   : > { %4513 = vpow2.f32 %v1745_v33  ;;  %v1747_v47 = vmul.f32 1.442695, %v1674_v39  ;;  %v1671_v49 = vsub.f32 %v5000_v48, %v1498_v4 }
 0x189   : > { %v1479_v9 = vpop.xlane.xlu0 %1478 }
 0x18a   : > { %4515 = vpow2.f32 %v1747_v47  ;;  %v1741_v23 = vmul.f32 1.442695, %v1671_v49  ;;  %v1665_v20 = vsub.f32 %v5010_v53, %v1479_v9 }
 0x18b   : > { %v1485_v17 = vpop.xlane.xlu1 %1484 }
 0x18c   : > { %4517 = vpow2.f32 %v1741_v23  ;;  %v1667_v45 = vsub.f32 %v5006_v51, %v1485_v17  ;;  %v1729_v11 = vmul.f32 1.442695, %v1665_v20 }
 0x18d   : > { %v1501_v15 = vpop.xlane.xlu0 %1500 }
 0x18e   : > { %v1733_v29 = vmul.f32 1.442695, %v1667_v45  ;;  %v1672_v28 = vsub.f32 %v5016_v56, %v1501_v15 }
 0x18f   : > { %v1516_v52 = vpop.xlane.xlu1 %1515 }
 0x190   : > { %4519 = vpow2.f32 %v1733_v29  ;;  %v1743_v31 = vmul.f32 1.442695, %v1672_v28  ;;  %v1677_v44 = vsub.f32 %v5020_v58, %v1516_v52 }
 0x191   : > { %v5253_v48 = vpop.eup %4509  ;;  %4521 = vpow2.f32 %v1729_v11  ;;  %v1495_v33 = vpop.xlane.xlu0 %1494 }
 0x192   : > { %4523 = vpow2.f32 %v1743_v31  ;;  %v1753_v53 = vmul.f32 1.442695, %v1677_v44  ;;  %v1670_v23 = vsub.f32 %v5018_v57, %v1495_v33  ;;  %v1859_v51 = vsel %vm1473_vm1, %v5253_v48, 0.0 }
 0x193   : > { %v5258_v20 = vpop.eup %4511  ;;  %v1510_v39 = vpop.xlane.xlu1 %1509  ;;  %1860 = vadd.xlane.f32.xlu1 %v1859_v51 }
 0x194   : > { %v1739_v56 = vmul.f32 1.442695, %v1670_v23  ;;  %v1675_v4 = vsub.f32 %v5026_v61, %v1510_v39  ;;  %4525 = vpow2.f32 %v1753_v53  ;;  %v1853_v49 = vsel %vm1473_vm1, %v5258_v20, 0.0 }
 0x195   : > { %v5261_v47 = vpop.eup %4513  ;;  %v1488_v58 = vpop.xlane.xlu0 %1487 }
 0x196   : > { %4527 = vpow2.f32 %v1739_v56  ;;  %v1749_v9 = vmul.f32 1.442695, %v1675_v4  ;;  %v1668_v57 = vsub.f32 %v5022_v59, %v1488_v58  ;;  %v1880_v17 = vsel %vm1473_vm1, %v5261_v47, 0.0 }
 0x197   : > { %v5268_v45 = vpop.eup %4515  ;;  %v1491_v11 = vpop.xlane.xlu1 %1490  ;;  %1881 = vadd.xlane.f32.xlu0 %v1880_v17  ;;  %1854 = vadd.xlane.f32.xlu1 %v1853_v49 }
 0x198   : > { %v1735_v61 = vmul.f32 1.442695, %v1668_v57  ;;  %v1669_v15 = vsub.f32 %v5038_v5, %v1491_v11  ;;  %4529 = vpow2.f32 %v1749_v9  ;;  %v1883_v52 = vsel %vm1473_vm1, %v5268_v45, 0.0 }
 0x199   : > { %v5271_v29 = vpop.eup %4517  ;;  %v1513_v28 = vpop.xlane.xlu0 %1512 }
 0x19a   : > { %4531 = vpow2.f32 %v1735_v61  ;;  %v1737_v59 = vmul.f32 1.442695, %v1669_v15  ;;  %v1676_v31 = vsub.f32 %v5042_v7, %v1513_v28  ;;  %v1874_v44 = vsel %vm1473_vm1, %v5271_v29, 0.0 }
 0x19b   : > { %1875 = vadd.xlane.f32.xlu0 %v1874_v44  ;;  %1884 = vadd.xlane.f32.xlu1 %v1883_v52 }
 0x19c   : > { %v1751_v33 = vmul.f32 1.442695, %v1676_v31  ;;  %4533 = vpow2.f32 %v1737_v59 }
 0x19d   : > { %v5278_v53 = vpop.eup %4519 }
 0x19e   : > { %v5280_v5 = vpop.eup %4521  ;;  %4535 = vpow2.f32 %v1751_v33  ;;  %v1862_v23 = vsel %vm1473_vm1, %v5278_v53, 0.0 }
 0x19f   : > { %v5284_v51 = vpop.eup %4523  ;;  %v1525_v39 = vpop.xlane.xlu0 %1524  ;;  %1863 = vadd.xlane.f32.xlu0 %v1862_v23  ;;  %v1856_v49 = vsel %vm1473_vm1, %v5280_v5, 0.0 }
 0x1a0   : > { %v1680_v7 = vsub.f32 %v5048_v10, %v1525_v39  ;;  %v1877_v56 = vsel %vm1473_vm1, %v5284_v51, 0.0 }
 0x1a1   : > { %1878 = vadd.xlane.f32.xlu1 %v1877_v56  ;;  %v5289_v4 = vpop.eup %4525 }
 0x1a2   : > { %v1759_v58 = vmul.f32 1.442695, %v1680_v7  ;;  %v1892_v59 = vsel %vm1492_vm2, %v5289_v4, 0.0 }
 0x1a3   : > { %v5293_v9 = vpop.eup %4527  ;;  %v1546_v57 = vpop.xlane.xlu0 %1545  ;;  %1857 = vadd.xlane.f32.xlu0 %v1856_v49 }
 0x1a4   : > { %v1528_v17 = vpop.xlane.xlu1 %1527  ;;  %4537 = vpow2.f32 %v1759_v58  ;;  %v1687_v11 = vsub.f32 %v5052_v12, %v1546_v57  ;;  %v1871_v61 = vsel %vm1492_vm2, %v5293_v9, 0.0 }
 0x1a5   : > { %v1681_v10 = vsub.f32 %v5060_v16, %v1528_v17  ;;  %1872 = vadd.xlane.f32.xlu1 %v1871_v61  ;;  %v5299_v15 = vpop.eup %4529 }
 0x1a6   : > { %v1773_v28 = vmul.f32 1.442695, %v1687_v11  ;;  %v1886_v58 = vsel %vm1473_vm1, %v5299_v15, 0.0 }
 0x1a7   : > { %v1761_v52 = vmul.f32 1.442695, %v1681_v10  ;;  %v5303_v31 = vpop.eup %4531  ;;  %v1519_v44 = vpop.xlane.xlu0 %1518  ;;  %1893 = vadd.xlane.f32.xlu0 %v1892_v59  ;;  %v4473_v10 = vld [vmem:[%s5323_s24 + $0x18] ss:$0 sps:$4 sm:$0x11]   ;;  %v4769_v59 = vmov 0  }
 0x1a8   : > { %v1549_v33 = vpop.xlane.xlu1 %1548  ;;  %4539 = vpow2.f32 %v1773_v28  ;;  %v1678_v12 = vsub.f32 %v5054_v13, %v1519_v44  ;;  %v1865_v23 = vsel %vm1473_vm1, %v5303_v31, 0.0  ;;  %v5328_v44 = vsel %vm2300_vm3, 65535, %v4769_v59 }
 0x1a9   : > { %v1688_v16 = vsub.f32 %v5064_v18, %v1549_v33  ;;  %4541 = vpow2.f32 %v1761_v52  ;;  %1866 = vadd.xlane.f32.xlu1 %v1865_v23  ;;  %v5309_v39 = vpop.eup %4533 }
 0x1aa   : > { %v1755_v7 = vmul.f32 1.442695, %v1678_v12 }
 0x1ab   : > { %v1775_v56 = vmul.f32 1.442695, %v1688_v16  ;;  %v5313_v49 = vpop.eup %4535  ;;  %v1540_v57 = vpop.xlane.xlu0 %1539  ;;  %1887 = vadd.xlane.f32.xlu0 %v1886_v58  ;;  %v2304_v16 = vand.u32 %v4473_v10, %v5328_v44 }
 0x1ac   : > { %v1522_v17 = vpop.xlane.xlu1 %1521  ;;  %4543 = vpow2.f32 %v1755_v7  ;;  %v1685_v13 = vsub.f32 %v5056_v14, %v1540_v57  ;;  %v1889_v11 = vsel %vm1473_vm1, %v5313_v49, 0.0  ;;  %v1868_v14 = vsel %vm1473_vm1, %v5309_v39, 0.0 }
 0x1ad   : > { %v1679_v18 = vsub.f32 %v5066_v19, %v1522_v17  ;;  %4545 = vpow2.f32 %v1775_v56  ;;  %1890 = vadd.xlane.f32.xlu1 %v1889_v11  ;;  %4203 = vmatprep.subr.bf16.mxu1 %v2304_v16 }
 0x1ae   : > { %v1769_v61 = vmul.f32 1.442695, %v1685_v13  ;;  %4204 = vmatpush3.bf16.msra.mxu1 %v2304_v16  ;;  %v4474_v13 = vld [vmem:[%s5323_s24 + $0x10] sm:$0xff]  }
 0x1af   : > { %v1757_v28 = vmul.f32 1.442695, %v1679_v18  ;;  %v1537_v19 = vpop.xlane.xlu0 %1536  ;;  %1869 = vadd.xlane.f32.xlu0 %v1868_v14  ;;  %4205 = vmatprep.subr.bf16.mxu1 %v4474_v13 }
 0x1b0   : > { %v1543_v52 = vpop.xlane.xlu1 %1542  ;;  %4547 = vpow2.f32 %v1769_v61  ;;  %v1684_v12 = vsub.f32 %v5072_v22, %v1537_v19 }
 0x1b1   : > { %v1686_v33 = vsub.f32 %v5070_v21, %v1543_v52  ;;  %v5333_v23 = vpop.eup %4537  ;;  %4549 = vpow2.f32 %v1757_v28 }
 0x1b2   : > { %v1767_v56 = vmul.f32 1.442695, %v1684_v12  ;;  %v1901_v58 = vsel %vm1473_vm1, %v5333_v23, 0.0  ;;  %4206 = vmatpush3.bf16.msra.mxu1 %v4474_v13  ;;  %v4476_v12 = vld [vmem:[%s5323_s24] sm:$0xff]  }
 0x1b3   : > { %v1771_v7 = vmul.f32 1.442695, %v1686_v33  ;;  %v1531_v17 = vpop.xlane.xlu0 %1530  ;;  %1902 = vadd.xlane.f32.xlu1 %v1901_v58 }
 0x1b4   : > { %v1558_v57 = vpop.xlane.xlu1 %1557  ;;  %v1682_v22 = vsub.f32 %v5078_v25, %v1531_v17 }
 0x1b5   : > { %4551 = vpow2.f32 %v1771_v7  ;;  %v1691_v21 = vsub.f32 %v5076_v24, %v1558_v57  ;;  %v5340_v18 = vpop.eup %4539  ;;  %v4475_v24 = vld [vmem:[%s5323_s24 + $0x8] sm:$0xff]  }
 0x1b6   : > { %4553 = vpow2.f32 %v1767_v56  ;;  %v5342_v11 = vpop.eup %4541  ;;  %v1763_v61 = vmul.f32 1.442695, %v1682_v22  ;;  %v1922_v28 = vsel %vm1473_vm1, %v5340_v18, 0.0  ;;  %4207 = vmatprep.subr.bf16.mxu1 %v4475_v24 }
 0x1b7   : > { %v1781_v10 = vmul.f32 1.442695, %v1691_v21  ;;  %v1552_v14 = vpop.xlane.xlu0 %1551  ;;  %v1904_v19 = vsel %vm1473_vm1, %v5342_v11, 0.0  ;;  %1923 = vadd.xlane.f32.xlu1 %v1922_v28  ;;  %4208 = vmatpush3.bf16.msra.mxu1 %v4475_v24 }
 0x1b8   : > { %v1534_v52 = vpop.xlane.xlu1 %1533  ;;  %v1689_v25 = vsub.f32 %v5082_v27, %v1552_v14  ;;  %1905 = vadd.xlane.f32.xlu0 %v1904_v19  ;;  %4209 = vmatprep.subr.bf16.mxu1 %v4476_v12  ;;  %v4477_v14 = vld [vmem:[%s5323_s24 + $0x34] ss:$0 sps:$4 sm:$0x11]  }
 0x1b9   : > { %4555 = vpow2.f32 %v1781_v10  ;;  %v1683_v59 = vsub.f32 %v5094_v35, %v1534_v52  ;;  %v5351_v33 = vpop.eup %4543 }
 0x1ba   : > { %4557 = vpow2.f32 %v1763_v61  ;;  %v5354_v16 = vpop.eup %4545  ;;  %v1777_v7 = vmul.f32 1.442695, %v1689_v25  ;;  %v1895_v58 = vsel %vm1473_vm1, %v5351_v33, 0.0 }
 0x1bb   : > { %v1765_v56 = vmul.f32 1.442695, %v1683_v59  ;;  %v1925_v17 = vsel %vm1473_vm1, %v5354_v16, 0.0  ;;  %1896 = vadd.xlane.f32.xlu1 %v1895_v58  ;;  %4210 = vmatpush3.bf16.msra.mxu1 %v4476_v12  ;;  %v5380_v12 = vand.u32 %v4477_v14, %v5328_v44  ;;  %v4479_v14 = vld [vmem:[%s5323_s24 + $0x50] ss:$0 sps:$4 sm:$0x11]  }
 0x1bc   : > { %v1555_v57 = vpop.xlane.xlu1 %1554  ;;  %4559 = vpow2.f32 %v1777_v7  ;;  %1926 = vadd.xlane.f32.xlu0 %v1925_v17 }
 0x1bd   : > { %v1690_v27 = vsub.f32 %v5100_v38, %v1555_v57  ;;  %v5361_v35 = vpop.eup %4547  ;;  %4561 = vpow2.f32 %v1765_v56  ;;  %4219 = vmatprep.subr.bf16.mxu1 %v5380_v12 }
 0x1be   : > { %v5363_v13 = vpop.eup %4549  ;;  %v1916_v22 = vsel %vm1473_vm1, %v5361_v35, 0.0 }
 0x1bf   : > { %v1779_v21 = vmul.f32 1.442695, %v1690_v27  ;;  %v1567_v10 = vpop.xlane.xlu0 %1566  ;;  %v1898_v61 = vsel %vm1473_vm1, %v5363_v13, 0.0  ;;  %1917 = vadd.xlane.f32.xlu1 %v1916_v22 }
 0x1c0   : > { %v1694_v38 = vsub.f32 %v5104_v40, %v1567_v10  ;;  %1899 = vadd.xlane.f32.xlu0 %v1898_v61 }
 0x1c1   : > { %4563 = vpow2.f32 %v1779_v21 }
 0x1c2   : > { %v5370_v28 = vpop.eup %4551  ;;  %v1787_v19 = vmul.f32 1.442695, %v1694_v38 }
 0x1c3   : > { %v5373_v52 = vpop.eup %4553  ;;  %v1919_v24 = vsel %vm1473_vm1, %v5370_v28, 0.0  ;;  %v1588_v25 = vpop.xlane.xlu0 %1587 }
 0x1c4   : > { %v1570_v59 = vpop.xlane.xlu1 %1569  ;;  %v1913_v7 = vsel %vm1492_vm2, %v5373_v52, 0.0  ;;  %4565 = vpow2.f32 %v1787_v19  ;;  %v1701_v40 = vsub.f32 %v5108_v42, %v1588_v25  ;;  %1920 = vadd.xlane.f32.xlu0 %v1919_v24 }
 0x1c5   : > { %v1695_v56 = vsub.f32 %v5116_v50, %v1570_v59  ;;  %1914 = vadd.xlane.f32.xlu1 %v1913_v7 }
 0x1c6   : > { %v5384_v58 = vpop.eup %4555  ;;  %v1801_v17 = vmul.f32 1.442695, %v1701_v40 }
 0x1c7   : > { %v5387_v57 = vpop.eup %4557  ;;  %v1789_v27 = vmul.f32 1.442695, %v1695_v56  ;;  %v1934_v21 = vsel %vm1492_vm2, %v5384_v58, 0.0  ;;  %v1561_v22 = vpop.xlane.xlu0 %1560 }
 0x1c8   : > { %v1591_v10 = vpop.xlane.xlu1 %1590  ;;  %v1907_v42 = vsel %vm1473_vm1, %v5387_v57, 0.0  ;;  %4567 = vpow2.f32 %v1801_v17  ;;  %v1692_v50 = vsub.f32 %v5110_v43, %v1561_v22  ;;  %1935 = vadd.xlane.f32.xlu0 %v1934_v21 }
 0x1c9   : > { %v1702_v61 = vsub.f32 %v5120_v55, %v1591_v10  ;;  %1908 = vadd.xlane.f32.xlu1 %v1907_v42  ;;  %v5395_v38 = vpop.eup %4559  ;;  %4569 = vpow2.f32 %v1789_v27  ;;  %v2504_v55 = vand.u32 %v4479_v14, %v5328_v44 }
 0x1ca   : > { %v5398_v19 = vpop.eup %4561  ;;  %v1783_v24 = vmul.f32 1.442695, %v1692_v50  ;;  %v1928_v59 = vsel %vm1473_vm1, %v5395_v38, 0.0 }
 0x1cb   : > { %v1803_v25 = vmul.f32 1.442695, %v1702_v61  ;;  %v1582_v7 = vpop.xlane.xlu0 %1581  ;;  %v1910_v43 = vsel %vm1473_vm1, %v5398_v19, 0.0  ;;  %4235 = vmatprep.subr.bf16.mxu0 %v2504_v55  ;;  %v4481_v61 = vld [vmem:[%s5323_s24 + $0x48] sm:$0xff]  }
 0x1cc   : > { %v1564_v40 = vpop.xlane.xlu1 %1563  ;;  %4571 = vpow2.f32 %v1783_v24  ;;  %v1699_v56 = vsub.f32 %v5112_v46, %v1582_v7  ;;  %1911 = vadd.xlane.f32.xlu0 %v1910_v43  ;;  %4236 = vmatpush3.bf16.msra.mxu0 %v2504_v55  ;;  %v4483_v43 = vld [vmem:[%s5323_s24 + $0x40] sm:$0xff]  }
 0x1cd   : > { %v1693_v17 = vsub.f32 %v5122_v60, %v1564_v40  ;;  %1929 = vadd.xlane.f32.xlu1 %v1928_v59  ;;  %4573 = vpow2.f32 %v1803_v25  ;;  %4237 = vmatprep.subr.bf16.mxu0 %v4481_v61 }
 0x1ce   : > { %v5407_v27 = vpop.eup %4563  ;;  %v1797_v21 = vmul.f32 1.442695, %v1699_v56 }
 0x1cf   : > { %v1785_v22 = vmul.f32 1.442695, %v1693_v17  ;;  %v1931_v10 = vsel %vm1473_vm1, %v5407_v27, 0.0  ;;  %v1579_v50 = vpop.xlane.xlu0 %1578 }
 0x1d0   : > { %v1585_v42 = vpop.xlane.xlu1 %1584  ;;  %4575 = vpow2.f32 %v1797_v21  ;;  %v1698_v60 = vsub.f32 %v5128_v0, %v1579_v50  ;;  %1932 = vadd.xlane.f32.xlu0 %v1931_v10  ;;  %4238 = vmatpush3.bf16.msra.mxu0 %v4481_v61 }
 0x1d1   : > { %v1700_v46 = vsub.f32 %v5126_v63, %v1585_v42  ;;  %v5414_v14 = vpop.eup %4565  ;;  %4577 = vpow2.f32 %v1785_v22  ;;  %4239 = vmatprep.subr.bf16.mxu0 %v4483_v43 }
 0x1d2   : > { %v1795_v25 = vmul.f32 1.442695, %v1698_v60  ;;  %v1943_v59 = vsel %vm1473_vm1, %v5414_v14, 0.0 }
 0x1d3   : > { %v1799_v24 = vmul.f32 1.442695, %v1700_v46  ;;  %v1573_v40 = vpop.xlane.xlu0 %1572  ;;  %1944 = vadd.xlane.f32.xlu1 %v1943_v59 }
 0x1d4   : > { %v1600_v7 = vpop.xlane.xlu1 %1599  ;;  %v1696_v0 = vsub.f32 %v5134_v3, %v1573_v40  ;;  %4240 = vmatpush3.bf16.msra.mxu0 %v4483_v43 }
 0x1d5   : > { %4579 = vpow2.f32 %v1799_v24  ;;  %v1705_v63 = vsub.f32 %v5132_v2, %v1600_v7  ;;  %v5421_v55 = vpop.eup %4567  ;;  %v4485_v2 = vld [vmem:[%s5323_s24 + $0x38] sm:$0xff]  }
 0x1d6   : > { %4581 = vpow2.f32 %v1795_v25  ;;  %v5423_v56 = vpop.eup %4569  ;;  %v1791_v21 = vmul.f32 1.442695, %v1696_v0  ;;  %v1964_v22 = vsel %vm1473_vm1, %v5421_v55, 0.0  ;;  %4241 = vmatprep.subr.bf16.mxu0 %v4485_v2 }
 0x1d7   : > { %v1809_v17 = vmul.f32 1.442695, %v1705_v63  ;;  %v1594_v10 = vpop.xlane.xlu0 %1593  ;;  %v1946_v50 = vsel %vm1473_vm1, %v5423_v56, 0.0  ;;  %1965 = vadd.xlane.f32.xlu1 %v1964_v22 }
 0x1d8   : > { %v1576_v42 = vpop.xlane.xlu1 %1575  ;;  %v1703_v3 = vsub.f32 %v5138_v6, %v1594_v10  ;;  %1947 = vadd.xlane.f32.xlu0 %v1946_v50  ;;  %4242 = vmatpush3.bf16.msra.mxu0 %v4485_v2 }
 0x1d9   : > { %4583 = vpow2.f32 %v1809_v17  ;;  %v1697_v46 = vsub.f32 %v5150_v26, %v1576_v42  ;;  %v5432_v60 = vpop.eup %4571 }
 0x1da   : > { %4585 = vpow2.f32 %v1791_v21  ;;  %v5434_v61 = vpop.eup %4573  ;;  %v1805_v24 = vmul.f32 1.442695, %v1703_v3  ;;  %v1937_v59 = vsel %vm1473_vm1, %v5432_v60, 0.0 }
 0x1db   : > { %v1793_v25 = vmul.f32 1.442695, %v1697_v46  ;;  %v1967_v40 = vsel %vm1473_vm1, %v5434_v61, 0.0  ;;  %1938 = vadd.xlane.f32.xlu1 %v1937_v59 }
 0x1dc   : > { %v1597_v7 = vpop.xlane.xlu1 %1596  ;;  %4587 = vpow2.f32 %v1805_v24  ;;  %1968 = vadd.xlane.f32.xlu0 %v1967_v40 }
 0x1dd   : > { %v1704_v6 = vsub.f32 %v5156_v30, %v1597_v7  ;;  %v5441_v26 = vpop.eup %4575  ;;  %4589 = vpow2.f32 %v1793_v25 }
 0x1de   : > { %v5443_v63 = vpop.eup %4577  ;;  %v1958_v43 = vsel %vm1473_vm1, %v5441_v26, 0.0 }
 0x1df   : > { %v1807_v0 = vmul.f32 1.442695, %v1704_v6  ;;  %v1609_v17 = vpop.xlane.xlu0 %1608  ;;  %v1940_v21 = vsel %vm1473_vm1, %v5443_v63, 0.0  ;;  %1959 = vadd.xlane.f32.xlu1 %v1958_v43 }
 0x1e0   : > { %v1708_v22 = vsub.f32 %v5160_v32, %v1609_v17  ;;  %1941 = vadd.xlane.f32.xlu0 %v1940_v21 }
 0x1e1   : > { %4591 = vpow2.f32 %v1807_v0 }
 0x1e2   : > { %v5450_v30 = vpop.eup %4579  ;;  %v1815_v42 = vmul.f32 1.442695, %v1708_v22 }
 0x1e3   : > { %v5452_v10 = vpop.eup %4581  ;;  %v1961_v50 = vsel %vm1473_vm1, %v5450_v30, 0.0  ;;  %v1630_v2 = vpop.xlane.xlu0 %1629 }
 0x1e4   : > { %v1612_v3 = vpop.xlane.xlu1 %1611  ;;  %v1955_v46 = vsel %vm1492_vm2, %v5452_v10, 0.0  ;;  %4593 = vpow2.f32 %v1815_v42  ;;  %v1715_v24 = vsub.f32 %v5164_v34, %v1630_v2  ;;  %1962 = vadd.xlane.f32.xlu0 %v1961_v50 }
 0x1e5   : > { %v1709_v25 = vsub.f32 %v5172_v41, %v1612_v3  ;;  %1956 = vadd.xlane.f32.xlu1 %v1955_v46 }
 0x1e6   : > { %v5460_v32 = vpop.eup %4583  ;;  %v1829_v7 = vmul.f32 1.442695, %v1715_v24 }
 0x1e7   : > { %v5462_v59 = vpop.eup %4585  ;;  %v1817_v40 = vmul.f32 1.442695, %v1709_v25  ;;  %v1976_v6 = vsel %vm1492_vm2, %v5460_v32, 0.0  ;;  %v1603_v0 = vpop.xlane.xlu0 %1602 }
 0x1e8   : > { %v1633_v43 = vpop.xlane.xlu1 %1632  ;;  %v1949_v17 = vsel %vm1473_vm1, %v5462_v59, 0.0  ;;  %4595 = vpow2.f32 %v1829_v7  ;;  %v1706_v34 = vsub.f32 %v5166_v36, %v1603_v0  ;;  %1977 = vadd.xlane.f32.xlu0 %v1976_v6  ;;  %v4489_v36 = vld [vmem:[%s5323_s24 + $0x88] ss:$0 sps:$4 sm:$0x11]  }
 0x1e9   : > { %v1716_v41 = vsub.f32 %v5176_v54, %v1633_v43  ;;  %1950 = vadd.xlane.f32.xlu1 %v1949_v17  ;;  %v5470_v21 = vpop.eup %4587  ;;  %4597 = vpow2.f32 %v1817_v40  ;;  %v5484_v40 = vand.u32 %v4489_v36, %v5328_v44 }
 0x1ea   : > { %v5472_v22 = vpop.eup %4589  ;;  %v1811_v42 = vmul.f32 1.442695, %v1706_v34  ;;  %v1970_v2 = vsel %vm1473_vm1, %v5470_v21, 0.0 }
 0x1eb   : > { %v1831_v50 = vmul.f32 1.442695, %v1716_v41  ;;  %v1624_v3 = vpop.xlane.xlu0 %1623  ;;  %v1952_v24 = vsel %vm1473_vm1, %v5472_v22, 0.0  ;;  %4267 = vmatprep.subr.bf16.mxu0 %v5484_v40 }
 0x1ec   : > { %v1606_v46 = vpop.xlane.xlu1 %1605  ;;  %4599 = vpow2.f32 %v1811_v42  ;;  %v1713_v54 = vsub.f32 %v5168_v37, %v1624_v3  ;;  %1953 = vadd.xlane.f32.xlu0 %v1952_v24  ;;  %v5930_v24 = vld [vmem:[#allocation2_spill] sm:$0xff] }
 0x1ed   : > { %v1707_v25 = vsub.f32 %v5178_v62, %v1606_v46  ;;  %1971 = vadd.xlane.f32.xlu1 %v1970_v2  ;;  %4601 = vpow2.f32 %v1831_v50 }
 0x1ee   : > { %v5481_v7 = vpop.eup %4591  ;;  %v1825_v6 = vmul.f32 1.442695, %v1713_v54  ;;  %v5931_v54 = vld [vmem:[#allocation3_spill] sm:$0xff] }
 0x1ef   : > { %v1813_v0 = vmul.f32 1.442695, %v1707_v25  ;;  %v1973_v43 = vsel %vm1473_vm1, %v5481_v7, 0.0  ;;  %v1621_v34 = vpop.xlane.xlu0 %1620 }
 0x1f0   : > { %v1627_v17 = vpop.xlane.xlu1 %1626  ;;  %4603 = vpow2.f32 %v1825_v6  ;;  %v1712_v62 = vsub.f32 %v5184_v8, %v1621_v34  ;;  %1974 = vadd.xlane.f32.xlu0 %v1973_v43 }
 0x1f1   : > { %v1714_v37 = vsub.f32 %v5180_v1, %v1627_v17  ;;  %v5491_v41 = vpop.eup %4593  ;;  %4605 = vpow2.f32 %v1813_v0 }
 0x1f2   : > { %5929 = vst [vmem:[#allocation14_spill] sm:$0xff] %v5491_v41  ;;  %v1823_v50 = vmul.f32 1.442695, %v1712_v62  ;;  %v1985_v2 = vsel %vm1473_vm1, %v5491_v41, 0.0  ;;  %v5934_v62 = vld [vmem:[#allocation4_spill] sm:$0xff] }
 0x1f3   : > { %v1827_v42 = vmul.f32 1.442695, %v1714_v37  ;;  %v1615_v46 = vpop.xlane.xlu0 %1614  ;;  %1986 = vadd.xlane.f32.xlu1 %v1985_v2  ;;  %v5935_v2 = vld [vmem:[#allocation5_spill] sm:$0xff] }
 0x1f4   : > { %v1642_v3 = vpop.xlane.xlu1 %1641  ;;  %v1710_v25 = vsub.f32 %v5931_v54, %v1615_v46 }
 0x1f5   : > { %4607 = vpow2.f32 %v1827_v42  ;;  %v1719_v36 = vsub.f32 %v5930_v24, %v1642_v3  ;;  %v5497_v1 = vpop.eup %4595 }
 0x1f6   : > { %5932 = vst [vmem:[#allocation2_spill] sm:$0xff] %v5497_v1  ;;  %4609 = vpow2.f32 %v1823_v50  ;;  %v5499_v8 = vpop.eup %4597  ;;  %v1819_v0 = vmul.f32 1.442695, %v1710_v25  ;;  %v2006_v43 = vsel %vm1473_vm1, %v5497_v1, 0.0 }
 0x1f7   : > { %5933 = vst [vmem:[#allocation3_spill] sm:$0xff] %v5499_v8  ;;  %v1837_v6 = vmul.f32 1.442695, %v1719_v36  ;;  %v1636_v17 = vpop.xlane.xlu0 %1635  ;;  %v1988_v37 = vsel %vm1473_vm1, %v5499_v8, 0.0  ;;  %2007 = vadd.xlane.f32.xlu1 %v2006_v43 }
 0x1f8   : > { %v1618_v34 = vpop.xlane.xlu1 %1617  ;;  %v1717_v42 = vsub.f32 %v5934_v62, %v1636_v17  ;;  %1989 = vadd.xlane.f32.xlu0 %v1988_v37 }
 0x1f9   : > { %4611 = vpow2.f32 %v1837_v6  ;;  %v1711_v3 = vsub.f32 %v5935_v2, %v1618_v34  ;;  %v5507_v50 = vpop.eup %4599  ;;  %v5938_v6 = vld [vmem:[#allocation6_spill] sm:$0xff] }
 0x1fa   : > { %5936 = vst [vmem:[#allocation4_spill] sm:$0xff] %v5507_v50  ;;  %4613 = vpow2.f32 %v1819_v0  ;;  %v5509_v46 = vpop.eup %4601  ;;  %v1833_v24 = vmul.f32 1.442695, %v1717_v42  ;;  %v1979_v54 = vsel %vm1473_vm1, %v5507_v50, 0.0 }
 0x1fb   : > { %5937 = vst [vmem:[#allocation5_spill] sm:$0xff] %v5509_v46  ;;  %v1821_v36 = vmul.f32 1.442695, %v1711_v3  ;;  %v2009_v43 = vsel %vm1473_vm1, %v5509_v46, 0.0  ;;  %1980 = vadd.xlane.f32.xlu1 %v1979_v54  ;;  %v5941_v3 = vld [vmem:[#allocation7_spill] sm:$0xff] }
 0x1fc   : > { %v1639_v25 = vpop.xlane.xlu1 %1638  ;;  %4615 = vpow2.f32 %v1833_v24  ;;  %2010 = vadd.xlane.f32.xlu0 %v2009_v43 }
 0x1fd   : > { %v1718_v17 = vsub.f32 %v5938_v6, %v1639_v25  ;;  %v5516_v34 = vpop.eup %4603  ;;  %4617 = vpow2.f32 %v1821_v36 }
 0x1fe   : > { %5939 = vst [vmem:[#allocation6_spill] sm:$0xff] %v5516_v34  ;;  %v5518_v0 = vpop.eup %4605  ;;  %v2000_v62 = vsel %vm1473_vm1, %v5516_v34, 0.0  ;;  %v5944_v34 = vld [vmem:[#allocation8_spill] sm:$0xff] }
 0x1ff   : > { %5940 = vst [vmem:[#allocation15_spill] sm:$0xff] %v5518_v0  ;;  %v1835_v37 = vmul.f32 1.442695, %v1718_v17  ;;  %v1651_v42 = vpop.xlane.xlu0 %1650  ;;  %v1982_v2 = vsel %vm1473_vm1, %v5518_v0, 0.0  ;;  %2001 = vadd.xlane.f32.xlu1 %v2000_v62 }
 0x200   : > { %v1722_v24 = vsub.f32 %v5941_v3, %v1651_v42  ;;  %1983 = vadd.xlane.f32.xlu0 %v1982_v2 }
 0x201   : > { %4619 = vpow2.f32 %v1835_v37 }
 0x202   : > { %v5525_v54 = vpop.eup %4607  ;;  %v1843_v36 = vmul.f32 1.442695, %v1722_v24 }
 0x203   : > { %5942 = vst [vmem:[#allocation7_spill] sm:$0xff] %v5525_v54  ;;  %v5527_v25 = vpop.eup %4609  ;;  %v2003_v43 = vsel %vm1473_vm1, %v5525_v54, 0.0  ;;  %v1645_v6 = vpop.xlane.xlu0 %1644 }
 0x204   : > { %5943 = vst [vmem:[#allocation16_spill] sm:$0xff] %v5527_v25  ;;  %v1654_v17 = vpop.xlane.xlu1 %1653  ;;  %v1997_v1 = vsel %vm1492_vm2, %v5527_v25, 0.0  ;;  %4621 = vpow2.f32 %v1843_v36  ;;  %v1720_v62 = vsub.f32 %v5944_v34, %v1645_v6  ;;  %2004 = vadd.xlane.f32.xlu0 %v2003_v43  ;;  %v5947_v25 = vld [vmem:[#allocation10_spill] sm:$0xff] }
 0x205   : > { %1998 = vadd.xlane.f32.xlu1 %v1997_v1  ;;  %v5949_v1 = vld [vmem:[#allocation11_spill] sm:$0xff] }
 0x206   : > { %v5534_v37 = vpop.eup %4611  ;;  %v1839_v2 = vmul.f32 1.442695, %v1720_v62 }
 0x207   : > { %5945 = vst [vmem:[#allocation8_spill] sm:$0xff] %v5534_v37  ;;  %v5536_v42 = vpop.eup %4613  ;;  %v2018_v3 = vsel %vm1492_vm2, %v5534_v37, 0.0  ;;  %v1663_v54 = vpop.xlane.xlu0 %1662 }
 0x208   : > { %5946 = vst [vmem:[#allocation17_spill] sm:$0xff] %v5536_v42  ;;  %v1648_v24 = vpop.xlane.xlu1 %1647  ;;  %v1991_v46 = vsel %vm1473_vm1, %v5536_v42, 0.0  ;;  %4623 = vpow2.f32 %v1839_v2  ;;  %2019 = vadd.xlane.f32.xlu0 %v2018_v3  ;;  %v1726_v43 = vsub.f32 %v5949_v1, %v1663_v54  ;;  %v5951_v42 = vld [vmem:[#allocation9_spill] sm:$0xff] }
 0x209   : > { %v1721_v36 = vsub.f32 %v5947_v25, %v1648_v24  ;;  %1992 = vadd.xlane.f32.xlu1 %v1991_v46  ;;  %v5543_v34 = vpop.eup %4615  ;;  %v1723_v2 = vsub.f32 %v5951_v42, %v1654_v17  ;;  %v5952_v25 = vld [vmem:[#allocation12_spill] sm:$0xff] }
 0x20a   : > { %5948 = vst [vmem:[#allocation10_spill] sm:$0xff] %v5543_v34  ;;  %v5546_v6 = vpop.eup %4617  ;;  %v2012_v37 = vsel %vm1473_vm1, %v5543_v34, 0.0  ;;  %v1851_v54 = vmul.f32 1.442695, %v1726_v43 }
 0x20b   : > { %5950 = vst [vmem:[#allocation11_spill] sm:$0xff] %v5546_v6  ;;  %v1841_v62 = vmul.f32 1.442695, %v1721_v36  ;;  %v1994_v41 = vsel %vm1473_vm1, %v5546_v6, 0.0  ;;  %v1657_v0 = vpop.xlane.xlu0 %1656  ;;  %v5954_v36 = vld [vmem:[#allocation13_spill] sm:$0xff] }
 0x20c   : > { %1995 = vadd.xlane.f32.xlu0 %v1994_v41  ;;  %v1724_v46 = vsub.f32 %v5952_v25, %v1657_v0  ;;  %v1845_v8 = vmul.f32 1.442695, %v1723_v2 }
 0x20d   : > { %4625 = vpow2.f32 %v1841_v62  ;;  %2013 = vadd.xlane.f32.xlu1 %v2012_v37  ;;  %v1660_v24 = vpop.xlane.xlu1 %1659 }
 0x20e   : > { %v5554_v3 = vpop.eup %4619  ;;  %v1847_v1 = vmul.f32 1.442695, %v1724_v46  ;;  %v1725_v50 = vsub.f32 %v5954_v36, %v1660_v24 }
 0x20f   : > { %5953 = vst [vmem:[#allocation9_spill] sm:$0xff] %v5554_v3  ;;  %v2015_v34 = vsel %vm1473_vm1, %v5554_v3, 0.0  ;;  %v4478_v3 = vld [vmem:[%s5323_s24 + $0x2c] sm:$0xff]  }
 0x210   : > { %4627 = vpow2.f32 %v1847_v1  ;;  %v1849_v6 = vmul.f32 1.442695, %v1725_v50  ;;  %2016 = vadd.xlane.f32.xlu0 %v2015_v34 }
 0x211   : > { %v5559_v17 = vpop.eup %4621  ;;  %4629 = vpow2.f32 %v1851_v54 }
 0x212   : > { %5955 = vst [vmem:[#allocation12_spill] sm:$0xff] %v5559_v17  ;;  %4631 = vpow2.f32 %v1849_v6  ;;  %v2027_v41 = vsel %vm1473_vm1, %v5559_v17, 0.0 }
 0x213   : > { %2028 = vadd.xlane.f32.xlu1 %v2027_v41  ;;  %4633 = vpow2.f32 %v1845_v8 }
 0x215   : > { %v5563_v0 = vpop.eup %4623 }
 0x216   : > { %5956 = vst [vmem:[#allocation13_spill] sm:$0xff] %v5563_v0  ;;  %v2021_v37 = vsel %vm1473_vm1, %v5563_v0, 0.0 }
 0x217   : > { %2022 = vadd.xlane.f32.xlu1 %v2021_v37 }
 0x21a   : > { %v5567_v42 = vpop.eup %4625 }
 0x21b   : > { %5957 = vst [vmem:[#allocation18_spill] sm:$0xff] %v5567_v42  ;;  %v2024_v50 = vsel %vm1473_vm1, %v5567_v42, 0.0 }
 0x21c   : > { %2025 = vadd.xlane.f32.xlu0 %v2024_v50  ;;  %v1861_v34 = vpop.xlane.xlu1 %1860 }
 0x21d   : > { %v5571_v43 = vpop.eup %4627 }
 0x21e   : > { %5958 = vst [vmem:[#allocation19_spill] sm:$0xff] %v5571_v43  ;;  %v5573_v6 = vpop.eup %4629  ;;  %v2033_v8 = vsel %vm1473_vm1, %v5571_v43, 0.0 }
 0x21f   : > { %5959 = vst [vmem:[#allocation20_spill] sm:$0xff] %v5573_v6  ;;  %v5577_v62 = vpop.eup %4631  ;;  %2034 = vadd.xlane.f32.xlu1 %v2033_v8  ;;  %v2039_v24 = vsel %vm1492_vm2, %v5573_v6, 0.0 }
 0x220   : > { %5960 = vst [vmem:[#allocation21_spill] sm:$0xff] %v5577_v62  ;;  %v1882_v2 = vpop.xlane.xlu0 %1881  ;;  %v1855_v25 = vpop.xlane.xlu1 %1854  ;;  %v2036_v46 = vsel %vm1473_vm1, %v5577_v62, 0.0 }
 0x221   : > { %v5581_v54 = vpop.eup %4633  ;;  %2037 = vadd.xlane.f32.xlu0 %v2036_v46 }
 0x222   : > { %5961 = vst [vmem:[#allocation22_spill] sm:$0xff] %v5581_v54  ;;  %v2030_v36 = vsel %vm1473_vm1, %v5581_v54, 0.0 }
 0x223   : > { %2040 = vadd.xlane.f32.xlu1 %v2039_v24 }
 0x224   : > { %v1876_v1 = vpop.xlane.xlu0 %1875  ;;  %v1885_v41 = vpop.xlane.xlu1 %1884 }
 0x225   : > { %2031 = vadd.xlane.f32.xlu0 %v2030_v36 }
 0x228   : > { %v1864_v37 = vpop.xlane.xlu0 %1863 }
 0x229   : > { %4635 = vrcp.f32 %v1864_v37 }
 0x22a   : > { %v1879_v50 = vpop.xlane.xlu1 %1878  ;;  %4637 = vrcp.f32 %v1855_v25 }
 0x22b   : > { %4639 = vrcp.f32 %v1861_v34 }
 0x22c   : > { %v1858_v8 = vpop.xlane.xlu0 %1857 }
 0x22d   : > { %4641 = vrcp.f32 %v1858_v8 }
 0x22e   : > { %v1873_v17 = vpop.xlane.xlu1 %1872  ;;  %4643 = vrcp.f32 %v1879_v50 }
 0x22f   : > { %4645 = vrcp.f32 %v1873_v17 }
 0x230   : > { %v1894_v62 = vpop.xlane.xlu0 %1893 }
 0x232   : > { %v1867_v46 = vpop.xlane.xlu1 %1866 }
 0x233   : > { %4647 = vrcp.f32 %v1867_v46 }
 0x234   : > { %v1888_v43 = vpop.xlane.xlu0 %1887  ;;  %4649 = vrcp.f32 %v1876_v1 }
 0x236   : > { %v4636_v24 = vpop.eup %4635  ;;  %v1891_v36 = vpop.xlane.xlu1 %1890 }
 0x237   : > { %v4638_v6 = vpop.eup %4637  ;;  %v2108_v34 = vmul.f32 %v4636_v24, %v5278_v53  ;;  %v4480_v53 = vld [vmem:[%s5323_s24 + $0x24] sm:$0xff]   ;;  %v4484_v24 = vld [vmem:[%s5323_s24 + $0x6c] ss:$0 sps:$4 sm:$0x11]  }
 0x238   : > { %v1870_v54 = vpop.xlane.xlu0 %1869  ;;  %v4640_v42 = vpop.eup %4639  ;;  %v2105_v25 = vmul.f32 %v4638_v6, %v5258_v20 }
 0x239   : > { %4651 = vrcp.f32 %v1870_v54  ;;  %v2107_v0 = vmul.f32 %v4640_v42, %v5253_v48 }
 0x23a   : > { %v4642_v37 = vpop.eup %4641  ;;  %4653 = vrcp.f32 %v1885_v41 }
 0x23b   : > { %v2106_v8 = vmul.f32 %v4642_v37, %v5280_v5  ;;  %v2169_v46 = vpack.c.bf16 %v2108_v34, %v2107_v0  ;;  %4655 = vrcp.f32 %v1891_v36  ;;  %v4644_v48 = vpop.eup %4643 }
 0x23c   : > { %v1903_v17 = vpop.xlane.xlu1 %1902  ;;  %4657 = vrcp.f32 %v1882_v2  ;;  %v4646_v5 = vpop.eup %4645  ;;  %v2113_v37 = vmul.f32 %v4644_v48, %v5284_v51 }
 0x23d   : > { %v2168_v50 = vpack.c.bf16 %v2106_v8, %v2105_v25  ;;  %4659 = vrcp.f32 %v1888_v43  ;;  %v2111_v2 = vmul.f32 %v4646_v5, %v5293_v9  ;;  %v4482_v43 = vld [vmem:[%s5323_s24 + $0x1c] sm:$0xff]  }
 0x23e   : > { %4661 = vrcp.f32 %v1894_v62  ;;  %v2604_v62 = vand.u32 %v4484_v24, %v5328_v44 }
 0x23f   : > { %4211 = vmatprep.mubr.msk.bf16.mxu1 %vm1473_vm1, %v2168_v50  ;;  %v2171_v9 = vpack.c.bf16 %v2111_v2, %v2111_v2 }
 0x240   : > { %4212 = vmatmul.mubr.msk.bf16.vlgmr.msra.gmra.mxu1 %vm1473_vm1, %v2169_v46  ;;  %v1924_v54 = vpop.xlane.xlu1 %1923  ;;  %v4648_v42 = vpop.eup %4647 }
 0x241   : > { %v1906_v20 = vpop.xlane.xlu0 %1905  ;;  %4220 = vmatpush3.bf16.msra.mxu1 %v5380_v12  ;;  %v4650_v6 = vpop.eup %4649  ;;  %v2109_v36 = vmul.f32 %v4648_v42, %v5303_v31 }
 0x242   : > { %4221 = vmatprep.subr.bf16.mxu1 %v4478_v3  ;;  %4663 = vrcp.f32 %v1906_v20 }
 0x244   : > { %v1897_v0 = vpop.xlane.xlu1 %1896 }
 0x245   : > { %v1927_v1 = vpop.xlane.xlu0 %1926  ;;  %4222 = vmatpush3.bf16.msra.mxu1 %v4478_v3  ;;  %4665 = vrcp.f32 %v1897_v0  ;;  %v2112_v3 = vmul.f32 %v4650_v6, %v5271_v29 }
 0x246   : > { %v4652_v41 = vpop.eup %4651  ;;  %4223 = vmatprep.subr.bf16.mxu1 %v4480_v53  ;;  %4667 = vrcp.f32 %v1903_v17 }
 0x247   : > { %v2110_v12 = vmul.f32 %v4652_v41, %v5309_v39  ;;  %v4654_v50 = vpop.eup %4653  ;;  %v2172_v31 = vpack.c.bf16 %v2113_v37, %v2112_v3 }
 0x248   : > { %v1918_v34 = vpop.xlane.xlu1 %1917  ;;  %v4656_v39 = vpop.eup %4655  ;;  %v2115_v20 = vmul.f32 %v4654_v50, %v5268_v45  ;;  %v4488_v50 = vld [vmem:[%s5323_s24 + $0x54] sm:$0xff]  }
 0x249   : > { %v1900_v25 = vpop.xlane.xlu0 %1899  ;;  %v2170_v8 = vpack.c.bf16 %v2110_v12, %v2109_v36  ;;  %4224 = vmatpush3.bf16.msra.mxu1 %v4480_v53  ;;  %v4658_v51 = vpop.eup %4657  ;;  %v2117_v48 = vmul.f32 %v4656_v39, %v5313_v49 }
 0x24a   : > { %4669 = vrcp.f32 %v1900_v25  ;;  %4225 = vmatprep.subr.bf16.mxu1 %v4482_v43  ;;  %v4660_v29 = vpop.eup %4659  ;;  %v2114_v53 = vmul.f32 %v4658_v51, %v5261_v47  ;;  %v4490_v51 = vld [vmem:[%s5323_s24 + $0x80] sm:$0xff]  }
 0x24b   : > { %4215 = vmatprep.mubr.msk.bf16.mxu1 %vm1473_vm1, %v2170_v8  ;;  %4671 = vrcp.f32 %v1918_v34  ;;  %v2116_v0 = vmul.f32 %v4660_v29, %v5299_v15  ;;  %v4662_v41 = vpop.eup %4661 }
 0x24c   : > { %4216 = vmatmul.mubr.msk.bf16.gmra.mxu1 %vm1473_vm1, %v2171_v9  ;;  %4673 = vrcp.f32 %v1927_v1  ;;  %v2173_v6 = vpack.c.bf16 %v2115_v20, %v2114_v53  ;;  %v4486_v1 = vld [vmem:[%s5323_s24 + $0x64] sm:$0xff]   ;;  %v2118_v15 = vmul.f32 %v4662_v41, %v5289_v4  ;;  %v4497_v41 = vld [vmem:[%s5323_s24 + $0xc0] ss:$0 sps:$4 sm:$0x11]  }
 0x24d   : > { %v1921_v17 = vpop.xlane.xlu0 %1920  ;;  %4227 = vmatprep.mubr.msk.bf16.mxu1 %vm1473_vm1, %v2172_v31  ;;  %4226 = vmatpush3.bf16.msra.mxu1 %v4482_v43  ;;  %v2174_v2 = vpack.c.bf16 %v2117_v48, %v2116_v0  ;;  %v4491_v31 = vld [vmem:[%s5323_s24 + $0xa4] ss:$0 sps:$4 sm:$0x11]   ;;  %v4492_v48 = vld [vmem:[%s5323_s24 + $0x78] sm:$0xff]  }
 0x24e   : > { %v1915_v46 = vpop.xlane.xlu1 %1914  ;;  %4675 = vrcp.f32 %v1921_v17  ;;  %4251 = vmatprep.subr.bf16.mxu1 %v2604_v62  ;;  %v2804_v20 = vand.u32 %v4491_v31, %v5328_v44  ;;  %v4493_v0 = vld [vmem:[%s5323_s24 + $0x9c] sm:$0xff]  }
 0x24f   : > { %4677 = vrcp.f32 %v1924_v54  ;;  %v4664_v43 = vpop.eup %4663  ;;  %v4487_v54 = vld [vmem:[%s5323_s24 + $0x5c] sm:$0xff]  }
 0x250   : > { %4679 = vrcp.f32 %v1915_v46  ;;  %v2122_v12 = vmul.f32 %v4664_v43, %v5342_v11 }
 0x251   : > { %v1936_v5 = vpop.xlane.xlu0 %1935 }
 0x252   : > { %v1909_v42 = vpop.xlane.xlu1 %1908  ;;  %v4666_v45 = vpop.eup %4665 }
 0x253   : > { %4681 = vrcp.f32 %v1909_v42  ;;  %v4668_v47 = vpop.eup %4667  ;;  %v2119_v37 = vmul.f32 %v4666_v45, %v5351_v33 }
 0x254   : > { %4228 = vmatmul.mubr.msk.bf16.vlgmr.msra.gmra.mxu1 %vm1473_vm1, %v2173_v6  ;;  %v2121_v8 = vmul.f32 %v4668_v47, %v5333_v23 }
 0x255   : > { %v1912_v24 = vpop.xlane.xlu0 %1911  ;;  %4231 = vmatprep.mubr.msk.bf16.mxu1 %vm1473_vm1, %v2174_v2  ;;  %4252 = vmatpush3.bf16.msra.mxu1 %v2604_v62  ;;  %v2175_v62 = vpack.c.bf16 %v2118_v15, %v2118_v15  ;;  %v4495_v15 = vld [vmem:[%s5323_s24 + $0x94] sm:$0xff]  }
 0x256   : > { %v1930_v49 = vpop.xlane.xlu1 %1929  ;;  %4683 = vrcp.f32 %v1912_v24  ;;  %4253 = vmatprep.subr.bf16.mxu1 %v4486_v1  ;;  %v2177_v39 = vpack.c.bf16 %v2122_v12, %v2121_v8  ;;  %v5644_v12 = vand.u32 %v4497_v41, %v5328_v44  ;;  %v4496_v8 = vld [vmem:[%s5323_s24 + $0x8c] sm:$0xff]  }
 0x257   : > { %v4670_v36 = vpop.eup %4669  ;;  %4685 = vrcp.f32 %v1936_v5 }
 0x258   : > { %4687 = vrcp.f32 %v1930_v49  ;;  %v2120_v34 = vmul.f32 %v4670_v36, %v5363_v13  ;;  %v4672_v25 = vpop.eup %4671 }
 0x259   : > { %v1933_v3 = vpop.xlane.xlu0 %1932  ;;  %4254 = vmatpush3.bf16.msra.mxu1 %v4486_v1  ;;  %v4674_v9 = vpop.eup %4673  ;;  %v2126_v23 = vmul.f32 %v4672_v25, %v5361_v35  ;;  %v4494_v1 = vld [vmem:[%s5323_s24 + $0x70] sm:$0xff]  }
 0x25a   : > { %4689 = vrcp.f32 %v1933_v3  ;;  %v2176_v4 = vpack.c.bf16 %v2120_v34, %v2119_v37  ;;  %4255 = vmatprep.subr.bf16.mxu1 %v4487_v54  ;;  %v2129_v46 = vmul.f32 %v4674_v9, %v5354_v16  ;;  %v4499_v3 = vld [vmem:[%s5323_s24 + $0xdc] ss:$0 sps:$4 sm:$0x11]  }
 0x25b   : > { %v4676_v11 = vpop.eup %4675  ;;  %v3004_v9 = vand.u32 %v4499_v3, %v5328_v44 }
 0x25c   : > { %4243 = vmatprep.mubr.msk.bf16.mxu0 %vm1473_vm1, %v2176_v4  ;;  %4232 = vmatmul.mubr.msk.bf16.gmra.mxu1 %vm1473_vm1, %v2175_v62  ;;  %v1945_v33 = vpop.xlane.xlu1 %1944  ;;  %v2127_v13 = vmul.f32 %v4676_v11, %v5370_v28  ;;  %v4678_v17 = vpop.eup %4677 }
 0x25d   : > { %4244 = vmatmul.mubr.msk.bf16.vlgmr.msra.gmra.mxu0 %vm1473_vm1, %v2177_v39  ;;  %4256 = vmatpush3.bf16.msra.mxu1 %v4487_v54  ;;  %v4680_v35 = vpop.eup %4679  ;;  %v2128_v28 = vmul.f32 %v4678_v17, %v5340_v18 }
 0x25e   : > { %v2180_v29 = vpack.c.bf16 %v2127_v13, %v2126_v23  ;;  %4257 = vmatprep.subr.bf16.mxu1 %v4488_v50  ;;  %4268 = vmatpush3.bf16.msra.mxu0 %v5484_v40  ;;  %v2125_v6 = vmul.f32 %v4680_v35, %v5373_v52 }
 0x25f   : > { %4269 = vmatprep.subr.bf16.mxu0 %v4490_v51  ;;  %v2181_v16 = vpack.c.bf16 %v2129_v46, %v2128_v28 }
 0x260   : > { %4259 = vmatprep.mubr.msk.bf16.mxu1 %vm1473_vm1, %v2180_v29  ;;  %v1966_v53 = vpop.xlane.xlu1 %1965  ;;  %v4682_v5 = vpop.eup %4681  ;;  %v2179_v52 = vpack.c.bf16 %v2125_v6, %v2125_v6  ;;  %v4501_v6 = vld [vmem:[%s5323_s24 + $0xd4] sm:$0xff]  }
 0x261   : > { %v1948_v42 = vpop.xlane.xlu0 %1947  ;;  %4258 = vmatpush3.bf16.msra.mxu1 %v4488_v50  ;;  %v2123_v43 = vmul.f32 %v4682_v5, %v5387_v57 }
 0x262   : > { %4283 = vmatprep.subr.bf16.mxu1 %v2804_v20  ;;  %4270 = vmatpush3.bf16.msra.mxu0 %v4490_v51  ;;  %4691 = vrcp.f32 %v1948_v42  ;;  %v4498_v42 = vld [vmem:[%s5323_s24 + $0xb8] sm:$0xff]  }
 0x263   : > { %v4684_v40 = vpop.eup %4683  ;;  %4271 = vmatprep.subr.bf16.mxu0 %v4492_v48 }
 0x264   : > { %v4686_v2 = vpop.eup %4685  ;;  %4260 = vmatmul.mubr.msk.bf16.vlgmr.msra.gmra.mxu1 %vm1473_vm1, %v2181_v16  ;;  %v1939_v18 = vpop.xlane.xlu1 %1938  ;;  %v2124_v45 = vmul.f32 %v4684_v40, %v5398_v19 }
 0x265   : > { %v4688_v24 = vpop.eup %4687  ;;  %v1969_v49 = vpop.xlane.xlu0 %1968  ;;  %4284 = vmatpush3.bf16.msra.mxu1 %v2804_v20  ;;  %v2132_v36 = vmul.f32 %v4686_v2, %v5384_v58  ;;  %4693 = vrcp.f32 %v1939_v18  ;;  %v4502_v18 = vld [vmem:[%s5323_s24 + $0xa8] sm:$0xff]  }
 0x266   : > { %v2178_v47 = vpack.c.bf16 %v2124_v45, %v2123_v43  ;;  %4285 = vmatprep.subr.bf16.mxu1 %v4493_v0  ;;  %4272 = vmatpush3.bf16.msra.mxu0 %v4492_v48  ;;  %v2130_v19 = vmul.f32 %v4688_v24, %v5395_v38  ;;  %4695 = vrcp.f32 %v1945_v33  ;;  %v4503_v43 = vld [vmem:[%s5323_s24 + $0xcc] sm:$0xff]  }
 0x267   : > { %v4690_v54 = vpop.eup %4689  ;;  %4273 = vmatprep.subr.bf16.mxu0 %v4494_v1  ;;  %v2183_v25 = vpack.c.bf16 %v2132_v36, %v2132_v36 }
 0x268   : > { %4247 = vmatprep.mubr.msk.bf16.mxu0 %vm1473_vm1, %v2178_v47  ;;  %v1960_v57 = vpop.xlane.xlu1 %1959  ;;  %v2131_v37 = vmul.f32 %v4690_v54, %v5407_v27 }
 0x269   : > { %v1942_v34 = vpop.xlane.xlu0 %1941  ;;  %4248 = vmatmul.mubr.msk.bf16.gmra.mxu0 %vm1473_vm1, %v2179_v52  ;;  %4286 = vmatpush3.bf16.msra.mxu1 %v4493_v0  ;;  %v4505_v52 = vld [vmem:[%s5323_s24 + $0xf8] ss:$0 sps:$4 sm:$0x11]  }
 0x26a   : > { %4697 = vrcp.f32 %v1942_v34  ;;  %v2182_v58 = vpack.c.bf16 %v2131_v37, %v2130_v19  ;;  %4287 = vmatprep.subr.bf16.mxu1 %v4495_v15  ;;  %4274 = vmatpush3.bf16.msra.mxu0 %v4494_v1  ;;  %v4504_v19 = vld [vmem:[%s5323_s24 + $0xc4] sm:$0xff]  }
 0x26b   : > { %4699 = vrcp.f32 %v1969_v49  ;;  %4299 = vmatprep.subr.bf16.mxu0 %v5644_v12 }
 0x26c   : > { %4701 = vrcp.f32 %v1960_v57  ;;  %4263 = vmatprep.mubr.msk.bf16.mxu1 %vm1473_vm1, %v2182_v58  ;;  %v3104_v58 = vand.u32 %v4505_v52, %v5328_v44  ;;  %v4508_v52 = vld [vmem:[%s5323_s24 + $0xe0] sm:$0xff]  }
 0x26d   : > { %4703 = vrcp.f32 %v1966_v53  ;;  %v1963_v38 = vpop.xlane.xlu0 %1962  ;;  %4264 = vmatmul.mubr.msk.bf16.gmra.mxu1 %vm1473_vm1, %v2183_v25 }
 0x26e   : > { %v1957_v27 = vpop.xlane.xlu1 %1956  ;;  %4705 = vrcp.f32 %v1963_v38  ;;  %4288 = vmatpush3.bf16.msra.mxu1 %v4495_v15 }
 0x26f   : > { %4289 = vmatprep.subr.bf16.mxu1 %v4496_v8  ;;  %4707 = vrcp.f32 %v1957_v27  ;;  %v4692_v50 = vpop.eup %4691 }
 0x270   : > { %v2136_v23 = vmul.f32 %v4692_v50, %v5423_v56  ;;  %v5962_v50 = vld [vmem:[#allocation3_spill] sm:$0xff] }
 0x271   : > { %v1978_v4 = vpop.xlane.xlu0 %1977 }
 0x272   : > { %v1951_v62 = vpop.xlane.xlu1 %1950  ;;  %4290 = vmatpush3.bf16.msra.mxu1 %v4496_v8  ;;  %v4694_v31 = vpop.eup %4693 }
 0x273   : > { %4315 = vmatprep.subr.bf16.mxu1 %v3004_v9  ;;  %4709 = vrcp.f32 %v1951_v62  ;;  %v4696_v51 = vpop.eup %4695  ;;  %v2133_v17 = vmul.f32 %v4694_v31, %v5432_v60 }
 0x274   : > { %v2135_v20 = vmul.f32 %v4696_v51, %v5414_v14 }
 0x275   : > { %v1954_v11 = vpop.xlane.xlu0 %1953 }
 0x276   : > { %v1972_v39 = vpop.xlane.xlu1 %1971  ;;  %4711 = vrcp.f32 %v1954_v11  ;;  %v2185_v5 = vpack.c.bf16 %v2136_v23, %v2135_v20 }
 0x277   : > { %v4698_v33 = vpop.eup %4697  ;;  %4713 = vrcp.f32 %v1978_v4 }
 0x278   : > { %v4700_v13 = vpop.eup %4699  ;;  %4715 = vrcp.f32 %v1972_v39  ;;  %v2134_v46 = vmul.f32 %v4698_v33, %v5443_v63  ;;  %v5963_v39 = vld [vmem:[#allocation4_spill] sm:$0xff]  ;;  %v5964_v33 = vld [vmem:[#allocation15_spill] sm:$0xff] }
 0x279   : > { %v4702_v29 = vpop.eup %4701  ;;  %v1975_v48 = vpop.xlane.xlu0 %1974  ;;  %v2143_v56 = vmul.f32 %v4700_v13, %v5434_v61  ;;  %v4500_v61 = vld [vmem:[%s5323_s24 + $0xb0] sm:$0xff]  }
 0x27a   : > { %v4704_v35 = vpop.eup %4703  ;;  %4717 = vrcp.f32 %v1975_v48  ;;  %v2184_v28 = vpack.c.bf16 %v2134_v46, %v2133_v17  ;;  %v2140_v60 = vmul.f32 %v4702_v29, %v5441_v26  ;;  %v5965_v17 = vld [vmem:[#allocation14_spill] sm:$0xff] }
 0x27b   : > { %v4706_v53 = vpop.eup %4705  ;;  %v2142_v14 = vmul.f32 %v4704_v35, %v5421_v55 }
 0x27c   : > { %4275 = vmatprep.mubr.msk.bf16.mxu0 %vm1473_vm1, %v2184_v28  ;;  %v1987_v16 = vpop.xlane.xlu1 %1986  ;;  %v2141_v63 = vmul.f32 %v4706_v53, %v5450_v30  ;;  %v4708_v1 = vpop.eup %4707  ;;  %v5966_v53 = vld [vmem:[#allocation5_spill] sm:$0xff] }
 0x27d   : > { %4276 = vmatmul.mubr.msk.bf16.vlgmr.msra.gmra.mxu0 %vm1473_vm1, %v2185_v5  ;;  %v2189_v40 = vpack.c.bf16 %v2143_v56, %v2142_v14  ;;  %v2139_v30 = vmul.f32 %v4708_v1, %v5452_v10  ;;  %v5969_v14 = vld [vmem:[#allocation2_spill] sm:$0xff] }
 0x27e   : > { %v2188_v0 = vpack.c.bf16 %v2141_v63, %v2140_v60  ;;  %4300 = vmatpush3.bf16.msra.mxu0 %v5644_v12  ;;  %v5968_v60 = vld [vmem:[#allocation7_spill] sm:$0xff] }
 0x27f   : > { %4301 = vmatprep.subr.bf16.mxu0 %v4498_v42  ;;  %v2187_v10 = vpack.c.bf16 %v2139_v30, %v2139_v30  ;;  %v5970_v30 = vld [vmem:[#allocation16_spill] sm:$0xff] }
 0x280   : > { %4291 = vmatprep.mubr.msk.bf16.mxu1 %vm1473_vm1, %v2188_v0  ;;  %v2008_v41 = vpop.xlane.xlu1 %2007  ;;  %v4710_v26 = vpop.eup %4709 }
 0x281   : > { %v1990_v2 = vpop.xlane.xlu0 %1989  ;;  %4292 = vmatmul.mubr.msk.bf16.vlgmr.msra.gmra.mxu1 %vm1473_vm1, %v2189_v40  ;;  %v2137_v49 = vmul.f32 %v4710_v26, %v5462_v59  ;;  %v4506_v40 = vld [vmem:[%s5323_s24 + $0xf0] sm:$0xff]  }
 0x282   : > { %4302 = vmatpush3.bf16.msra.mxu0 %v4498_v42  ;;  %4316 = vmatpush3.bf16.msra.mxu1 %v3004_v9  ;;  %4719 = vrcp.f32 %v1990_v2  ;;  %v5967_v42 = vld [vmem:[#allocation6_spill] sm:$0xff]  ;;  %v4507_v2 = vld [vmem:[%s5323_s24 + $0xe8] sm:$0xff]  }
 0x283   : > { %v4712_v55 = vpop.eup %4711  ;;  %4303 = vmatprep.subr.bf16.mxu0 %v4500_v61  ;;  %4317 = vmatprep.subr.bf16.mxu1 %v4501_v6 }
 0x284   : > { %v4714_v45 = vpop.eup %4713  ;;  %v1981_v24 = vpop.xlane.xlu1 %1980  ;;  %v2138_v47 = vmul.f32 %v4712_v55, %v5472_v22 }
 0x285   : > { %v4716_v15 = vpop.eup %4715  ;;  %v2011_v54 = vpop.xlane.xlu0 %2010  ;;  %v2146_v57 = vmul.f32 %v4714_v45, %v5460_v32  ;;  %4721 = vrcp.f32 %v1981_v24  ;;  %v5971_v24 = vld [vmem:[#allocation17_spill] sm:$0xff] }
 0x286   : > { %v2186_v36 = vpack.c.bf16 %v2138_v47, %v2137_v49  ;;  %4304 = vmatpush3.bf16.msra.mxu0 %v4500_v61  ;;  %4318 = vmatpush3.bf16.msra.mxu1 %v4501_v6  ;;  %v2144_v22 = vmul.f32 %v4716_v15, %v5470_v21  ;;  %4723 = vrcp.f32 %v1987_v16  ;;  %v5972_v47 = vld [vmem:[#allocation11_spill] sm:$0xff] }
 0x287   : > { %v4718_v12 = vpop.eup %4717  ;;  %4305 = vmatprep.subr.bf16.mxu0 %v4502_v18  ;;  %4319 = vmatprep.subr.bf16.mxu1 %v4503_v43  ;;  %v2191_v32 = vpack.c.bf16 %v2146_v57, %v2146_v57  ;;  %v5973_v57 = vld [vmem:[#allocation8_spill] sm:$0xff] }
 0x288   : > { %4279 = vmatprep.mubr.msk.bf16.mxu0 %vm1473_vm1, %v2186_v36  ;;  %v2002_v59 = vpop.xlane.xlu1 %2001  ;;  %v2145_v37 = vmul.f32 %v4718_v12, %v5481_v7 }
 0x289   : > { %v1984_v34 = vpop.xlane.xlu0 %1983  ;;  %4280 = vmatmul.mubr.msk.bf16.gmra.mxu0 %vm1473_vm1, %v2187_v10 }
 0x28a   : > { %4725 = vrcp.f32 %v1984_v34  ;;  %v2190_v25 = vpack.c.bf16 %v2145_v37, %v2144_v22  ;;  %4306 = vmatpush3.bf16.msra.mxu0 %v4502_v18  ;;  %4320 = vmatpush3.bf16.msra.mxu1 %v4503_v43  ;;  %v5974_v22 = vld [vmem:[#allocation10_spill] sm:$0xff]  ;;  %v5975_v34 = vld [vmem:[#allocation9_spill] sm:$0xff] }
 0x28b   : > { %4727 = vrcp.f32 %v2011_v54  ;;  %4321 = vmatprep.subr.bf16.mxu1 %v4504_v19  ;;  %4331 = vmatprep.subr.bf16.mxu0 %v3104_v58 }
 0x28c   : > { %4729 = vrcp.f32 %v2002_v59  ;;  %4295 = vmatprep.mubr.msk.bf16.mxu1 %vm1473_vm1, %v2190_v25 }
 0x28d   : > { %4731 = vrcp.f32 %v2008_v41  ;;  %v2005_v21 = vpop.xlane.xlu0 %2004  ;;  %4296 = vmatmul.mubr.msk.bf16.gmra.mxu1 %vm1473_vm1, %v2191_v32 }
 0x28e   : > { %v1999_v7 = vpop.xlane.xlu1 %1998  ;;  %4733 = vrcp.f32 %v2005_v21  ;;  %4322 = vmatpush3.bf16.msra.mxu1 %v4504_v19 }
 0x28f   : > { %4347 = vmatprep.subr.bf16.mxu1 %v3104_v58  ;;  %4735 = vrcp.f32 %v1999_v7  ;;  %v4720_v3 = vpop.eup %4719 }
 0x290   : > { %v2150_v31 = vmul.f32 %v4720_v3, %v5962_v50 }
 0x291   : > { %v2020_v44 = vpop.xlane.xlu0 %2019 }
 0x292   : > { %v1993_v8 = vpop.xlane.xlu1 %1992  ;;  %v4722_v38 = vpop.eup %4721 }
 0x293   : > { %4737 = vrcp.f32 %v1993_v8  ;;  %v4724_v4 = vpop.eup %4723  ;;  %v2147_v51 = vmul.f32 %v4722_v38, %v5963_v39  ;;  %v5976_v38 = vld [vmem:[#allocation13_spill] sm:$0xff]  ;;  %v5978_v39 = vld [vmem:[#allocation19_spill] sm:$0xff] }
 0x294   : > { %v2149_v46 = vmul.f32 %v4724_v4, %v5965_v17  ;;  %v5980_v17 = vld [vmem:[#allocation20_spill] sm:$0xff] }
 0x295   : > { %v1996_v27 = vpop.xlane.xlu0 %1995 }
 0x296   : > { %v2014_v9 = vpop.xlane.xlu1 %2013  ;;  %4739 = vrcp.f32 %v1996_v27  ;;  %v2193_v28 = vpack.c.bf16 %v2150_v31, %v2149_v46 }
 0x297   : > { %v4726_v62 = vpop.eup %4725  ;;  %4741 = vrcp.f32 %v2020_v44 }
 0x298   : > { %v4728_v11 = vpop.eup %4727  ;;  %4743 = vrcp.f32 %v2014_v9  ;;  %v2148_v23 = vmul.f32 %v4726_v62, %v5964_v33  ;;  %v5977_v9 = vld [vmem:[#allocation18_spill] sm:$0xff]  ;;  %v5979_v33 = vld [vmem:[#allocation21_spill] sm:$0xff] }
 0x299   : > { %v4730_v13 = vpop.eup %4729  ;;  %v2017_v29 = vpop.xlane.xlu0 %2016  ;;  %v2157_v5 = vmul.f32 %v4728_v11, %v5966_v53  ;;  %v5982_v53 = vld [vmem:[#allocation22_spill] sm:$0xff] }
 0x29a   : > { %v4732_v20 = vpop.eup %4731  ;;  %4745 = vrcp.f32 %v2017_v29  ;;  %v2192_v48 = vpack.c.bf16 %v2148_v23, %v2147_v51  ;;  %v2154_v16 = vmul.f32 %v4730_v13, %v5967_v42 }
 0x29b   : > { %v4734_v35 = vpop.eup %4733  ;;  %v2156_v0 = vmul.f32 %v4732_v20, %v5969_v14 }
 0x29c   : > { %4307 = vmatprep.mubr.msk.bf16.mxu0 %vm1473_vm1, %v2192_v48  ;;  %v2029_v56 = vpop.xlane.xlu1 %2028  ;;  %v2155_v63 = vmul.f32 %v4734_v35, %v5968_v60  ;;  %v4736_v1 = vpop.eup %4735  ;;  %v5981_v48 = vld [vmem:[#allocation12_spill] sm:$0xff] }
 0x29d   : > { %4308 = vmatmul.mubr.msk.bf16.vlgmr.msra.gmra.mxu0 %vm1473_vm1, %v2193_v28  ;;  %v2197_v6 = vpack.c.bf16 %v2157_v5, %v2156_v0  ;;  %v2153_v18 = vmul.f32 %v4736_v1, %v5970_v30 }
 0x29e   : > { %v2196_v61 = vpack.c.bf16 %v2155_v63, %v2154_v16  ;;  %4332 = vmatpush3.bf16.msra.mxu0 %v3104_v58 }
 0x29f   : > { %4333 = vmatprep.subr.bf16.mxu0 %v4506_v40  ;;  %v2195_v10 = vpack.c.bf16 %v2153_v18, %v2153_v18 }
 0x2a0   : > { %4323 = vmatprep.mubr.msk.bf16.mxu1 %vm1473_vm1, %v2196_v61  ;;  %v2023_v41 = vpop.xlane.xlu1 %2022  ;;  %v4738_v26 = vpop.eup %4737 }
 0x2a1   : > { %4324 = vmatmul.mubr.msk.bf16.vlgmr.msra.gmra.mxu1 %vm1473_vm1, %v2197_v6  ;;  %4747 = vrcp.f32 %v2023_v41  ;;  %v2151_v49 = vmul.f32 %v4738_v26, %v5971_v24  ;;  %v3441_v41 = vld [vmem:[%s5727_s27 + $0x18] sm:$0x1] }
 0x2a2   : > { %4351 = vmatpush3.bf16.msra.mxu1 %v3104_v58  ;;  %4334 = vmatpush3.bf16.msra.mxu0 %v4506_v40 }
 0x2a3   : > { %v4740_v55 = vpop.eup %4739  ;;  %4348 = vmatprep.subr.bf16.mxu1 %v4506_v40  ;;  %4335 = vmatprep.subr.bf16.mxu0 %v4507_v2 }
 0x2a4   : > { %v4742_v43 = vpop.eup %4741  ;;  %v2152_v15 = vmul.f32 %v4740_v55, %v5972_v47 }
 0x2a5   : > { %v2026_v45 = vpop.xlane.xlu0 %2025  ;;  %v4744_v54 = vpop.eup %4743  ;;  %v2160_v19 = vmul.f32 %v4742_v43, %v5973_v57  ;;  %v3450_v57 = vld [vmem:[%s5727_s27 + $0x34] sm:$0x1] }
 0x2a6   : > { %4749 = vrcp.f32 %v2026_v45  ;;  %v2194_v36 = vpack.c.bf16 %v2152_v15, %v2151_v49  ;;  %4352 = vmatpush3.bf16.msra.mxu1 %v4506_v40  ;;  %4336 = vmatpush3.bf16.msra.mxu0 %v4507_v2  ;;  %v2158_v37 = vmul.f32 %v4744_v54, %v5974_v22 }
 0x2a7   : > { %v4746_v12 = vpop.eup %4745  ;;  %4349 = vmatprep.subr.bf16.mxu1 %v4507_v2  ;;  %4337 = vmatprep.subr.bf16.mxu0 %v4508_v52  ;;  %v2199_v21 = vpack.c.bf16 %v2160_v19, %v2160_v19 }
 0x2a8   : > { %4311 = vmatprep.mubr.msk.bf16.mxu0 %vm1473_vm1, %v2194_v36  ;;  %v2035_v59 = vpop.xlane.xlu1 %2034  ;;  %v2159_v58 = vmul.f32 %v4746_v12, %v5975_v34 }
 0x2a9   : > { %4312 = vmatmul.mubr.msk.bf16.gmra.mxu0 %vm1473_vm1, %v2195_v10  ;;  %4751 = vrcp.f32 %v2035_v59 }
 0x2aa   : > { %v2038_v25 = vpop.xlane.xlu0 %2037  ;;  %v2198_v32 = vpack.c.bf16 %v2159_v58, %v2158_v37  ;;  %4353 = vmatpush3.bf16.msra.mxu1 %v4507_v2  ;;  %4338 = vmatpush3.bf16.msra.mxu0 %v4508_v52 }
 0x2ab   : > { %4753 = vrcp.f32 %v2038_v25  ;;  %4350 = vmatprep.subr.bf16.mxu1 %v4508_v52 }
 0x2ac   : > { %4755 = vrcp.f32 %v2029_v56  ;;  %4327 = vmatprep.mubr.msk.bf16.mxu1 %vm1473_vm1, %v2198_v32  ;;  %v2041_v7 = vpop.xlane.xlu1 %2040 }
 0x2ad   : > { %4328 = vmatmul.mubr.msk.bf16.gmra.mxu1 %vm1473_vm1, %v2199_v21  ;;  %4757 = vrcp.f32 %v2041_v7 }
 0x2ae   : > { %v2032_v44 = vpop.xlane.xlu0 %2031  ;;  %4354 = vmatpush3.bf16.msra.mxu1 %v4508_v52  ;;  %v4748_v8 = vpop.eup %4747 }
 0x2af   : > { %4759 = vrcp.f32 %v2032_v44  ;;  %v2161_v27 = vmul.f32 %v4748_v8, %v5976_v38 }
 0x2b3   : > { %v4750_v3 = vpop.eup %4749 }
 0x2b4   : > { %v2162_v4 = vmul.f32 %v4750_v3, %v5977_v9 }
 0x2b6   : > { %v2200_v62 = vpack.c.bf16 %v2162_v4, %v2161_v27  ;;  %v4752_v50 = vpop.eup %4751 }
 0x2b7   : > { %v2165_v51 = vmul.f32 %v4752_v50, %v5978_v39  ;;  %v3459_v39 = vld [vmem:[%s5727_s27 + $0x50] sm:$0x1] }
 0x2b8   : > { %4339 = vmatprep.mubr.msk.bf16.mxu0 %vm1473_vm1, %v2200_v62  ;;  %v4754_v31 = vpop.eup %4753 }
 0x2b9   : > { %v4756_v11 = vpop.eup %4755  ;;  %v2166_v23 = vmul.f32 %v4754_v31, %v5979_v33 }
 0x2ba   : > { %v4758_v13 = vpop.eup %4757  ;;  %v2163_v35 = vmul.f32 %v4756_v11, %v5981_v48 }
 0x2bb   : > { %v2167_v46 = vmul.f32 %v4758_v13, %v5980_v17  ;;  %v2202_v29 = vpack.c.bf16 %v2166_v23, %v2165_v51 }
 0x2bc   : > { %v4760_v20 = vpop.eup %4759 }
 0x2bd   : > { %v2203_v28 = vpack.c.bf16 %v2167_v46, %v2167_v46  ;;  %v2164_v5 = vmul.f32 %v4760_v20, %v5982_v53  ;;  %4343 = vmatprep.mubr.msk.bf16.mxu1 %vm1473_vm1, %v2202_v29 }
 0x2bf   : > { %v2201_v56 = vpack.c.bf16 %v2164_v5, %v2163_v35  ;;  %4344 = vmatmul.mubr.msk.bf16.vlgmr.msra.gmra.mxu1 %vm1473_vm1, %v2203_v28  ;;  %v3468_v35 = vld [vmem:[%s5727_s27 + $0x6c] sm:$0x1] }
 0x2c1   : > { %4340 = vmatmul.mubr.msk.bf16.vlgmr.msra.gmra.mxu0 %vm1473_vm1, %v2201_v56 }
 0x300   : > { %v4213_v42 = vpop.f32.mrf.mxu1 }
 0x301   : > { %v3854_v16 = vpack.c.bf16 %v4213_v42, %v4213_v42 }
 0x302   : > { %v2340_v60 = vpop.f32.mrf.mxu1 }
 0x303   : > { %3434 = vst.msk [vmem:[%s5727_s27 + $0x8] sm:$0xf] %vm3431_vm4, %v3854_v16  ;;  %v3852_v63 = vpack.c.bf16 %v2340_v60, %v2340_v60 }
 0x304   : > { %v4214_v14 = vpop.f32.mrf.mxu1 }
 0x305   : > { %3432 = vst.msk [vmem:[%s5727_s27] sm:$0xf] %vm3431_vm4, %v3852_v63  ;;  %v3855_v0 = vpack.c.bf16 %v4214_v14, %v4214_v14 }
 0x306   : > { %v2343_v40 = vpop.f32.mrf.mxu1 }
 0x307   : > { %3435 = vst.msk [vmem:[%s5727_s27 + $0xc] sm:$0xf] %vm3431_vm4, %v3855_v0  ;;  %v3853_v61 = vpack.c.bf16 %v2343_v40, %v2343_v40 }
 0x309   : > { %3433 = vst.msk [vmem:[%s5727_s27 + $0x4] sm:$0xf] %vm3431_vm4, %v3853_v61 }
 0x30c   : > { %v4217_v6 = vpop.f32.mrf.mxu1 }
 0x30d   : > { %v3858_v26 = vpack.c.bf16 %v4217_v6, %v4217_v6 }
 0x30e   : > { %v2356_v2 = vpop.f32.mrf.mxu1 }
 0x30f   : > { %v3442_v55 = vsel %vm5737_vm7, %v3858_v26, %v3441_v41  ;;  %v3856_v30 = vpack.c.bf16 %v2356_v2, %v2356_v2 }
 0x310   : > { %3443 = vst [vmem:[%s5727_s27 + $0x18] sm:$0x1] %v3442_v55  ;;  %v4218_v18 = vpop.f32.mrf.mxu1 }
 0x311   : > { %3436 = vst.msk [vmem:[%s5727_s27 + $0x10] sm:$0xf] %vm3431_vm4, %v3856_v30 }
 0x312   : > { %v2359_v43 = vpop.f32.mrf.mxu1 }
 0x313   : > { %v3857_v45 = vpack.c.bf16 %v2359_v43, %v2359_v43 }
 0x314   : > { %v4229_v24 = vpop.f32.mrf.mxu1 }
 0x315   : > { %3437 = vst.msk [vmem:[%s5727_s27 + $0x14] sm:$0xf] %vm3431_vm4, %v3857_v45  ;;  %v3861_v49 = vpack.c.bf16 %v4229_v24, %v4229_v24 }
 0x316   : > { %v2440_v47 = vpop.f32.mrf.mxu1 }
 0x317   : > { %3446 = vst.msk [vmem:[%s5727_s27 + $0x24] sm:$0xf] %vm3431_vm4, %v3861_v49  ;;  %v3859_v15 = vpack.c.bf16 %v2440_v47, %v2440_v47 }
 0x318   : > { %v4230_v54 = vpop.f32.mrf.mxu1 }
 0x319   : > { %3444 = vst.msk [vmem:[%s5727_s27 + $0x1c] sm:$0xf] %vm3431_vm4, %v3859_v15  ;;  %v3862_v52 = vpack.c.bf16 %v4230_v54, %v4230_v54 }
 0x31a   : > { %v2443_v36 = vpop.f32.mrf.mxu1 }
 0x31b   : > { %3447 = vst.msk [vmem:[%s5727_s27 + $0x28] sm:$0xf] %vm3431_vm4, %v3862_v52  ;;  %v3860_v12 = vpack.c.bf16 %v2443_v36, %v2443_v36  ;;  %v3477_v52 = vld [vmem:[%s5727_s27 + $0x88] sm:$0x1] }
 0x31c   : > { %v4233_v10 = vpop.f32.mrf.mxu1 }
 0x31d   : > { %3445 = vst.msk [vmem:[%s5727_s27 + $0x20] sm:$0xf] %vm3431_vm4, %v3860_v12  ;;  %v3865_v19 = vpack.c.bf16 %v4233_v10, %v4233_v10  ;;  %v4245_v59 = vpop.f32.mrf.mxu0 }
 0x31e   : > { %v3868_v22 = vpack.c.bf16 %v4245_v59, %v4245_v59  ;;  %v2456_v37 = vpop.f32.mrf.mxu1 }
 0x31f   : > { %v3451_v34 = vsel %vm5737_vm7, %v3865_v19, %v3450_v57  ;;  %v3863_v58 = vpack.c.bf16 %v2456_v37, %v2456_v37  ;;  %v2540_v25 = vpop.f32.mrf.mxu0 }
 0x320   : > { %3452 = vst [vmem:[%s5727_s27 + $0x34] sm:$0x1] %v3451_v34  ;;  %3455 = vst.msk [vmem:[%s5727_s27 + $0x40] sm:$0xf] %vm3431_vm4, %v3868_v22  ;;  %v3866_v32 = vpack.c.bf16 %v2540_v25, %v2540_v25  ;;  %v4234_v21 = vpop.f32.mrf.mxu1  ;;  %v3486_v22 = vld [vmem:[%s5727_s27 + $0xa4] sm:$0x1] }
 0x321   : > { %3448 = vst.msk [vmem:[%s5727_s27 + $0x2c] sm:$0xf] %vm3431_vm4, %v3863_v58  ;;  %v4246_v7 = vpop.f32.mrf.mxu0 }
 0x322   : > { %3453 = vst.msk [vmem:[%s5727_s27 + $0x38] sm:$0xf] %vm3431_vm4, %v3866_v32  ;;  %v3869_v44 = vpack.c.bf16 %v4246_v7, %v4246_v7  ;;  %v2459_v8 = vpop.f32.mrf.mxu1 }
 0x323   : > { %v3864_v3 = vpack.c.bf16 %v2459_v8, %v2459_v8  ;;  %v2543_v38 = vpop.f32.mrf.mxu0 }
 0x324   : > { %3456 = vst.msk [vmem:[%s5727_s27 + $0x44] sm:$0xf] %vm3431_vm4, %v3869_v44  ;;  %v3867_v27 = vpack.c.bf16 %v2543_v38, %v2543_v38  ;;  %v4261_v9 = vpop.f32.mrf.mxu1 }
 0x325   : > { %3449 = vst.msk [vmem:[%s5727_s27 + $0x30] sm:$0xf] %vm3431_vm4, %v3864_v3  ;;  %v3875_v4 = vpack.c.bf16 %v4261_v9, %v4261_v9 }
 0x326   : > { %3454 = vst.msk [vmem:[%s5727_s27 + $0x3c] sm:$0xf] %vm3431_vm4, %v3867_v27  ;;  %v2640_v62 = vpop.f32.mrf.mxu1 }
 0x327   : > { %3464 = vst.msk [vmem:[%s5727_s27 + $0x5c] sm:$0xf] %vm3431_vm4, %v3875_v4  ;;  %v3873_v50 = vpack.c.bf16 %v2640_v62, %v2640_v62 }
 0x328   : > { %v4262_v31 = vpop.f32.mrf.mxu1 }
 0x329   : > { %3462 = vst.msk [vmem:[%s5727_s27 + $0x54] sm:$0xf] %vm3431_vm4, %v3873_v50  ;;  %v4249_v11 = vpop.f32.mrf.mxu0  ;;  %v3876_v51 = vpack.c.bf16 %v4262_v31, %v4262_v31 }
 0x32a   : > { %v3872_v33 = vpack.c.bf16 %v4249_v11, %v4249_v11  ;;  %v2643_v23 = vpop.f32.mrf.mxu1 }
 0x32b   : > { %3465 = vst.msk [vmem:[%s5727_s27 + $0x60] sm:$0xf] %vm3431_vm4, %v3876_v51  ;;  %v2556_v13 = vpop.f32.mrf.mxu0  ;;  %v3874_v17 = vpack.c.bf16 %v2643_v23, %v2643_v23 }
 0x32c   : > { %v3460_v46 = vsel %vm5737_vm7, %v3872_v33, %v3459_v39  ;;  %v3870_v29 = vpack.c.bf16 %v2556_v13, %v2556_v13 }
 0x32d   : > { %3461 = vst [vmem:[%s5727_s27 + $0x50] sm:$0x1] %v3460_v46  ;;  %3463 = vst.msk [vmem:[%s5727_s27 + $0x58] sm:$0xf] %vm3431_vm4, %v3874_v17  ;;  %v4250_v20 = vpop.f32.mrf.mxu0  ;;  %v4265_v48 = vpop.f32.mrf.mxu1 }
 0x32e   : > { %3457 = vst.msk [vmem:[%s5727_s27 + $0x48] sm:$0xf] %vm3431_vm4, %v3870_v29  ;;  %v3879_v28 = vpack.c.bf16 %v4265_v48, %v4265_v48  ;;  %v3495_v20 = vld [vmem:[%s5727_s27 + $0xc0] sm:$0x1] }
 0x32f   : > { %v2559_v53 = vpop.f32.mrf.mxu0  ;;  %v2656_v5 = vpop.f32.mrf.mxu1 }
 0x330   : > { %v3469_v56 = vsel %vm5737_vm7, %v3879_v28, %v3468_v35  ;;  %v3871_v42 = vpack.c.bf16 %v2559_v53, %v2559_v53  ;;  %v3877_v16 = vpack.c.bf16 %v2656_v5, %v2656_v5 }
 0x331   : > { %3470 = vst [vmem:[%s5727_s27 + $0x6c] sm:$0x1] %v3469_v56  ;;  %v4266_v60 = vpop.f32.mrf.mxu1 }
 0x332   : > { %3458 = vst.msk [vmem:[%s5727_s27 + $0x4c] sm:$0xf] %vm3431_vm4, %v3871_v42  ;;  %3466 = vst.msk [vmem:[%s5727_s27 + $0x64] sm:$0xf] %vm3431_vm4, %v3877_v16  ;;  %v3504_v42 = vld [vmem:[%s5727_s27 + $0xdc] sm:$0x1] }
 0x333   : > { %v2659_v63 = vpop.f32.mrf.mxu1 }
 0x334   : > { %v3878_v14 = vpack.c.bf16 %v2659_v63, %v2659_v63 }
 0x336   : > { %3467 = vst.msk [vmem:[%s5727_s27 + $0x68] sm:$0xf] %vm3431_vm4, %v3878_v14 }
 0x33d   : > { %v4277_v0 = vpop.f32.mrf.mxu0 }
 0x33e   : > { %v3882_v40 = vpack.c.bf16 %v4277_v0, %v4277_v0 }
 0x33f   : > { %v2740_v61 = vpop.f32.mrf.mxu0 }
 0x340   : > { %3473 = vst.msk [vmem:[%s5727_s27 + $0x78] sm:$0xf] %vm3431_vm4, %v3882_v40  ;;  %v3880_v6 = vpack.c.bf16 %v2740_v61, %v2740_v61 }
 0x341   : > { %v4278_v41 = vpop.f32.mrf.mxu0  ;;  %v4293_v26 = vpop.f32.mrf.mxu1 }
 0x342   : > { %3471 = vst.msk [vmem:[%s5727_s27 + $0x70] sm:$0xf] %vm3431_vm4, %v3880_v6  ;;  %v3883_v2 = vpack.c.bf16 %v4278_v41, %v4278_v41  ;;  %v3889_v55 = vpack.c.bf16 %v4293_v26, %v4293_v26 }
 0x343   : > { %v2743_v30 = vpop.f32.mrf.mxu0  ;;  %v2840_v18 = vpop.f32.mrf.mxu1 }
 0x344   : > { %3474 = vst.msk [vmem:[%s5727_s27 + $0x7c] sm:$0xf] %vm3431_vm4, %v3883_v2  ;;  %3482 = vst.msk [vmem:[%s5727_s27 + $0x94] sm:$0xf] %vm3431_vm4, %v3889_v55  ;;  %v3881_v43 = vpack.c.bf16 %v2743_v30, %v2743_v30  ;;  %v3887_v45 = vpack.c.bf16 %v2840_v18, %v2840_v18  ;;  %v3513_v2 = vld [vmem:[%s5727_s27 + $0xf8] sm:$0x1] }
 0x345   : > { %v4294_v24 = vpop.f32.mrf.mxu1 }
 0x346   : > { %3472 = vst.msk [vmem:[%s5727_s27 + $0x74] sm:$0xf] %vm3431_vm4, %v3881_v43  ;;  %3480 = vst.msk [vmem:[%s5727_s27 + $0x8c] sm:$0xf] %vm3431_vm4, %v3887_v45  ;;  %v3890_v49 = vpack.c.bf16 %v4294_v24, %v4294_v24 }
 0x347   : > { %v2843_v47 = vpop.f32.mrf.mxu1 }
 0x348   : > { %3483 = vst.msk [vmem:[%s5727_s27 + $0x98] sm:$0xf] %vm3431_vm4, %v3890_v49  ;;  %v3888_v15 = vpack.c.bf16 %v2843_v47, %v2843_v47 }
 0x349   : > { %v4281_v54 = vpop.f32.mrf.mxu0 }
 0x34a   : > { %3481 = vst.msk [vmem:[%s5727_s27 + $0x90] sm:$0xf] %vm3431_vm4, %v3888_v15  ;;  %v3886_v36 = vpack.c.bf16 %v4281_v54, %v4281_v54 }
 0x34b   : > { %v2756_v12 = vpop.f32.mrf.mxu0 }
 0x34c   : > { %v3478_v10 = vsel %vm5737_vm7, %v3886_v36, %v3477_v52  ;;  %v3884_v57 = vpack.c.bf16 %v2756_v12, %v2756_v12 }
 0x34d   : > { %3479 = vst [vmem:[%s5727_s27 + $0x88] sm:$0x1] %v3478_v10  ;;  %v4282_v19 = vpop.f32.mrf.mxu0  ;;  %v4297_v59 = vpop.f32.mrf.mxu1 }
 0x34e   : > { %3475 = vst.msk [vmem:[%s5727_s27 + $0x80] sm:$0xf] %vm3431_vm4, %v3884_v57  ;;  %v3893_v37 = vpack.c.bf16 %v4297_v59, %v4297_v59 }
 0x34f   : > { %v2759_v34 = vpop.f32.mrf.mxu0  ;;  %v2856_v58 = vpop.f32.mrf.mxu1 }
 0x350   : > { %v3487_v25 = vsel %vm5737_vm7, %v3893_v37, %v3486_v22  ;;  %v3885_v32 = vpack.c.bf16 %v2759_v34, %v2759_v34  ;;  %v3891_v21 = vpack.c.bf16 %v2856_v58, %v2856_v58 }
 0x351   : > { %3488 = vst [vmem:[%s5727_s27 + $0xa4] sm:$0x1] %v3487_v25  ;;  %v4298_v7 = vpop.f32.mrf.mxu1 }
 0x352   : > { %3476 = vst.msk [vmem:[%s5727_s27 + $0x84] sm:$0xf] %vm3431_vm4, %v3885_v32  ;;  %3484 = vst.msk [vmem:[%s5727_s27 + $0x9c] sm:$0xf] %vm3431_vm4, %v3891_v21 }
 0x353   : > { %v2859_v44 = vpop.f32.mrf.mxu1 }
 0x354   : > { %v3892_v8 = vpack.c.bf16 %v2859_v44, %v2859_v44 }
 0x356   : > { %3485 = vst.msk [vmem:[%s5727_s27 + $0xa0] sm:$0xf] %vm3431_vm4, %v3892_v8 }
 0x35d   : > { %v4309_v3 = vpop.f32.mrf.mxu0 }
 0x35e   : > { %v3896_v38 = vpack.c.bf16 %v4309_v3, %v4309_v3 }
 0x35f   : > { %v2940_v27 = vpop.f32.mrf.mxu0 }
 0x360   : > { %3491 = vst.msk [vmem:[%s5727_s27 + $0xb0] sm:$0xf] %vm3431_vm4, %v3896_v38  ;;  %v3894_v9 = vpack.c.bf16 %v2940_v27, %v2940_v27 }
 0x361   : > { %v4310_v4 = vpop.f32.mrf.mxu0  ;;  %v4325_v62 = vpop.f32.mrf.mxu1 }
 0x362   : > { %3489 = vst.msk [vmem:[%s5727_s27 + $0xa8] sm:$0xf] %vm3431_vm4, %v3894_v9  ;;  %v3897_v50 = vpack.c.bf16 %v4310_v4, %v4310_v4  ;;  %v3903_v31 = vpack.c.bf16 %v4325_v62, %v4325_v62 }
 0x363   : > { %v2943_v11 = vpop.f32.mrf.mxu0  ;;  %v3040_v39 = vpop.f32.mrf.mxu1 }
 0x364   : > { %3492 = vst.msk [vmem:[%s5727_s27 + $0xb4] sm:$0xf] %vm3431_vm4, %v3897_v50  ;;  %3500 = vst.msk [vmem:[%s5727_s27 + $0xcc] sm:$0xf] %vm3431_vm4, %v3903_v31  ;;  %v3895_v51 = vpack.c.bf16 %v2943_v11, %v2943_v11  ;;  %v3901_v33 = vpack.c.bf16 %v3040_v39, %v3040_v39 }
 0x365   : > { %v4326_v23 = vpop.f32.mrf.mxu1 }
 0x366   : > { %3490 = vst.msk [vmem:[%s5727_s27 + $0xac] sm:$0xf] %vm3431_vm4, %v3895_v51  ;;  %3498 = vst.msk [vmem:[%s5727_s27 + $0xc4] sm:$0xf] %vm3431_vm4, %v3901_v33  ;;  %v3904_v13 = vpack.c.bf16 %v4326_v23, %v4326_v23 }
 0x367   : > { %v3043_v17 = vpop.f32.mrf.mxu1 }
 0x368   : > { %3501 = vst.msk [vmem:[%s5727_s27 + $0xd0] sm:$0xf] %vm3431_vm4, %v3904_v13  ;;  %v3902_v46 = vpack.c.bf16 %v3043_v17, %v3043_v17 }
 0x369   : > { %v4313_v29 = vpop.f32.mrf.mxu0 }
 0x36a   : > { %3499 = vst.msk [vmem:[%s5727_s27 + $0xc8] sm:$0xf] %vm3431_vm4, %v3902_v46  ;;  %v3900_v48 = vpack.c.bf16 %v4313_v29, %v4313_v29 }
 0x36b   : > { %v2956_v35 = vpop.f32.mrf.mxu0 }
 0x36c   : > { %v3496_v28 = vsel %vm5737_vm7, %v3900_v48, %v3495_v20  ;;  %v3898_v53 = vpack.c.bf16 %v2956_v35, %v2956_v35 }
 0x36d   : > { %3497 = vst [vmem:[%s5727_s27 + $0xc0] sm:$0x1] %v3496_v28  ;;  %v4314_v5 = vpop.f32.mrf.mxu0  ;;  %v4329_v56 = vpop.f32.mrf.mxu1 }
 0x36e   : > { %3493 = vst.msk [vmem:[%s5727_s27 + $0xb8] sm:$0xf] %vm3431_vm4, %v3898_v53  ;;  %v3907_v16 = vpack.c.bf16 %v4329_v56, %v4329_v56 }
 0x36f   : > { %v2959_v60 = vpop.f32.mrf.mxu0  ;;  %v3056_v63 = vpop.f32.mrf.mxu1 }
 0x370   : > { %v3505_v14 = vsel %vm5737_vm7, %v3907_v16, %v3504_v42  ;;  %v3899_v0 = vpack.c.bf16 %v2959_v60, %v2959_v60  ;;  %v3905_v40 = vpack.c.bf16 %v3056_v63, %v3056_v63 }
 0x371   : > { %3506 = vst [vmem:[%s5727_s27 + $0xdc] sm:$0x1] %v3505_v14  ;;  %v4330_v61 = vpop.f32.mrf.mxu1 }
 0x372   : > { %3494 = vst.msk [vmem:[%s5727_s27 + $0xbc] sm:$0xf] %vm3431_vm4, %v3899_v0  ;;  %3502 = vst.msk [vmem:[%s5727_s27 + $0xd4] sm:$0xf] %vm3431_vm4, %v3905_v40 }
 0x373   : > { %v3059_v6 = vpop.f32.mrf.mxu1 }
 0x374   : > { %v3906_v41 = vpack.c.bf16 %v3059_v6, %v3059_v6 }
 0x376   : > { %3503 = vst.msk [vmem:[%s5727_s27 + $0xd8] sm:$0xf] %vm3431_vm4, %v3906_v41 }
 0x37f   : > { %v4345_v26 = vpop.f32.mrf.mxu1 }
 0x380   : > { %v3914_v55 = vpack.c.bf16 %v4345_v26, %v4345_v26 }
 0x381   : > { %v4341_v30 = vpop.f32.mrf.mxu0  ;;  %v3156_v18 = vpop.f32.mrf.mxu1 }
 0x382   : > { %v3514_v43 = vsel %vm5737_vm7, %v3914_v55, %v3513_v2  ;;  %v3910_v45 = vpack.c.bf16 %v4341_v30, %v4341_v30  ;;  %v3912_v24 = vpack.c.bf16 %v3156_v18, %v3156_v18 }
 0x383   : > { %3515 = vst [vmem:[%s5727_s27 + $0xf8] sm:$0x1] %v3514_v43  ;;  %v3140_v49 = vpop.f32.mrf.mxu0  ;;  %v4346_v47 = vpop.f32.mrf.mxu1 }
 0x384   : > { %3509 = vst.msk [vmem:[%s5727_s27 + $0xe8] sm:$0xf] %vm3431_vm4, %v3910_v45  ;;  %3511 = vst.msk [vmem:[%s5727_s27 + $0xf0] sm:$0xf] %vm3431_vm4, %v3912_v24  ;;  %v3908_v15 = vpack.c.bf16 %v3140_v49, %v3140_v49 }
 0x385   : > { %v4342_v54 = vpop.f32.mrf.mxu0  ;;  %v3159_v52 = vpop.f32.mrf.mxu1 }
 0x386   : > { %3507 = vst.msk [vmem:[%s5727_s27 + $0xe0] sm:$0xf] %vm3431_vm4, %v3908_v15  ;;  %v3911_v36 = vpack.c.bf16 %v4342_v54, %v4342_v54  ;;  %v3913_v1 = vpack.c.bf16 %v3159_v52, %v3159_v52 }
 0x387   : > { %v3143_v12 = vpop.f32.mrf.mxu0 }
 0x388   : > { %3510 = vst.msk [vmem:[%s5727_s27 + $0xec] sm:$0xf] %vm3431_vm4, %v3911_v36  ;;  %3512 = vst.msk [vmem:[%s5727_s27 + $0xf4] sm:$0xf] %vm3431_vm4, %v3913_v1  ;;  %v3909_v10 = vpack.c.bf16 %v3143_v12, %v3143_v12 }
 0x38a   : > { %3508 = vst.msk [vmem:[%s5727_s27 + $0xe4] sm:$0xf] %vm3431_vm4, %v3909_v10 }
 0x38b PF: > { %s13_s12 = sadd.s32 1, %s4767_s12  }
 0x38c   : > { %p10_p4 = scmp.ge.s32.totalorder %s13_s12, 4  }
 0x38e   :  { %12 = sbr.rel (!%p10_p4) target bundleno = 1 (0x1), region = 68 }

// kernel: cross_level_attention.8
= control target key start
LH: loop header
LB: loop body
LE: loop exit
PB: predicated region body
PF: predicated region fallthrough
CT: control target
= control target key end

     0   :  { %s533_s9 = smov 0   ;;  %s649_s0 = inlined_call_operand.vmem [shape: bf16[512,8], index: 0, kind: input, shape index: {}]   ;;  %s650_s1 = inlined_call_operand.vmem [shape: f32[1,8], index: 1, kind: output, shape index: {0}]   ;;  %s651_s2 = inlined_call_operand.vmem [shape: f32[1,8], index: 2, kind: output, shape index: {1}]  }
   0x1 LB: > { %s412_s10 = sadd.s32 4294967295, %s515_s9   ;;  %p415_p0 = scmp.ge.s32.totalorder %s515_s9, 1  ;;  %s515_s9 = sphi %s533_s9, %s13_s9  }
   0x2   : > { %p106_p1 = scmp.lt.s32.totalorder %s515_s9, 3 }
   0x4   : > { %p107_p2 = pnand %p415_p0, %p106_p1 }
   0x5   : > { %s416_s11 = sshll.u32 (!%p107_p2), %s412_s10, 5  ;;  %p418_p4 = scmp.ne.s32.totalorder (!%p107_p2), %s412_s10, 0 }
   0x6   : > { %110 = sbr.rel (%p107_p2) target bundleno = 105 (0x69), region = 24  ;;  %p124_p3 = scmp.lt.s32.totalorder (!%p107_p2), %s416_s11, 63 }
   0xb   : > { %s653_s11 = smov (!%p124_p3, %s416_s11), 63  ;;  %132 = sbr.rel (%p418_p4) target bundleno = 18 (0x12), region = 28 }
   0xc   : > { %s417_s12 = sshll.u32 %s653_s11, 2 }
   0xd   : > { %s544_s15 = scalar_lea.vmem %s649_s0, %s417_s12 }
  0x10   : > { %vm133_vm0 = vcmask 57344   ;;  %v517_v0 = vmov 0.0  }
  0x11   : > { %134 = vst.msk [vmem:[%s650_s1] sm:$0x1] %vm133_vm0, %v517_v0  ;;  %135 = vst.msk [vmem:[%s651_s2] sm:$0x1] %vm133_vm0, %v517_v0 }
  0x12 PF: > { %v422_v1 = vld [vmem:[%s544_s15] sm:$0xff]   ;;  %v485_v2 = vld [vmem:[%s544_s15 + $0x8] sm:$0xff]   ;;  %vm201_vm1 = vcmask 64512   ;;  %v486_v6 = vld [vmem:[%s544_s15 + $0x10] sm:$0xff]   ;;  %vm272_vm2 = vcmask 57344  }
  0x13   : > { %v423_v3 = vunpack.c.l.bf16 %v422_v1  ;;  %v424_v4 = vunpack.c.h.bf16 %v422_v1  ;;  %v427_v5 = vunpack.c.l.bf16 %v485_v2  ;;  %v428_v7 = vunpack.c.h.bf16 %v485_v2  ;;  %v487_v14 = vld [vmem:[%s544_s15 + $0x18] sm:$0xff]   ;;  %v488_v21 = vld [vmem:[%s544_s15 + $0x20] sm:$0xff]   ;;  %v489_v27 = vld [vmem:[%s544_s15 + $0x28] sm:$0xff]  }
  0x14   : > { %v431_v12 = vunpack.c.l.bf16 %v486_v6  ;;  %v432_v16 = vunpack.c.h.bf16 %v486_v6  ;;  %v435_v19 = vunpack.c.l.bf16 %v487_v14  ;;  %v436_v23 = vunpack.c.h.bf16 %v487_v14  ;;  %v490_v34 = vld [vmem:[%s544_s15 + $0x30] sm:$0xff]   ;;  %v491_v50 = vld [vmem:[%s544_s15 + $0x38] sm:$0xff]   ;;  %v492_v63 = vld [vmem:[%s544_s15 + $0x40] sm:$0xff]  }
  0x15   : > { %v202_v8 = vsel %vm201_vm1, %v423_v3, 0.0  ;;  %v203_v9 = vsel %vm201_vm1, %v424_v4, 0.0  ;;  %v205_v10 = vsel %vm201_vm1, %v427_v5, 0.0  ;;  %v207_v13 = vsel %vm201_vm1, %v428_v7, 0.0 }
  0x16   : > { %v204_v11 = vadd.f32 %v203_v9, %v202_v8  ;;  %v209_v17 = vsel %vm201_vm1, %v431_v12, 0.0  ;;  %v211_v20 = vsel %vm201_vm1, %v432_v16, 0.0  ;;  %v213_v24 = vsel %vm201_vm1, %v435_v19, 0.0 }
  0x17   : > { %v439_v26 = vunpack.c.l.bf16 %v488_v21  ;;  %v215_v28 = vsel %vm201_vm1, %v436_v23, 0.0  ;;  %v440_v30 = vunpack.c.h.bf16 %v488_v21  ;;  %v443_v32 = vunpack.c.l.bf16 %v489_v27 }
  0x18   : > { %v206_v15 = vadd.f32 %v205_v10, %v204_v11  ;;  %v275_v36 = vmul.f32 %v423_v3, %v423_v3  ;;  %v276_v37 = vmul.f32 %v424_v4, %v424_v4  ;;  %v277_v38 = vmul.f32 %v427_v5, %v427_v5 }
  0x19   : > { %v217_v31 = vsel %vm201_vm1, %v439_v26, 0.0  ;;  %v219_v35 = vsel %vm201_vm1, %v440_v30, 0.0  ;;  %v444_v39 = vunpack.c.h.bf16 %v489_v27  ;;  %v221_v41 = vsel %vm201_vm1, %v443_v32, 0.0 }
  0x1a   : > { %v208_v18 = vadd.f32 %v207_v13, %v206_v15  ;;  %v278_v42 = vmul.f32 %v428_v7, %v428_v7  ;;  %v447_v43 = vunpack.c.l.bf16 %v490_v34  ;;  %v279_v46 = vmul.f32 %v431_v12, %v431_v12  ;;  %v493_v12 = vld [vmem:[%s544_s15 + $0x48] sm:$0xff]  }
  0x1b   : > { %v223_v45 = vsel %vm201_vm1, %v444_v39, 0.0  ;;  %v307_v47 = vsel %vm201_vm1, %v275_v36, 0.0  ;;  %v308_v48 = vsel %vm201_vm1, %v276_v37, 0.0  ;;  %v310_v49 = vsel %vm201_vm1, %v277_v38, 0.0  ;;  %v495_v38 = vld [vmem:[%s544_s15 + $0x58] sm:$0xff]  }
  0x1c   : > { %v210_v22 = vadd.f32 %v209_v17, %v208_v18  ;;  %v309_v52 = vadd.f32 %v308_v48, %v307_v47  ;;  %v448_v53 = vunpack.c.h.bf16 %v490_v34  ;;  %v225_v54 = vsel %vm201_vm1, %v447_v43, 0.0 }
  0x1d   : > { %v280_v55 = vmul.f32 %v432_v16, %v432_v16  ;;  %v312_v56 = vsel %vm201_vm1, %v278_v42, 0.0  ;;  %v451_v59 = vunpack.c.l.bf16 %v491_v50  ;;  %v281_v61 = vmul.f32 %v435_v19, %v435_v19 }
  0x1e   : > { %v212_v25 = vadd.f32 %v211_v20, %v210_v22  ;;  %v311_v58 = vadd.f32 %v310_v49, %v309_v52  ;;  %v227_v60 = vsel %vm201_vm1, %v448_v53, 0.0  ;;  %v314_v62 = vsel %vm201_vm1, %v279_v46, 0.0 }
  0x1f   : > { %v452_v2 = vunpack.c.h.bf16 %v491_v50  ;;  %v229_v3 = vsel %vm201_vm1, %v451_v59, 0.0  ;;  %v282_v4 = vmul.f32 %v436_v23, %v436_v23  ;;  %v316_v5 = vsel %vm201_vm1, %v280_v55, 0.0 }
  0x20   : > { %v214_v29 = vadd.f32 %v213_v24, %v212_v25  ;;  %v313_v1 = vadd.f32 %v312_v56, %v311_v58  ;;  %v455_v8 = vunpack.c.l.bf16 %v492_v63  ;;  %v283_v10 = vmul.f32 %v439_v26, %v439_v26  ;;  %v494_v25 = vld [vmem:[%s544_s15 + $0x50] sm:$0xff]  }
  0x21   : > { %v231_v9 = vsel %vm201_vm1, %v452_v2, 0.0  ;;  %v318_v11 = vsel %vm201_vm1, %v281_v61, 0.0  ;;  %v456_v15 = vunpack.c.h.bf16 %v492_v63  ;;  %v284_v17 = vmul.f32 %v440_v30, %v440_v30 }
  0x22   : > { %v216_v33 = vadd.f32 %v215_v28, %v214_v29  ;;  %v315_v7 = vadd.f32 %v314_v62, %v313_v1  ;;  %v233_v16 = vsel %vm201_vm1, %v455_v8, 0.0  ;;  %v320_v18 = vsel %vm201_vm1, %v282_v4, 0.0 }
  0x23   : > { %v459_v21 = vunpack.c.l.bf16 %v493_v12  ;;  %v235_v22 = vsel %vm201_vm1, %v456_v15, 0.0  ;;  %v285_v23 = vmul.f32 %v443_v32, %v443_v32  ;;  %v322_v24 = vsel %vm201_vm1, %v283_v10, 0.0 }
  0x24   : > { %v218_v40 = vadd.f32 %v217_v31, %v216_v33  ;;  %v317_v14 = vadd.f32 %v316_v5, %v315_v7  ;;  %v460_v28 = vunpack.c.h.bf16 %v493_v12  ;;  %v286_v31 = vmul.f32 %v444_v39, %v444_v39 }
  0x25   : > { %v237_v29 = vsel %vm201_vm1, %v459_v21, 0.0  ;;  %v324_v30 = vsel %vm201_vm1, %v284_v17, 0.0  ;;  %v287_v37 = vmul.f32 %v447_v43, %v447_v43  ;;  %v326_v32 = vsel %vm201_vm1, %v285_v23, 0.0 }
  0x26   : > { %v220_v44 = vadd.f32 %v219_v35, %v218_v40  ;;  %v319_v20 = vadd.f32 %v318_v11, %v317_v14  ;;  %v463_v35 = vunpack.c.l.bf16 %v494_v25  ;;  %v239_v36 = vsel %vm201_vm1, %v460_v28, 0.0 }
  0x27   : > { %v464_v42 = vunpack.c.h.bf16 %v494_v25  ;;  %v328_v39 = vsel %vm201_vm1, %v286_v31, 0.0  ;;  %v467_v48 = vunpack.c.l.bf16 %v495_v38  ;;  %v289_v50 = vmul.f32 %v451_v59, %v451_v59 }
  0x28   : > { %v222_v51 = vadd.f32 %v221_v41, %v220_v44  ;;  %v321_v27 = vadd.f32 %v320_v18, %v319_v20  ;;  %v241_v44 = vsel %vm201_vm1, %v463_v35, 0.0  ;;  %v330_v43 = vsel %vm201_vm1, %v287_v37, 0.0 }
  0x29   : > { %v243_v49 = vsel %vm201_vm1, %v464_v42, 0.0  ;;  %v468_v55 = vunpack.c.h.bf16 %v495_v38  ;;  %v245_v56 = vsel %vm201_vm1, %v467_v48, 0.0  ;;  %v291_v63 = vmul.f32 %v455_v8, %v455_v8 }
  0x2a   : > { %v224_v57 = vadd.f32 %v223_v45, %v222_v51  ;;  %v323_v34 = vadd.f32 %v322_v24, %v321_v27  ;;  %v288_v45 = vmul.f32 %v448_v53, %v448_v53  ;;  %v496_v51 = vld [vmem:[%s544_s15 + $0x60] sm:$0xff]   ;;  %v334_v59 = vsel %vm201_vm1, %v289_v50, 0.0 }
  0x2b   : > { %v471_v61 = vunpack.c.l.bf16 %v496_v51  ;;  %v247_v62 = vsel %vm201_vm1, %v468_v55, 0.0  ;;  %v472_v4 = vunpack.c.h.bf16 %v496_v51  ;;  %v293_v12 = vmul.f32 %v459_v21, %v459_v21  ;;  %v499_v21 = vld [vmem:[%s544_s15 + $0x78] sm:$0xff]  }
  0x2c   : > { %v226_v0 = vadd.f32 %v225_v54, %v224_v57  ;;  %v325_v41 = vadd.f32 %v324_v30, %v323_v34  ;;  %v290_v57 = vmul.f32 %v452_v2, %v452_v2  ;;  %v332_v53 = vsel %vm201_vm1, %v288_v45, 0.0 }
  0x2d   : > { %v249_v5 = vsel %vm201_vm1, %v471_v61, 0.0  ;;  %v251_v11 = vsel %vm201_vm1, %v472_v4, 0.0  ;;  %v338_v8 = vsel %vm201_vm1, %v291_v63, 0.0  ;;  %v295_v25 = vmul.f32 %v463_v35, %v463_v35 }
  0x2e   : > { %v228_v6 = vadd.f32 %v227_v60, %v226_v0  ;;  %v327_v47 = vadd.f32 %v326_v32, %v325_v41  ;;  %v497_v0 = vld [vmem:[%s544_s15 + $0x68] sm:$0xff]   ;;  %v336_v2 = vsel %vm201_vm1, %v290_v57, 0.0  ;;  %v483_v37 = vunpack.c.l.bf16 %v499_v21 }
  0x2f   : > { %v475_v10 = vunpack.c.l.bf16 %v497_v0  ;;  %v476_v17 = vunpack.c.h.bf16 %v497_v0  ;;  %v297_v38 = vmul.f32 %v467_v48, %v467_v48  ;;  %v299_v50 = vmul.f32 %v471_v61, %v471_v61 }
  0x30   : > { %v230_v13 = vadd.f32 %v229_v3, %v228_v6  ;;  %v329_v54 = vadd.f32 %v328_v39, %v327_v47  ;;  %v292_v6 = vmul.f32 %v456_v15, %v456_v15  ;;  %v261_v45 = vsel %vm201_vm1, %v483_v37, 0.0 }
  0x31   : > { %v253_v18 = vsel %vm201_vm1, %v475_v10, 0.0  ;;  %v255_v24 = vsel %vm201_vm1, %v476_v17, 0.0  ;;  %v298_v39 = vmul.f32 %v468_v55, %v468_v55  ;;  %v300_v48 = vmul.f32 %v472_v4, %v472_v4 }
  0x32   : > { %v232_v19 = vadd.f32 %v231_v9, %v230_v13  ;;  %v331_v60 = vadd.f32 %v330_v43, %v329_v54  ;;  %v498_v13 = vld [vmem:[%s544_s15 + $0x70] sm:$0xff]   ;;  %v340_v15 = vsel %vm201_vm1, %v292_v6, 0.0  ;;  %v350_v43 = vsel %vm201_vm1, %v297_v38, 0.0 }
  0x33   : > { %v479_v23 = vunpack.c.l.bf16 %v498_v13  ;;  %v480_v31 = vunpack.c.h.bf16 %v498_v13  ;;  %v352_v54 = vsel %vm201_vm1, %v298_v39, 0.0  ;;  %v356_v63 = vsel %vm201_vm1, %v300_v48, 0.0 }
  0x34   : > { %v234_v26 = vadd.f32 %v233_v16, %v232_v19  ;;  %v333_v3 = vadd.f32 %v332_v53, %v331_v60  ;;  %v294_v19 = vmul.f32 %v460_v28, %v460_v28  ;;  %v301_v53 = vmul.f32 %v475_v10, %v475_v10 }
  0x35   : > { %v257_v30 = vsel %vm201_vm1, %v479_v23, 0.0  ;;  %v259_v32 = vsel %vm201_vm1, %v480_v31, 0.0  ;;  %v303_v61 = vmul.f32 %v479_v23, %v479_v23  ;;  %v304_v4 = vmul.f32 %v480_v31, %v480_v31 }
  0x36   : > { %v236_v33 = vadd.f32 %v235_v22, %v234_v26  ;;  %v335_v9 = vadd.f32 %v334_v59, %v333_v3  ;;  %v342_v26 = vsel %vm201_vm1, %v293_v12, 0.0  ;;  %v344_v34 = vsel %vm201_vm1, %v294_v19, 0.0 }
  0x37   : > { %v362_v10 = vsel %vm201_vm1, %v303_v61, 0.0 }
  0x38   : > { %v238_v40 = vadd.f32 %v237_v29, %v236_v33  ;;  %v337_v16 = vadd.f32 %v336_v2, %v335_v9  ;;  %v296_v33 = vmul.f32 %v464_v42, %v464_v42  ;;  %v305_v9 = vmul.f32 %v483_v37, %v483_v37 }
  0x3a   : > { %v240_v46 = vadd.f32 %v239_v36, %v238_v40  ;;  %v339_v22 = vadd.f32 %v338_v8, %v337_v16  ;;  %v346_v40 = vsel %vm201_vm1, %v295_v25, 0.0  ;;  %v200_v8 = vld [vmem:[%s650_s1] sm:$0x1] }
  0x3c   : > { %v242_v52 = vadd.f32 %v241_v44, %v240_v46  ;;  %v341_v29 = vadd.f32 %v340_v15, %v339_v22  ;;  %v484_v44 = vunpack.c.h.bf16 %v499_v21  ;;  %v348_v46 = vsel %vm201_vm1, %v296_v33, 0.0 }
  0x3e   : > { %v244_v58 = vadd.f32 %v243_v49, %v242_v52  ;;  %v343_v36 = vadd.f32 %v342_v26, %v341_v29  ;;  %v263_v49 = vsel %vm201_vm1, %v484_v44, 0.0  ;;  %v306_v13 = vmul.f32 %v484_v44, %v484_v44  ;;  %v274_v29 = vld [vmem:[%s651_s2] sm:$0x1] }
  0x40   : > { %v246_v1 = vadd.f32 %v245_v56, %v244_v58  ;;  %v345_v41 = vadd.f32 %v344_v34, %v343_v36  ;;  %v354_v58 = vsel %vm201_vm1, %v299_v50, 0.0 }
  0x42   : > { %v248_v7 = vadd.f32 %v247_v62, %v246_v1  ;;  %v347_v42 = vadd.f32 %v346_v40, %v345_v41  ;;  %v302_v62 = vmul.f32 %v476_v17, %v476_v17  ;;  %v358_v1 = vsel %vm201_vm1, %v301_v53, 0.0 }
  0x44   : > { %v250_v14 = vadd.f32 %v249_v5, %v248_v7  ;;  %v349_v52 = vadd.f32 %v348_v46, %v347_v42  ;;  %v360_v6 = vsel %vm201_vm1, %v302_v62, 0.0 }
  0x46   : > { %v252_v20 = vadd.f32 %v251_v11, %v250_v14  ;;  %v351_v57 = vadd.f32 %v350_v43, %v349_v52  ;;  %v364_v14 = vsel %vm201_vm1, %v304_v4, 0.0 }
  0x48   : > { %v254_v27 = vadd.f32 %v253_v18, %v252_v20  ;;  %v353_v60 = vadd.f32 %v352_v54, %v351_v57  ;;  %v366_v18 = vsel %vm201_vm1, %v305_v9, 0.0  ;;  %v368_v20 = vsel %vm201_vm1, %v306_v13, 0.0 }
  0x4a   : > { %v256_v28 = vadd.f32 %v255_v24, %v254_v27  ;;  %v355_v0 = vadd.f32 %v354_v58, %v353_v60 }
  0x4c   : > { %v258_v35 = vadd.f32 %v257_v30, %v256_v28  ;;  %v357_v5 = vadd.f32 %v356_v63, %v355_v0 }
  0x4e   : > { %v260_v47 = vadd.f32 %v259_v32, %v258_v35  ;;  %v359_v7 = vadd.f32 %v358_v1, %v357_v5 }
  0x50   : > { %v262_v51 = vadd.f32 %v261_v45, %v260_v47  ;;  %v361_v12 = vadd.f32 %v360_v6, %v359_v7 }
  0x52   : > { %v264_v56 = vadd.f32 %v263_v49, %v262_v51  ;;  %v363_v17 = vadd.f32 %v362_v10, %v361_v12 }
  0x54   : > { %v265_v55 = vrot.slane %v264_v56, 4  ;;  %v365_v15 = vadd.f32 %v364_v14, %v363_v17 }
  0x56   : > { %v266_v59 = vadd.f32 %v265_v55, %v264_v56  ;;  %v367_v22 = vadd.f32 %v366_v18, %v365_v15 }
  0x58   : > { %v267_v3 = vrot.slane %v266_v59, 2  ;;  %v369_v23 = vadd.f32 %v368_v20, %v367_v22 }
  0x5a   : > { %v268_v2 = vadd.f32 %v267_v3, %v266_v59  ;;  %v370_v24 = vrot.slane %v369_v23, 4 }
  0x5c   : > { %v269_v11 = vrot.slane %v268_v2, 1  ;;  %v371_v25 = vadd.f32 %v370_v24, %v369_v23 }
  0x5e   : > { %v270_v16 = vadd.f32 %v269_v11, %v268_v2  ;;  %v372_v26 = vrot.slane %v371_v25, 2 }
  0x60   : > { %v271_v19 = vadd.f32 %v270_v16, %v200_v8  ;;  %v373_v21 = vadd.f32 %v372_v26, %v371_v25 }
  0x62   : > { %273 = vst.msk [vmem:[%s650_s1] sm:$0x1] %vm272_vm2, %v271_v19  ;;  %v374_v27 = vrot.slane %v373_v21, 1 }
  0x64   : > { %v375_v31 = vadd.f32 %v374_v27, %v373_v21 }
  0x66   : > { %v376_v30 = vadd.f32 %v375_v31, %v274_v29 }
  0x68   : > { %377 = vst.msk [vmem:[%s651_s2] sm:$0x1] %vm272_vm2, %v376_v30 }
  0x69 PF: > { %s13_s9 = sadd.s32 1, %s515_s9  }
  0x6a   : > { %p10_p5 = scmp.ge.s32.totalorder %s13_s9, 4  }
  0x6c   :  { %12 = sbr.rel (!%p10_p5) target bundleno = 1 (0x1), region = 62 }

// kernel: cross_level_attention.9
= control target key start
LH: loop header
LB: loop body
LE: loop exit
PB: predicated region body
PF: predicated region fallthrough
CT: control target
= control target key end

     0   :  { %s565_s12 = smov 0   ;;  %s744_s0 = inlined_call_operand.vmem [shape: bf16[512,8], index: 0, kind: input, shape index: {}]   ;;  %s745_s1 = inlined_call_operand.vmem [shape: f32[1,8], index: 1, kind: input, shape index: {}]   ;;  %s746_s2 = inlined_call_operand.vmem [shape: f32[1,8], index: 2, kind: input, shape index: {}]   ;;  %s747_s3 = inlined_call_operand.vmem [shape: f32[512,8], index: 3, kind: output, shape index: {}]  }
   0x1 LB: > { %s437_s13 = sadd.s32 4294967295, %s543_s12   ;;  %p441_p0 = scmp.ge.s32.totalorder %s543_s12, 1  ;;  %s543_s12 = sphi %s565_s12, %s13_s12  }
   0x2   : > { %p138_p1 = scmp.lt.s32.totalorder %s543_s12, 3 }
   0x4   : > { %p139_p2 = pnand %p441_p0, %p138_p1 }
   0x5   : > { %s442_s14 = sshll.u32 (!%p139_p2), %s437_s13, 5 }
   0x6   : > { %142 = sbr.rel (%p139_p2) target bundleno = 51 (0x33), region = 32  ;;  %p163_p3 = scmp.lt.s32.totalorder (!%p139_p2), %s442_s14, 63 }
   0xb   : > { %s749_s14 = smov (!%p163_p3, %s442_s14), 63  ;;  %v584_v0 = vld [vmem:[%s745_s1] ss:$0 sm:$0xff]  ;;  %vm348_vm0 = vcmask 64512  }
   0xc   : > { %s443_s15 = sshll.u32 %s749_s14, 2  ;;  %v593_v9 = vld [vmem:[%s746_s2] ss:$0 sm:$0xff]  ;;  %s445_s23 = sshll.u32 %s749_s14, 3 }
   0xd   : > { %s579_s18 = scalar_lea.vmem %s744_s0, %s443_s15  ;;  %s611_s26 = scalar_lea.vmem %s747_s3, %s445_s23 }
   0xe   : > { %v451_v1 = vld [vmem:[%s579_s18] sm:$0xff]   ;;  %v514_v2 = vld [vmem:[%s579_s18 + $0x8] sm:$0xff]   ;;  %v515_v3 = vld [vmem:[%s579_s18 + $0x10] sm:$0xff]  }
   0xf   : > { %v452_v4 = vunpack.c.l.bf16 %v451_v1  ;;  %v453_v5 = vunpack.c.h.bf16 %v451_v1  ;;  %v456_v6 = vunpack.c.l.bf16 %v514_v2  ;;  %v457_v7 = vunpack.c.h.bf16 %v514_v2  ;;  %v516_v8 = vld [vmem:[%s579_s18 + $0x18] sm:$0xff]   ;;  %v517_v30 = vld [vmem:[%s579_s18 + $0x20] sm:$0xff]   ;;  %v518_v31 = vld [vmem:[%s579_s18 + $0x28] sm:$0xff]  }
  0x10   : > { %v460_v10 = vunpack.c.l.bf16 %v515_v3  ;;  %v461_v11 = vunpack.c.h.bf16 %v515_v3  ;;  %v464_v12 = vunpack.c.l.bf16 %v516_v8  ;;  %v465_v13 = vunpack.c.h.bf16 %v516_v8  ;;  %v519_v36 = vld [vmem:[%s579_s18 + $0x30] sm:$0xff]   ;;  %v520_v37 = vld [vmem:[%s579_s18 + $0x38] sm:$0xff]   ;;  %v521_v3 = vld [vmem:[%s579_s18 + $0x40] sm:$0xff]  }
  0x11   : > { %v245_v14 = vmul.f32 %v452_v4, %v584_v0  ;;  %v246_v15 = vmul.f32 %v453_v5, %v584_v0  ;;  %v247_v16 = vmul.f32 %v456_v6, %v584_v0  ;;  %v248_v17 = vmul.f32 %v457_v7, %v584_v0  ;;  %v522_v4 = vld [vmem:[%s579_s18 + $0x48] sm:$0xff]  }
  0x12   : > { %v249_v18 = vmul.f32 %v460_v10, %v584_v0  ;;  %v250_v19 = vmul.f32 %v461_v11, %v584_v0  ;;  %v251_v20 = vmul.f32 %v464_v12, %v584_v0  ;;  %v252_v21 = vmul.f32 %v465_v13, %v584_v0  ;;  %v523_v10 = vld [vmem:[%s579_s18 + $0x50] sm:$0xff]   ;;  %v524_v11 = vld [vmem:[%s579_s18 + $0x58] sm:$0xff]  }
  0x13   : > { %v284_v22 = vadd.f32 %v593_v9, %v245_v14  ;;  %v285_v23 = vadd.f32 %v593_v9, %v246_v15  ;;  %v286_v24 = vadd.f32 %v593_v9, %v247_v16  ;;  %v287_v25 = vadd.f32 %v593_v9, %v248_v17 }
  0x14   : > { %v288_v26 = vadd.f32 %v593_v9, %v249_v18  ;;  %v289_v27 = vadd.f32 %v593_v9, %v250_v19  ;;  %v290_v28 = vadd.f32 %v593_v9, %v251_v20  ;;  %v291_v29 = vadd.f32 %v593_v9, %v252_v21 }
  0x15   : > { %v316_v32 = vmax.f32 %v284_v22, 0.0  ;;  %v317_v33 = vmax.f32 %v285_v23, 0.0  ;;  %v318_v34 = vmax.f32 %v286_v24, 0.0  ;;  %v319_v35 = vmax.f32 %v287_v25, 0.0 }
  0x16   : > { %v320_v38 = vmax.f32 %v288_v26, 0.0  ;;  %v321_v39 = vmax.f32 %v289_v27, 0.0  ;;  %v322_v40 = vmax.f32 %v290_v28, 0.0  ;;  %v323_v41 = vmax.f32 %v291_v29, 0.0 }
  0x17   : > { %349 = vst.msk [vmem:[%s611_s26] sm:$0xff] %vm348_vm0, %v316_v32  ;;  %350 = vst.msk [vmem:[%s611_s26 + $0x8] sm:$0xff] %vm348_vm0, %v317_v33  ;;  %v468_v42 = vunpack.c.l.bf16 %v517_v30  ;;  %v469_v43 = vunpack.c.h.bf16 %v517_v30  ;;  %v472_v44 = vunpack.c.l.bf16 %v518_v31  ;;  %v473_v45 = vunpack.c.h.bf16 %v518_v31 }
  0x18   : > { %351 = vst.msk [vmem:[%s611_s26 + $0x10] sm:$0xff] %vm348_vm0, %v318_v34  ;;  %352 = vst.msk [vmem:[%s611_s26 + $0x18] sm:$0xff] %vm348_vm0, %v319_v35  ;;  %v476_v46 = vunpack.c.l.bf16 %v519_v36  ;;  %v477_v47 = vunpack.c.h.bf16 %v519_v36  ;;  %v480_v48 = vunpack.c.l.bf16 %v520_v37  ;;  %v481_v49 = vunpack.c.h.bf16 %v520_v37 }
  0x19   : > { %353 = vst.msk [vmem:[%s611_s26 + $0x20] sm:$0xff] %vm348_vm0, %v320_v38  ;;  %354 = vst.msk [vmem:[%s611_s26 + $0x28] sm:$0xff] %vm348_vm0, %v321_v39  ;;  %v253_v50 = vmul.f32 %v468_v42, %v584_v0  ;;  %v254_v51 = vmul.f32 %v469_v43, %v584_v0  ;;  %v255_v52 = vmul.f32 %v472_v44, %v584_v0  ;;  %v484_v16 = vunpack.c.l.bf16 %v521_v3 }
  0x1a   : > { %355 = vst.msk [vmem:[%s611_s26 + $0x30] sm:$0xff] %vm348_vm0, %v322_v40  ;;  %356 = vst.msk [vmem:[%s611_s26 + $0x38] sm:$0xff] %vm348_vm0, %v323_v41  ;;  %v256_v53 = vmul.f32 %v473_v45, %v584_v0  ;;  %v257_v54 = vmul.f32 %v476_v46, %v584_v0  ;;  %v258_v55 = vmul.f32 %v477_v47, %v584_v0  ;;  %v485_v17 = vunpack.c.h.bf16 %v521_v3  ;;  %v525_v40 = vld [vmem:[%s579_s18 + $0x60] sm:$0xff]   ;;  %v526_v41 = vld [vmem:[%s579_s18 + $0x68] sm:$0xff]  }
  0x1b   : > { %v259_v56 = vmul.f32 %v480_v48, %v584_v0  ;;  %v260_v57 = vmul.f32 %v481_v49, %v584_v0  ;;  %v292_v58 = vadd.f32 %v593_v9, %v253_v50  ;;  %v293_v59 = vadd.f32 %v593_v9, %v254_v51  ;;  %v527_v46 = vld [vmem:[%s579_s18 + $0x70] sm:$0xff]   ;;  %v528_v47 = vld [vmem:[%s579_s18 + $0x78] sm:$0xff]  }
  0x1c   : > { %v294_v60 = vadd.f32 %v593_v9, %v255_v52  ;;  %v295_v61 = vadd.f32 %v593_v9, %v256_v53  ;;  %v296_v62 = vadd.f32 %v593_v9, %v257_v54  ;;  %v297_v63 = vadd.f32 %v593_v9, %v258_v55 }
  0x1d   : > { %v298_v1 = vadd.f32 %v593_v9, %v259_v56  ;;  %v299_v2 = vadd.f32 %v593_v9, %v260_v57  ;;  %v324_v5 = vmax.f32 %v292_v58, 0.0  ;;  %v325_v6 = vmax.f32 %v293_v59, 0.0 }
  0x1e   : > { %v326_v7 = vmax.f32 %v294_v60, 0.0  ;;  %v327_v8 = vmax.f32 %v295_v61, 0.0  ;;  %v328_v12 = vmax.f32 %v296_v62, 0.0  ;;  %v329_v13 = vmax.f32 %v297_v63, 0.0 }
  0x1f   : > { %v330_v14 = vmax.f32 %v298_v1, 0.0  ;;  %v331_v15 = vmax.f32 %v299_v2, 0.0  ;;  %357 = vst.msk [vmem:[%s611_s26 + $0x40] sm:$0xff] %vm348_vm0, %v324_v5  ;;  %358 = vst.msk [vmem:[%s611_s26 + $0x48] sm:$0xff] %vm348_vm0, %v325_v6  ;;  %v488_v18 = vunpack.c.l.bf16 %v522_v4  ;;  %v489_v19 = vunpack.c.h.bf16 %v522_v4 }
  0x20   : > { %359 = vst.msk [vmem:[%s611_s26 + $0x50] sm:$0xff] %vm348_vm0, %v326_v7  ;;  %360 = vst.msk [vmem:[%s611_s26 + $0x58] sm:$0xff] %vm348_vm0, %v327_v8  ;;  %v492_v20 = vunpack.c.l.bf16 %v523_v10  ;;  %v493_v21 = vunpack.c.h.bf16 %v523_v10  ;;  %v496_v22 = vunpack.c.l.bf16 %v524_v11  ;;  %v497_v23 = vunpack.c.h.bf16 %v524_v11 }
  0x21   : > { %361 = vst.msk [vmem:[%s611_s26 + $0x60] sm:$0xff] %vm348_vm0, %v328_v12  ;;  %362 = vst.msk [vmem:[%s611_s26 + $0x68] sm:$0xff] %vm348_vm0, %v329_v13  ;;  %v261_v24 = vmul.f32 %v484_v16, %v584_v0  ;;  %v262_v25 = vmul.f32 %v485_v17, %v584_v0  ;;  %v263_v26 = vmul.f32 %v488_v18, %v584_v0  ;;  %v500_v52 = vunpack.c.l.bf16 %v525_v40 }
  0x22   : > { %363 = vst.msk [vmem:[%s611_s26 + $0x70] sm:$0xff] %vm348_vm0, %v330_v14  ;;  %364 = vst.msk [vmem:[%s611_s26 + $0x78] sm:$0xff] %vm348_vm0, %v331_v15  ;;  %v264_v27 = vmul.f32 %v489_v19, %v584_v0  ;;  %v265_v28 = vmul.f32 %v492_v20, %v584_v0  ;;  %v266_v29 = vmul.f32 %v493_v21, %v584_v0  ;;  %v501_v53 = vunpack.c.h.bf16 %v525_v40 }
  0x23   : > { %v267_v30 = vmul.f32 %v496_v22, %v584_v0  ;;  %v268_v31 = vmul.f32 %v497_v23, %v584_v0  ;;  %v300_v32 = vadd.f32 %v593_v9, %v261_v24  ;;  %v301_v33 = vadd.f32 %v593_v9, %v262_v25 }
  0x24   : > { %v302_v34 = vadd.f32 %v593_v9, %v263_v26  ;;  %v303_v35 = vadd.f32 %v593_v9, %v264_v27  ;;  %v304_v36 = vadd.f32 %v593_v9, %v265_v28  ;;  %v305_v37 = vadd.f32 %v593_v9, %v266_v29 }
  0x25   : > { %v306_v38 = vadd.f32 %v593_v9, %v267_v30  ;;  %v307_v39 = vadd.f32 %v593_v9, %v268_v31  ;;  %v332_v42 = vmax.f32 %v300_v32, 0.0  ;;  %v333_v43 = vmax.f32 %v301_v33, 0.0 }
  0x26   : > { %v334_v44 = vmax.f32 %v302_v34, 0.0  ;;  %v335_v45 = vmax.f32 %v303_v35, 0.0  ;;  %v336_v48 = vmax.f32 %v304_v36, 0.0  ;;  %v337_v49 = vmax.f32 %v305_v37, 0.0 }
  0x27   : > { %v338_v50 = vmax.f32 %v306_v38, 0.0  ;;  %v339_v51 = vmax.f32 %v307_v39, 0.0  ;;  %365 = vst.msk [vmem:[%s611_s26 + $0x80] sm:$0xff] %vm348_vm0, %v332_v42  ;;  %366 = vst.msk [vmem:[%s611_s26 + $0x88] sm:$0xff] %vm348_vm0, %v333_v43  ;;  %v504_v54 = vunpack.c.l.bf16 %v526_v41  ;;  %v505_v55 = vunpack.c.h.bf16 %v526_v41 }
  0x28   : > { %367 = vst.msk [vmem:[%s611_s26 + $0x90] sm:$0xff] %vm348_vm0, %v334_v44  ;;  %368 = vst.msk [vmem:[%s611_s26 + $0x98] sm:$0xff] %vm348_vm0, %v335_v45  ;;  %v508_v56 = vunpack.c.l.bf16 %v527_v46  ;;  %v509_v57 = vunpack.c.h.bf16 %v527_v46  ;;  %v512_v58 = vunpack.c.l.bf16 %v528_v47  ;;  %v513_v59 = vunpack.c.h.bf16 %v528_v47 }
  0x29   : > { %369 = vst.msk [vmem:[%s611_s26 + $0xa0] sm:$0xff] %vm348_vm0, %v336_v48  ;;  %370 = vst.msk [vmem:[%s611_s26 + $0xa8] sm:$0xff] %vm348_vm0, %v337_v49  ;;  %v269_v60 = vmul.f32 %v500_v52, %v584_v0  ;;  %v270_v61 = vmul.f32 %v501_v53, %v584_v0  ;;  %v271_v62 = vmul.f32 %v504_v54, %v584_v0 }
  0x2a   : > { %371 = vst.msk [vmem:[%s611_s26 + $0xb0] sm:$0xff] %vm348_vm0, %v338_v50  ;;  %372 = vst.msk [vmem:[%s611_s26 + $0xb8] sm:$0xff] %vm348_vm0, %v339_v51  ;;  %v272_v63 = vmul.f32 %v505_v55, %v584_v0  ;;  %v273_v1 = vmul.f32 %v508_v56, %v584_v0  ;;  %v274_v2 = vmul.f32 %v509_v57, %v584_v0 }
  0x2b   : > { %v275_v3 = vmul.f32 %v512_v58, %v584_v0  ;;  %v276_v4 = vmul.f32 %v513_v59, %v584_v0  ;;  %v308_v5 = vadd.f32 %v593_v9, %v269_v60  ;;  %v309_v6 = vadd.f32 %v593_v9, %v270_v61 }
  0x2c   : > { %v310_v7 = vadd.f32 %v593_v9, %v271_v62  ;;  %v311_v8 = vadd.f32 %v593_v9, %v272_v63  ;;  %v312_v10 = vadd.f32 %v593_v9, %v273_v1  ;;  %v313_v11 = vadd.f32 %v593_v9, %v274_v2 }
  0x2d   : > { %v314_v0 = vadd.f32 %v593_v9, %v275_v3  ;;  %v315_v12 = vadd.f32 %v593_v9, %v276_v4  ;;  %v340_v13 = vmax.f32 %v308_v5, 0.0  ;;  %v341_v14 = vmax.f32 %v309_v6, 0.0 }
  0x2e   : > { %v342_v15 = vmax.f32 %v310_v7, 0.0  ;;  %v343_v16 = vmax.f32 %v311_v8, 0.0  ;;  %v344_v17 = vmax.f32 %v312_v10, 0.0  ;;  %v345_v18 = vmax.f32 %v313_v11, 0.0 }
  0x2f   : > { %v346_v19 = vmax.f32 %v314_v0, 0.0  ;;  %v347_v20 = vmax.f32 %v315_v12, 0.0  ;;  %373 = vst.msk [vmem:[%s611_s26 + $0xc0] sm:$0xff] %vm348_vm0, %v340_v13  ;;  %374 = vst.msk [vmem:[%s611_s26 + $0xc8] sm:$0xff] %vm348_vm0, %v341_v14 }
  0x30   : > { %375 = vst.msk [vmem:[%s611_s26 + $0xd0] sm:$0xff] %vm348_vm0, %v342_v15  ;;  %376 = vst.msk [vmem:[%s611_s26 + $0xd8] sm:$0xff] %vm348_vm0, %v343_v16 }
  0x31   : > { %377 = vst.msk [vmem:[%s611_s26 + $0xe0] sm:$0xff] %vm348_vm0, %v344_v17  ;;  %378 = vst.msk [vmem:[%s611_s26 + $0xe8] sm:$0xff] %vm348_vm0, %v345_v18 }
  0x32   : > { %379 = vst.msk [vmem:[%s611_s26 + $0xf0] sm:$0xff] %vm348_vm0, %v346_v19  ;;  %380 = vst.msk [vmem:[%s611_s26 + $0xf8] sm:$0xff] %vm348_vm0, %v347_v20 }
  0x33 PF: > { %s13_s12 = sadd.s32 1, %s543_s12  }
  0x34   : > { %p10_p4 = scmp.ge.s32.totalorder %s13_s12, 4  }
  0x36   :  { %12 = sbr.rel (!%p10_p4) target bundleno = 1 (0x1), region = 62 }

</bundles_post_ra>
